<compile_context>
chip_gen: v5e
topology: v5e:2x2
jax: 0.10.0
libtpu: 0.0.40
codegen_flags: <defaults>
</compile_context>

<pallas_src>
import functools
import math

import jax
import jax.numpy as jnp
from jax.experimental import pallas as pl
from jax.experimental.pallas import tpu as pltpu


# ----------------------------------------------------------------------------
# Fused attention block kernel:
#   q = (tgt  + qpos) @ Wq + bq
#   k = (base + posk) @ Wk + bk
#   v =  base         @ Wv + bv
#   ctx = softmax(q k^T / sqrt(dh) + key_bias) v          (per head)
#   out = LayerNorm(tgt + ctx @ Wo + bo)
# One batch element per grid step.  Optionally also writes the head-averaged
# attention map (only requested for the final layer's cross-attention).
# ----------------------------------------------------------------------------
def _attn_block_kernel(*refs, nhead, scale, want_attn):
    if want_attn:
        (tgt_ref, qpos_ref, base_ref, posk_ref, bias_ref,
         wq_ref, bq_ref, wk_ref, bk_ref, wv_ref, bv_ref,
         wo_ref, bo_ref, lnw_ref, lnb_ref, o_ref, attn_ref) = refs
    else:
        (tgt_ref, qpos_ref, base_ref, posk_ref, bias_ref,
         wq_ref, bq_ref, wk_ref, bk_ref, wv_ref, bv_ref,
         wo_ref, bo_ref, lnw_ref, lnb_ref, o_ref) = refs
        attn_ref = None

    tgt = tgt_ref[0]                                     # (Lq, E) f32 (residual)
    q_in = (tgt + qpos_ref[0]).astype(jnp.bfloat16)      # (Lq, E)
    k_in = (base_ref[0] + posk_ref[0]).astype(jnp.bfloat16)   # (Lk, E)
    v_in = base_ref[0].astype(jnp.bfloat16)              # (Lk, E)

    # QKV projections fused in-kernel (bf16 operands, f32 accumulation).
    q = jnp.dot(q_in, wq_ref[...], preferred_element_type=jnp.float32) + bq_ref[...]
    k = jnp.dot(k_in, wk_ref[...], preferred_element_type=jnp.float32) + bk_ref[...]
    v = jnp.dot(v_in, wv_ref[...], preferred_element_type=jnp.float32) + bv_ref[...]

    E = q.shape[-1]
    dh = E // nhead
    bias = bias_ref[0]                                   # (1, Lk) additive bias

    ctx_heads = []
    p_sum = None
    for h in range(nhead):                               # static unrolled loop
        lo, hi = h * dh, (h + 1) * dh
        q_h = (q[:, lo:hi] * scale).astype(jnp.bfloat16)     # (Lq, dh)
        k_h = k[:, lo:hi].astype(jnp.bfloat16)               # (Lk, dh)
        v_h = v[:, lo:hi].astype(jnp.bfloat16)               # (Lk, dh)

        # s = q_h @ k_h^T   (contract over dh)
        s = jax.lax.dot_general(
            q_h, k_h,
            dimension_numbers=(((1,), (1,)), ((), ())),
            preferred_element_type=jnp.float32)              # (Lq, Lk)
        s = s + bias
        s = s - jnp.max(s, axis=-1, keepdims=True)
        e = jnp.exp(s)
        inv = pl.reciprocal(jnp.sum(e, axis=-1, keepdims=True), approx=True)
        p = e * inv                                          # (Lq, Lk)

        ctx_heads.append(
            jnp.dot(p.astype(jnp.bfloat16), v_h,
                    preferred_element_type=jnp.float32))     # (Lq, dh)
        if want_attn:
            p_sum = p if p_sum is None else p_sum + p

    ctx = jnp.concatenate(ctx_heads, axis=-1).astype(jnp.bfloat16)   # (Lq, E)
    out = (jnp.dot(ctx, wo_ref[...], preferred_element_type=jnp.float32)
           + bo_ref[...])

    # residual + LayerNorm (eps=1e-5, biased variance, matches torch)
    y = tgt + out
    mu = jnp.mean(y, axis=-1, keepdims=True)
    var = jnp.mean(jnp.square(y - mu), axis=-1, keepdims=True)
    o_ref[0] = (y - mu) * jax.lax.rsqrt(var + 1e-5) * lnw_ref[...] + lnb_ref[...]

    if want_attn:
        attn_ref[0] = p_sum * (1.0 / nhead)


def fused_attention(tgt, qpos, base, posk, key_bias, ap, ln_w, ln_b, nhead,
                    want_attn):
    """tgt/qpos: (B, Lq, E); base/posk: (B, Lk, E); key_bias: (B, 1, Lk)."""
    B, Lq, E = tgt.shape
    Lk = base.shape[1]
    dh = E // nhead

    kernel = functools.partial(
        _attn_block_kernel, nhead=nhead, scale=1.0 / math.sqrt(dh),
        want_attn=want_attn)

    out_shape = [jax.ShapeDtypeStruct((B, Lq, E), jnp.float32)]
    out_specs = [pl.BlockSpec((1, Lq, E), lambda b: (b, 0, 0))]
    if want_attn:
        out_shape.append(jax.ShapeDtypeStruct((B, Lq, Lk), jnp.float32))
        out_specs.append(pl.BlockSpec((1, Lq, Lk), lambda b: (b, 0, 0)))

    const = lambda b: (0, 0)   # weights resident across the batch grid
    res = pl.pallas_call(
        kernel,
        grid=(B,),
        in_specs=[
            pl.BlockSpec((1, Lq, E), lambda b: (b, 0, 0)),   # tgt (residual)
            pl.BlockSpec((1, Lq, E), lambda b: (b, 0, 0)),   # query pos
            pl.BlockSpec((1, Lk, E), lambda b: (b, 0, 0)),   # key/value base
            pl.BlockSpec((1, Lk, E), lambda b: (b, 0, 0)),   # key pos
            pl.BlockSpec((1, 1, Lk), lambda b: (b, 0, 0)),   # key padding bias
            pl.BlockSpec((E, E), const), pl.BlockSpec((1, E), const),   # Wq,bq
            pl.BlockSpec((E, E), const), pl.BlockSpec((1, E), const),   # Wk,bk
            pl.BlockSpec((E, E), const), pl.BlockSpec((1, E), const),   # Wv,bv
            pl.BlockSpec((E, E), const), pl.BlockSpec((1, E), const),   # Wo,bo
            pl.BlockSpec((1, E), const), pl.BlockSpec((1, E), const),   # LN w,b
        ],
        out_specs=out_specs,
        out_shape=out_shape,
        compiler_params=pltpu.CompilerParams(
            dimension_semantics=("parallel",)),
    )(tgt, qpos, base, posk, key_bias,
      ap["wq"], ap["bq"], ap["wk"], ap["bk"], ap["wv"], ap["bv"],
      ap["wo"], ap["bo"], ln_w, ln_b)

    if want_attn:
        return res[0], res[1]
    return res[0], None


# ----------------------------------------------------------------------------
# Fused FFN + residual + LayerNorm kernel (M-tiled, weights VMEM-resident)
# ----------------------------------------------------------------------------
def _ffn_ln_kernel(x_ref, w1_ref, b1_ref, w2_ref, b2_ref, lnw_ref, lnb_ref,
                   o_ref):
    x = x_ref[...]                                        # (TM, E) f32
    h = (jnp.dot(x.astype(jnp.bfloat16), w1_ref[...],
                 preferred_element_type=jnp.float32) + b1_ref[...])
    h = jnp.maximum(h, 0.0)
    y = x + (jnp.dot(h.astype(jnp.bfloat16), w2_ref[...],
                     preferred_element_type=jnp.float32) + b2_ref[...])
    mu = jnp.mean(y, axis=-1, keepdims=True)
    var = jnp.mean(jnp.square(y - mu), axis=-1, keepdims=True)
    o_ref[...] = (y - mu) * jax.lax.rsqrt(var + 1e-5) * lnw_ref[...] + lnb_ref[...]


def _layernorm_kernel(x_ref, w_ref, b_ref, o_ref):
    y = x_ref[...]
    mu = jnp.mean(y, axis=-1, keepdims=True)
    var = jnp.mean(jnp.square(y - mu), axis=-1, keepdims=True)
    o_ref[...] = (y - mu) * jax.lax.rsqrt(var + 1e-5) * w_ref[...] + b_ref[...]


def _pick_tile_m(m):
    """Largest row-tile (multiple of 8) that divides M and yields >= 2 tiles."""
    for t in (256, 128, 64, 32, 16, 8):
        if m % t == 0 and m // t >= 2:
            return t
    return m


def ffn_ln(x, w1, b1, w2, b2, ln_w, ln_b):
    M, E = x.shape
    F = w1.shape[1]
    TM = _pick_tile_m(M)
    const = lambda i: (0, 0)
    return pl.pallas_call(
        _ffn_ln_kernel,
        grid=(M // TM,),
        in_specs=[
            pl.BlockSpec((TM, E), lambda i: (i, 0)),
            pl.BlockSpec((E, F), const), pl.BlockSpec((1, F), const),
            pl.BlockSpec((F, E), const), pl.BlockSpec((1, E), const),
            pl.BlockSpec((1, E), const), pl.BlockSpec((1, E), const),
        ],
        out_specs=pl.BlockSpec((TM, E), lambda i: (i, 0)),
        out_shape=jax.ShapeDtypeStruct((M, E), jnp.float32),
        compiler_params=pltpu.CompilerParams(
            dimension_semantics=("parallel",)),
    )(x, w1, b1, w2, b2, ln_w, ln_b)


def layernorm(x, w, b):
    M, E = x.shape
    TM = _pick_tile_m(M)
    const = lambda i: (0, 0)
    return pl.pallas_call(
        _layernorm_kernel,
        grid=(M // TM,),
        in_specs=[
            pl.BlockSpec((TM, E), lambda i: (i, 0)),
            pl.BlockSpec((1, E), const), pl.BlockSpec((1, E), const),
        ],
        out_specs=pl.BlockSpec((TM, E), lambda i: (i, 0)),
        out_shape=jax.ShapeDtypeStruct((M, E), jnp.float32),
        compiler_params=pltpu.CompilerParams(
            dimension_semantics=("parallel",)),
    )(x, w, b)


# ----------------------------------------------------------------------------
# Decoder layer / full transformer forward (post-norm, relu, dropout=identity)
# ----------------------------------------------------------------------------
def decoder_layer(tgt, memory, lp, nhead, mem_bias, self_bias, pos, query_pos,
                  want_attn):
    B, Nq, E = tgt.shape

    # self-attention: q = k = tgt + query_pos, value = tgt   (+ residual + LN1)
    tgt, _ = fused_attention(tgt, query_pos, tgt, query_pos, self_bias,
                             lp["self_attn"], lp["norm1_w"], lp["norm1_b"],
                             nhead, want_attn=False)

    # cross-attention: q = tgt + query_pos, k = memory + pos, v = memory
    # (+ residual + LN2); attention map only materialized for the last layer.
    tgt, att = fused_attention(tgt, query_pos, memory, pos, mem_bias,
                               lp["cross_attn"], lp["norm2_w"], lp["norm2_b"],
                               nhead, want_attn=want_attn)

    # FFN + residual + LN3
    tgt = ffn_ln(tgt.reshape(B * Nq, E), lp["w1"], lp["b1"], lp["w2"], lp["b2"],
                 lp["norm3_w"], lp["norm3_b"]).reshape(B, Nq, E)
    return tgt, att


def transformer_forward(params, src, mask, query_embed, pos_embed, nhead):
    B, C, Hh, Ww = src.shape
    HW = Hh * Ww
    Nq = query_embed.shape[0]

    memory = src.reshape(B, C, HW).transpose(0, 2, 1)        # (B, HW, C)
    pos = pos_embed.reshape(B, C, HW).transpose(0, 2, 1)     # (B, HW, C)
    query_pos = jnp.broadcast_to(
        query_embed[None].astype(jnp.float32), (B, Nq, C))
    tgt = jnp.zeros((B, Nq, C), jnp.float32)

    # key_padding_mask: True => ignore that memory position (additive -1e9)
    mem_bias = jnp.where(mask, -1e9, 0.0).astype(jnp.float32).reshape(B, 1, HW)
    self_bias = jnp.zeros((B, 1, Nq), jnp.float32)

    att = None
    n_layers = len(params["layers"])
    for li, lp in enumerate(params["layers"]):
        want_attn = (li == n_layers - 1)
        tgt, a = decoder_layer(tgt, memory, lp, nhead, mem_bias, self_bias,
                               pos, query_pos, want_attn)
        if want_attn:
            att = a

    out = layernorm(tgt.reshape(B * Nq, C),
                    params["norm_w"], params["norm_b"]).reshape(B, Nq, C)

    hs = out[None]        # (1, B, Nq, C)   == torch hs.transpose(1, 2)
    att_out = att[None]   # (1, B, Nq, HW)  == torch att.unsqueeze(0)
    return hs, att_out


# ----------------------------------------------------------------------------
# Deterministic parameter initialization (xavier-uniform weights, zero biases).
# Matmul weights are stored (in, out) in bf16 (MXU-native, half HBM traffic);
# biases and LayerNorm parameters stay f32 and are pre-shaped to (1, D).
# ----------------------------------------------------------------------------
def _xavier(key, shape):
    fan_in, fan_out = shape
    limit = (6.0 / (fan_in + fan_out)) ** 0.5
    w = jax.random.uniform(key, shape, jnp.float32, -limit, limit)
    return w.astype(jnp.bfloat16)


def _init_attn_params(key, d_model):
    ks = jax.random.split(key, 4)
    z = jnp.zeros((1, d_model), jnp.float32)
    return dict(
        wq=_xavier(ks[0], (d_model, d_model)), bq=z,
        wk=_xavier(ks[1], (d_model, d_model)), bk=z,
        wv=_xavier(ks[2], (d_model, d_model)), bv=z,
        wo=_xavier(ks[3], (d_model, d_model)), bo=z,
    )


def init_params(key, d_model, dim_feedforward, num_layers):
    ones_d = jnp.ones((1, d_model), jnp.float32)
    zeros_d = jnp.zeros((1, d_model), jnp.float32)
    layers = []
    for _ in range(num_layers):
        key, k_sa, k_ca, k1, k2 = jax.random.split(key, 5)
        layers.append(dict(
            self_attn=_init_attn_params(k_sa, d_model),
            cross_attn=_init_attn_params(k_ca, d_model),
            w1=_xavier(k1, (d_model, dim_feedforward)),
            b1=jnp.zeros((1, dim_feedforward), jnp.float32),
            w2=_xavier(k2, (dim_feedforward, d_model)),
            b2=zeros_d,
            norm1_w=ones_d, norm1_b=zeros_d,
            norm2_w=ones_d, norm2_b=zeros_d,
            norm3_w=ones_d, norm3_b=zeros_d,
        ))
    return dict(layers=layers, norm_w=ones_d, norm_b=zeros_d)


# ----------------------------------------------------------------------------
if __name__ == "__main__":
    # Small synthetic config: d_model=32, nhead=4, 2 decoder layers, ffn=64
    B, C, Hh, Ww = 2, 32, 4, 4
    NHEAD, NQ, FF, NLAYERS = 4, 8, 64, 2

    root = jax.random.PRNGKey(0)
    k_src, k_pos, k_q, k_par = jax.random.split(root, 4)

    src = jax.random.normal(k_src, (B, C, Hh, Ww), jnp.float32)
    pos_embed = jax.random.normal(k_pos, (B, C, Hh, Ww), jnp.float32)
    query_embed = jax.random.normal(k_q, (NQ, C), jnp.float32)
    # key-padding mask: last 3 memory positions of every batch element = padding
    mask = jnp.zeros((B, Hh * Ww), dtype=bool).at[:, -3:].set(True)

    params = init_params(k_par, C, FF, NLAYERS)

    fwd = jax.jit(functools.partial(transformer_forward, nhead=NHEAD))
    hs, att = fwd(params, src, mask, query_embed, pos_embed)
    hs, att = jax.block_until_ready((hs, att))

    assert hs.shape == (1, B, NQ, C), hs.shape
    assert att.shape == (1, B, NQ, Hh * Ww), att.shape
    assert jnp.all(jnp.isfinite(hs)) and jnp.all(jnp.isfinite(att))
    # masked memory positions must receive ~zero attention weight
    assert float(jnp.max(att[..., -3:])) < 1e-6
    # attention rows are (approximately) normalized
    assert float(jnp.max(jnp.abs(jnp.sum(att, axis=-1) - 1.0))) < 1e-2
    print("KERNEL_OK")
</pallas_src>

<mosaic_0001>
module attributes {stable_mosaic.version = 11 : i64} {
  func.func @_ffn_ln_kernel(%arg0: i32, %arg1: memref<8x32xf32, #tpu.memory_space<vmem>>, %arg2: memref<32x64xbf16, #tpu.memory_space<vmem>>, %arg3: memref<1x64xf32, #tpu.memory_space<vmem>>, %arg4: memref<64x32xbf16, #tpu.memory_space<vmem>>, %arg5: memref<1x32xf32, #tpu.memory_space<vmem>>, %arg6: memref<1x32xf32, #tpu.memory_space<vmem>>, %arg7: memref<1x32xf32, #tpu.memory_space<vmem>>, %arg8: memref<8x32xf32, #tpu.memory_space<vmem>>) attributes {dimension_semantics = [#tpu.dimension_semantics<parallel>], iteration_bounds = array<i64: 2>, scalar_prefetch = 0 : i64, scratch_operands = 0 : i64, tpu.core_type = #tpu.core_type<tc>, window_params = [{transform_indices = @transform_0, window_bounds = array<i64: 8, 32>}, {pipeline_mode = #tpu.pipeline_mode<synchronous>, transform_indices = @transform_1, window_bounds = array<i64: 32, 64>}, {pipeline_mode = #tpu.pipeline_mode<synchronous>, transform_indices = @transform_2, window_bounds = array<i64: 1, 64>}, {pipeline_mode = #tpu.pipeline_mode<synchronous>, transform_indices = @transform_3, window_bounds = array<i64: 64, 32>}, {pipeline_mode = #tpu.pipeline_mode<synchronous>, transform_indices = @transform_4, window_bounds = array<i64: 1, 32>}, {pipeline_mode = #tpu.pipeline_mode<synchronous>, transform_indices = @transform_5, window_bounds = array<i64: 1, 32>}, {pipeline_mode = #tpu.pipeline_mode<synchronous>, transform_indices = @transform_6, window_bounds = array<i64: 1, 32>}, {transform_indices = @transform_7, window_bounds = array<i64: 8, 32>}]} {
    %c0 = arith.constant 0 : index
    %c0_0 = arith.constant 0 : index
    %0 = vector.load %arg1[%c0, %c0_0] : memref<8x32xf32, #tpu.memory_space<vmem>>, vector<8x32xf32>
    %1 = arith.truncf %0 : vector<8x32xf32> to vector<8x32xbf16>
    %c0_1 = arith.constant 0 : index
    %c0_2 = arith.constant 0 : index
    %2 = vector.load %arg2[%c0_1, %c0_2] : memref<32x64xbf16, #tpu.memory_space<vmem>>, vector<32x64xbf16>
    %cst = arith.constant dense<0.000000e+00> : vector<8x64xf32>
    %3 = tpu.matmul %1, %2, %cst {dimension_numbers = #tpu.dot_dimension_numbers<[1], [0], [0], [1], [0, 0, 1, 1], [], []>} : vector<8x32xbf16>, vector<32x64xbf16>, vector<8x64xf32> -> vector<8x64xf32>
    %c0_3 = arith.constant 0 : index
    %c0_4 = arith.constant 0 : index
    %4 = vector.load %arg3[%c0_3, %c0_4] : memref<1x64xf32, #tpu.memory_space<vmem>>, vector<1x64xf32>
    %5 = vector.broadcast %4 : vector<1x64xf32> to vector<8x64xf32>
    %6 = arith.addf %3, %5 : vector<8x64xf32>
    %cst_5 = arith.constant 0.000000e+00 : f32
    %7 = vector.broadcast %cst_5 : f32 to vector<8x64xf32>
    %8 = arith.maximumf %6, %7 : vector<8x64xf32>
    %9 = arith.truncf %8 : vector<8x64xf32> to vector<8x64xbf16>
    %c0_6 = arith.constant 0 : index
    %c0_7 = arith.constant 0 : index
    %10 = vector.load %arg4[%c0_6, %c0_7] : memref<64x32xbf16, #tpu.memory_space<vmem>>, vector<64x32xbf16>
    %cst_8 = arith.constant dense<0.000000e+00> : vector<8x32xf32>
    %11 = tpu.matmul %9, %10, %cst_8 {dimension_numbers = #tpu.dot_dimension_numbers<[1], [0], [0], [1], [0, 0, 1, 1], [], []>} : vector<8x64xbf16>, vector<64x32xbf16>, vector<8x32xf32> -> vector<8x32xf32>
    %c0_9 = arith.constant 0 : index
    %c0_10 = arith.constant 0 : index
    %12 = vector.load %arg5[%c0_9, %c0_10] : memref<1x32xf32, #tpu.memory_space<vmem>>, vector<1x32xf32>
    %13 = vector.broadcast %12 : vector<1x32xf32> to vector<8x32xf32>
    %14 = arith.addf %11, %13 : vector<8x32xf32>
    %15 = arith.addf %0, %14 : vector<8x32xf32>
    %cst_11 = arith.constant dense<0.000000e+00> : vector<8xf32>
    %16 = vector.multi_reduction <add>, %15, %cst_11 [1] : vector<8x32xf32> to vector<8xf32>
    %17 = vector.shape_cast %16 : vector<8xf32> to vector<8x1xf32>
    %cst_12 = arith.constant 3.200000e+01 : f32
    %18 = vector.broadcast %cst_12 : f32 to vector<8x1xf32>
    %19 = arith.divf %17, %18 : vector<8x1xf32>
    %20 = vector.broadcast %19 : vector<8x1xf32> to vector<8x32xf32>
    %21 = arith.subf %15, %20 : vector<8x32xf32>
    %22 = arith.mulf %21, %21 : vector<8x32xf32>
    %cst_13 = arith.constant dense<0.000000e+00> : vector<8xf32>
    %23 = vector.multi_reduction <add>, %22, %cst_13 [1] : vector<8x32xf32> to vector<8xf32>
    %24 = vector.shape_cast %23 : vector<8xf32> to vector<8x1xf32>
    %cst_14 = arith.constant 3.200000e+01 : f32
    %25 = vector.broadcast %cst_14 : f32 to vector<8x1xf32>
    %26 = arith.divf %24, %25 : vector<8x1xf32>
    %27 = vector.broadcast %19 : vector<8x1xf32> to vector<8x32xf32>
    %28 = arith.subf %15, %27 : vector<8x32xf32>
    %cst_15 = arith.constant 9.99999974E-6 : f32
    %29 = vector.broadcast %cst_15 : f32 to vector<8x1xf32>
    %30 = arith.addf %26, %29 : vector<8x1xf32>
    %31 = math.rsqrt %30 : vector<8x1xf32>
    %32 = vector.broadcast %31 : vector<8x1xf32> to vector<8x32xf32>
    %33 = arith.mulf %28, %32 : vector<8x32xf32>
    %c0_16 = arith.constant 0 : index
    %c0_17 = arith.constant 0 : index
    %34 = vector.load %arg6[%c0_16, %c0_17] : memref<1x32xf32, #tpu.memory_space<vmem>>, vector<1x32xf32>
    %35 = vector.broadcast %34 : vector<1x32xf32> to vector<8x32xf32>
    %36 = arith.mulf %33, %35 : vector<8x32xf32>
    %c0_18 = arith.constant 0 : index
    %c0_19 = arith.constant 0 : index
    %37 = vector.load %arg7[%c0_18, %c0_19] : memref<1x32xf32, #tpu.memory_space<vmem>>, vector<1x32xf32>
    %38 = vector.broadcast %37 : vector<1x32xf32> to vector<8x32xf32>
    %39 = arith.addf %36, %38 : vector<8x32xf32>
    %c0_20 = arith.constant 0 : index
    %c0_21 = arith.constant 0 : index
    %40 = vector.load %arg8[%c0_20, %c0_21] : memref<8x32xf32, #tpu.memory_space<vmem>>, vector<8x32xf32>
    tpu.vector_store %arg8[%c0_20, %c0_21], %39 {strides = array<i32>} : memref<8x32xf32, #tpu.memory_space<vmem>>, vector<8x32xf32>,
    return
  }
  func.func @transform_0(%arg0: i32) -> (i32, i32) {
    %c0_i32 = arith.constant 0 : i32
    %c0_i32_0 = arith.constant 0 : i32
    return %arg0, %c0_i32 : i32, i32
  }
  func.func @transform_1(%arg0: i32) -> (i32, i32) {
    %c0_i32 = arith.constant 0 : i32
    %c0_i32_0 = arith.constant 0 : i32
    %c0_i32_1 = arith.constant 0 : i32
    return %c0_i32, %c0_i32_0 : i32, i32
  }
  func.func @transform_2(%arg0: i32) -> (i32, i32) {
    %c0_i32 = arith.constant 0 : i32
    %c0_i32_0 = arith.constant 0 : i32
    %c0_i32_1 = arith.constant 0 : i32
    return %c0_i32, %c0_i32_0 : i32, i32
  }
  func.func @transform_3(%arg0: i32) -> (i32, i32) {
    %c0_i32 = arith.constant 0 : i32
    %c0_i32_0 = arith.constant 0 : i32
    %c0_i32_1 = arith.constant 0 : i32
    return %c0_i32, %c0_i32_0 : i32, i32
  }
  func.func @transform_4(%arg0: i32) -> (i32, i32) {
    %c0_i32 = arith.constant 0 : i32
    %c0_i32_0 = arith.constant 0 : i32
    %c0_i32_1 = arith.constant 0 : i32
    return %c0_i32, %c0_i32_0 : i32, i32
  }
  func.func @transform_5(%arg0: i32) -> (i32, i32) {
    %c0_i32 = arith.constant 0 : i32
    %c0_i32_0 = arith.constant 0 : i32
    %c0_i32_1 = arith.constant 0 : i32
    return %c0_i32, %c0_i32_0 : i32, i32
  }
  func.func @transform_6(%arg0: i32) -> (i32, i32) {
    %c0_i32 = arith.constant 0 : i32
    %c0_i32_0 = arith.constant 0 : i32
    %c0_i32_1 = arith.constant 0 : i32
    return %c0_i32, %c0_i32_0 : i32, i32
  }
  func.func @transform_7(%arg0: i32) -> (i32, i32) {
    %c0_i32 = arith.constant 0 : i32
    %c0_i32_0 = arith.constant 0 : i32
    return %arg0, %c0_i32 : i32, i32
  }
}

module attributes {stable_mosaic.version = 11 : i64} {
  func.func @_attn_block_kernel(%arg0: i32, %arg1: memref<1x8x32xf32, #tpu.memory_space<vmem>>, %arg2: memref<1x8x32xf32, #tpu.memory_space<vmem>>, %arg3: memref<1x8x32xf32, #tpu.memory_space<vmem>>, %arg4: memref<1x8x32xf32, #tpu.memory_space<vmem>>, %arg5: memref<1x1x8xf32, #tpu.memory_space<vmem>>, %arg6: memref<32x32xbf16, #tpu.memory_space<vmem>>, %arg7: memref<1x32xf32, #tpu.memory_space<vmem>>, %arg8: memref<32x32xbf16, #tpu.memory_space<vmem>>, %arg9: memref<1x32xf32, #tpu.memory_space<vmem>>, %arg10: memref<32x32xbf16, #tpu.memory_space<vmem>>, %arg11: memref<1x32xf32, #tpu.memory_space<vmem>>, %arg12: memref<32x32xbf16, #tpu.memory_space<vmem>>, %arg13: memref<1x32xf32, #tpu.memory_space<vmem>>, %arg14: memref<1x32xf32, #tpu.memory_space<vmem>>, %arg15: memref<1x32xf32, #tpu.memory_space<vmem>>, %arg16: memref<1x8x32xf32, #tpu.memory_space<vmem>>) attributes {dimension_semantics = [#tpu.dimension_semantics<parallel>], iteration_bounds = array<i64: 2>, scalar_prefetch = 0 : i64, scratch_operands = 0 : i64, tpu.core_type = #tpu.core_type<tc>, window_params = [{transform_indices = @transform_0, window_bounds = array<i64: 1, 8, 32>}, {transform_indices = @transform_1, window_bounds = array<i64: 1, 8, 32>}, {transform_indices = @transform_2, window_bounds = array<i64: 1, 8, 32>}, {transform_indices = @transform_3, window_bounds = array<i64: 1, 8, 32>}, {transform_indices = @transform_4, window_bounds = array<i64: 1, 1, 8>}, {pipeline_mode = #tpu.pipeline_mode<synchronous>, transform_indices = @transform_5, window_bounds = array<i64: 32, 32>}, {pipeline_mode = #tpu.pipeline_mode<synchronous>, transform_indices = @transform_6, window_bounds = array<i64: 1, 32>}, {pipeline_mode = #tpu.pipeline_mode<synchronous>, transform_indices = @transform_7, window_bounds = array<i64: 32, 32>}, {pipeline_mode = #tpu.pipeline_mode<synchronous>, transform_indices = @transform_8, window_bounds = array<i64: 1, 32>}, {pipeline_mode = #tpu.pipeline_mode<synchronous>, transform_indices = @transform_9, window_bounds = array<i64: 32, 32>}, {pipeline_mode = #tpu.pipeline_mode<synchronous>, transform_indices = @transform_10, window_bounds = array<i64: 1, 32>}, {pipeline_mode = #tpu.pipeline_mode<synchronous>, transform_indices = @transform_11, window_bounds = array<i64: 32, 32>}, {pipeline_mode = #tpu.pipeline_mode<synchronous>, transform_indices = @transform_12, window_bounds = array<i64: 1, 32>}, {pipeline_mode = #tpu.pipeline_mode<synchronous>, transform_indices = @transform_13, window_bounds = array<i64: 1, 32>}, {pipeline_mode = #tpu.pipeline_mode<synchronous>, transform_indices = @transform_14, window_bounds = array<i64: 1, 32>}, {transform_indices = @transform_15, window_bounds = array<i64: 1, 8, 32>}]} {
    %c0 = arith.constant 0 : index
    %c0_0 = arith.constant 0 : index
    %c0_1 = arith.constant 0 : index
    %0 = vector.load %arg1[%c0, %c0_0, %c0_1] : memref<1x8x32xf32, #tpu.memory_space<vmem>>, vector<1x8x32xf32>
    %1 = vector.shape_cast %0 : vector<1x8x32xf32> to vector<8x32xf32>
    %c0_2 = arith.constant 0 : index
    %c0_3 = arith.constant 0 : index
    %c0_4 = arith.constant 0 : index
    %2 = vector.load %arg2[%c0_2, %c0_3, %c0_4] : memref<1x8x32xf32, #tpu.memory_space<vmem>>, vector<1x8x32xf32>
    %3 = vector.shape_cast %2 : vector<1x8x32xf32> to vector<8x32xf32>
    %4 = arith.addf %1, %3 : vector<8x32xf32>
    %5 = arith.truncf %4 : vector<8x32xf32> to vector<8x32xbf16>
    %c0_5 = arith.constant 0 : index
    %c0_6 = arith.constant 0 : index
    %c0_7 = arith.constant 0 : index
    %6 = vector.load %arg3[%c0_5, %c0_6, %c0_7] : memref<1x8x32xf32, #tpu.memory_space<vmem>>, vector<1x8x32xf32>
    %7 = vector.shape_cast %6 : vector<1x8x32xf32> to vector<8x32xf32>
    %c0_8 = arith.constant 0 : index
    %c0_9 = arith.constant 0 : index
    %c0_10 = arith.constant 0 : index
    %8 = vector.load %arg4[%c0_8, %c0_9, %c0_10] : memref<1x8x32xf32, #tpu.memory_space<vmem>>, vector<1x8x32xf32>
    %9 = vector.shape_cast %8 : vector<1x8x32xf32> to vector<8x32xf32>
    %10 = arith.addf %7, %9 : vector<8x32xf32>
    %11 = arith.truncf %10 : vector<8x32xf32> to vector<8x32xbf16>
    %c0_11 = arith.constant 0 : index
    %c0_12 = arith.constant 0 : index
    %c0_13 = arith.constant 0 : index
    %12 = vector.load %arg3[%c0_11, %c0_12, %c0_13] : memref<1x8x32xf32, #tpu.memory_space<vmem>>, vector<1x8x32xf32>
    %13 = vector.shape_cast %12 : vector<1x8x32xf32> to vector<8x32xf32>
    %14 = arith.truncf %13 : vector<8x32xf32> to vector<8x32xbf16>
    %c0_14 = arith.constant 0 : index
    %c0_15 = arith.constant 0 : index
    %15 = vector.load %arg6[%c0_14, %c0_15] : memref<32x32xbf16, #tpu.memory_space<vmem>>, vector<32x32xbf16>
    %cst = arith.constant dense<0.000000e+00> : vector<8x32xf32>
    %16 = tpu.matmul %5, %15, %cst {dimension_numbers = #tpu.dot_dimension_numbers<[1], [0], [0], [1], [0, 0, 1, 1], [], []>} : vector<8x32xbf16>, vector<32x32xbf16>, vector<8x32xf32> -> vector<8x32xf32>
    %c0_16 = arith.constant 0 : index
    %c0_17 = arith.constant 0 : index
    %17 = vector.load %arg7[%c0_16, %c0_17] : memref<1x32xf32, #tpu.memory_space<vmem>>, vector<1x32xf32>
    %18 = vector.broadcast %17 : vector<1x32xf32> to vector<8x32xf32>
    %19 = arith.addf %16, %18 : vector<8x32xf32>
    %c0_18 = arith.constant 0 : index
    %c0_19 = arith.constant 0 : index
    %20 = vector.load %arg8[%c0_18, %c0_19] : memref<32x32xbf16, #tpu.memory_space<vmem>>, vector<32x32xbf16>
    %cst_20 = arith.constant dense<0.000000e+00> : vector<8x32xf32>
    %21 = tpu.matmul %11, %20, %cst_20 {dimension_numbers = #tpu.dot_dimension_numbers<[1], [0], [0], [1], [0, 0, 1, 1], [], []>} : vector<8x32xbf16>, vector<32x32xbf16>, vector<8x32xf32> -> vector<8x32xf32>
    %c0_21 = arith.constant 0 : index
    %c0_22 = arith.constant 0 : index
    %22 = vector.load %arg9[%c0_21, %c0_22] : memref<1x32xf32, #tpu.memory_space<vmem>>, vector<1x32xf32>
    %23 = vector.broadcast %22 : vector<1x32xf32> to vector<8x32xf32>
    %24 = arith.addf %21, %23 : vector<8x32xf32>
    %c0_23 = arith.constant 0 : index
    %c0_24 = arith.constant 0 : index
    %25 = vector.load %arg10[%c0_23, %c0_24] : memref<32x32xbf16, #tpu.memory_space<vmem>>, vector<32x32xbf16>
    %cst_25 = arith.constant dense<0.000000e+00> : vector<8x32xf32>
    %26 = tpu.matmul %14, %25, %cst_25 {dimension_numbers = #tpu.dot_dimension_numbers<[1], [0], [0], [1], [0, 0, 1, 1], [], []>} : vector<8x32xbf16>, vector<32x32xbf16>, vector<8x32xf32> -> vector<8x32xf32>
    %c0_26 = arith.constant 0 : index
    %c0_27 = arith.constant 0 : index
    %27 = vector.load %arg11[%c0_26, %c0_27] : memref<1x32xf32, #tpu.memory_space<vmem>>, vector<1x32xf32>
    %28 = vector.broadcast %27 : vector<1x32xf32> to vector<8x32xf32>
    %29 = arith.addf %26, %28 : vector<8x32xf32>
    %c0_28 = arith.constant 0 : index
    %c0_29 = arith.constant 0 : index
    %c0_30 = arith.constant 0 : index
    %30 = vector.load %arg5[%c0_28, %c0_29, %c0_30] : memref<1x1x8xf32, #tpu.memory_space<vmem>>, vector<1x1x8xf32>
    %31 = vector.shape_cast %30 : vector<1x1x8xf32> to vector<1x8xf32>
    %32 = vector.extract_strided_slice %19 {offsets = [0, 0], sizes = [8, 8], strides = [1, 1]} : vector<8x32xf32> to vector<8x8xf32>
    %cst_31 = arith.constant 0.353553385 : f32
    %33 = vector.broadcast %cst_31 : f32 to vector<8x8xf32>
    %34 = arith.mulf %32, %33 : vector<8x8xf32>
    %35 = arith.truncf %34 : vector<8x8xf32> to vector<8x8xbf16>
    %36 = vector.extract_strided_slice %24 {offsets = [0, 0], sizes = [8, 8], strides = [1, 1]} : vector<8x32xf32> to vector<8x8xf32>
    %37 = arith.truncf %36 : vector<8x8xf32> to vector<8x8xbf16>
    %38 = vector.extract_strided_slice %29 {offsets = [0, 0], sizes = [8, 8], strides = [1, 1]} : vector<8x32xf32> to vector<8x8xf32>
    %39 = arith.truncf %38 : vector<8x8xf32> to vector<8x8xbf16>
    %cst_32 = arith.constant dense<0.000000e+00> : vector<8x8xf32>
    %40 = tpu.matmul %35, %37, %cst_32 {dimension_numbers = #tpu.dot_dimension_numbers<[1], [1], [0], [0], [0, 0, 1, 0], [], []>} : vector<8x8xbf16>, vector<8x8xbf16>, vector<8x8xf32> -> vector<8x8xf32>
    %41 = vector.broadcast %31 : vector<1x8xf32> to vector<8x8xf32>
    %42 = arith.addf %40, %41 : vector<8x8xf32>
    %cst_33 = arith.constant dense<0xFF800000> : vector<8xf32>
    %43 = vector.multi_reduction <maximumf>, %42, %cst_33 [1] : vector<8x8xf32> to vector<8xf32>
    %44 = vector.shape_cast %43 : vector<8xf32> to vector<8x1xf32>
    %45 = vector.broadcast %44 : vector<8x1xf32> to vector<8x8xf32>
    %46 = arith.subf %42, %45 : vector<8x8xf32>
    %47 = math.exp %46 : vector<8x8xf32>
    %cst_34 = arith.constant dense<0.000000e+00> : vector<8xf32>
    %48 = vector.multi_reduction <add>, %47, %cst_34 [1] : vector<8x8xf32> to vector<8xf32>
    %49 = vector.shape_cast %48 : vector<8xf32> to vector<8x1xf32>
    %50 = tpu.reciprocal %49 {approx = true} : vector<8x1xf32> -> vector<8x1xf32>
    %51 = vector.broadcast %50 : vector<8x1xf32> to vector<8x8xf32>
    %52 = arith.mulf %47, %51 : vector<8x8xf32>
    %53 = arith.truncf %52 : vector<8x8xf32> to vector<8x8xbf16>
    %cst_35 = arith.constant dense<0.000000e+00> : vector<8x8xf32>
    %54 = tpu.matmul %53, %39, %cst_35 {dimension_numbers = #tpu.dot_dimension_numbers<[1], [0], [0], [1], [0, 0, 1, 1], [], []>} : vector<8x8xbf16>, vector<8x8xbf16>, vector<8x8xf32> -> vector<8x8xf32>
    %55 = vector.extract_strided_slice %19 {offsets = [0, 8], sizes = [8, 8], strides = [1, 1]} : vector<8x32xf32> to vector<8x8xf32>
    %cst_36 = arith.constant 0.353553385 : f32
    %56 = vector.broadcast %cst_36 : f32 to vector<8x8xf32>
    %57 = arith.mulf %55, %56 : vector<8x8xf32>
    %58 = arith.truncf %57 : vector<8x8xf32> to vector<8x8xbf16>
    %59 = vector.extract_strided_slice %24 {offsets = [0, 8], sizes = [8, 8], strides = [1, 1]} : vector<8x32xf32> to vector<8x8xf32>
    %60 = arith.truncf %59 : vector<8x8xf32> to vector<8x8xbf16>
    %61 = vector.extract_strided_slice %29 {offsets = [0, 8], sizes = [8, 8], strides = [1, 1]} : vector<8x32xf32> to vector<8x8xf32>
    %62 = arith.truncf %61 : vector<8x8xf32> to vector<8x8xbf16>
    %cst_37 = arith.constant dense<0.000000e+00> : vector<8x8xf32>
    %63 = tpu.matmul %58, %60, %cst_37 {dimension_numbers = #tpu.dot_dimension_numbers<[1], [1], [0], [0], [0, 0, 1, 0], [], []>} : vector<8x8xbf16>, vector<8x8xbf16>, vector<8x8xf32> -> vector<8x8xf32>
    %64 = vector.broadcast %31 : vector<1x8xf32> to vector<8x8xf32>
    %65 = arith.addf %63, %64 : vector<8x8xf32>
    %cst_38 = arith.constant dense<0xFF800000> : vector<8xf32>
    %66 = vector.multi_reduction <maximumf>, %65, %cst_38 [1] : vector<8x8xf32> to vector<8xf32>
    %67 = vector.shape_cast %66 : vector<8xf32> to vector<8x1xf32>
    %68 = vector.broadcast %67 : vector<8x1xf32> to vector<8x8xf32>
    %69 = arith.subf %65, %68 : vector<8x8xf32>
    %70 = math.exp %69 : vector<8x8xf32>
    %cst_39 = arith.constant dense<0.000000e+00> : vector<8xf32>
    %71 = vector.multi_reduction <add>, %70, %cst_39 [1] : vector<8x8xf32> to vector<8xf32>
    %72 = vector.shape_cast %71 : vector<8xf32> to vector<8x1xf32>
    %73 = tpu.reciprocal %72 {approx = true} : vector<8x1xf32> -> vector<8x1xf32>
    %74 = vector.broadcast %73 : vector<8x1xf32> to vector<8x8xf32>
    %75 = arith.mulf %70, %74 : vector<8x8xf32>
    %76 = arith.truncf %75 : vector<8x8xf32> to vector<8x8xbf16>
    %cst_40 = arith.constant dense<0.000000e+00> : vector<8x8xf32>
    %77 = tpu.matmul %76, %62, %cst_40 {dimension_numbers = #tpu.dot_dimension_numbers<[1], [0], [0], [1], [0, 0, 1, 1], [], []>} : vector<8x8xbf16>, vector<8x8xbf16>, vector<8x8xf32> -> vector<8x8xf32>
    %78 = vector.extract_strided_slice %19 {offsets = [0, 16], sizes = [8, 8], strides = [1, 1]} : vector<8x32xf32> to vector<8x8xf32>
    %cst_41 = arith.constant 0.353553385 : f32
    %79 = vector.broadcast %cst_41 : f32 to vector<8x8xf32>
    %80 = arith.mulf %78, %79 : vector<8x8xf32>
    %81 = arith.truncf %80 : vector<8x8xf32> to vector<8x8xbf16>
    %82 = vector.extract_strided_slice %24 {offsets = [0, 16], sizes = [8, 8], strides = [1, 1]} : vector<8x32xf32> to vector<8x8xf32>
    %83 = arith.truncf %82 : vector<8x8xf32> to vector<8x8xbf16>
    %84 = vector.extract_strided_slice %29 {offsets = [0, 16], sizes = [8, 8], strides = [1, 1]} : vector<8x32xf32> to vector<8x8xf32>
    %85 = arith.truncf %84 : vector<8x8xf32> to vector<8x8xbf16>
    %cst_42 = arith.constant dense<0.000000e+00> : vector<8x8xf32>
    %86 = tpu.matmul %81, %83, %cst_42 {dimension_numbers = #tpu.dot_dimension_numbers<[1], [1], [0], [0], [0, 0, 1, 0], [], []>} : vector<8x8xbf16>, vector<8x8xbf16>, vector<8x8xf32> -> vector<8x8xf32>
    %87 = vector.broadcast %31 : vector<1x8xf32> to vector<8x8xf32>
    %88 = arith.addf %86, %87 : vector<8x8xf32>
    %cst_43 = arith.constant dense<0xFF800000> : vector<8xf32>
    %89 = vector.multi_reduction <maximumf>, %88, %cst_43 [1] : vector<8x8xf32> to vector<8xf32>
    %90 = vector.shape_cast %89 : vector<8xf32> to vector<8x1xf32>
    %91 = vector.broadcast %90 : vector<8x1xf32> to vector<8x8xf32>
    %92 = arith.subf %88, %91 : vector<8x8xf32>
    %93 = math.exp %92 : vector<8x8xf32>
    %cst_44 = arith.constant dense<0.000000e+00> : vector<8xf32>
    %94 = vector.multi_reduction <add>, %93, %cst_44 [1] : vector<8x8xf32> to vector<8xf32>
    %95 = vector.shape_cast %94 : vector<8xf32> to vector<8x1xf32>
    %96 = tpu.reciprocal %95 {approx = true} : vector<8x1xf32> -> vector<8x1xf32>
    %97 = vector.broadcast %96 : vector<8x1xf32> to vector<8x8xf32>
    %98 = arith.mulf %93, %97 : vector<8x8xf32>
    %99 = arith.truncf %98 : vector<8x8xf32> to vector<8x8xbf16>
    %cst_45 = arith.constant dense<0.000000e+00> : vector<8x8xf32>
    %100 = tpu.matmul %99, %85, %cst_45 {dimension_numbers = #tpu.dot_dimension_numbers<[1], [0], [0], [1], [0, 0, 1, 1], [], []>} : vector<8x8xbf16>, vector<8x8xbf16>, vector<8x8xf32> -> vector<8x8xf32>
    %101 = vector.extract_strided_slice %19 {offsets = [0, 24], sizes = [8, 8], strides = [1, 1]} : vector<8x32xf32> to vector<8x8xf32>
    %cst_46 = arith.constant 0.353553385 : f32
    %102 = vector.broadcast %cst_46 : f32 to vector<8x8xf32>
    %103 = arith.mulf %101, %102 : vector<8x8xf32>
    %104 = arith.truncf %103 : vector<8x8xf32> to vector<8x8xbf16>
    %105 = vector.extract_strided_slice %24 {offsets = [0, 24], sizes = [8, 8], strides = [1, 1]} : vector<8x32xf32> to vector<8x8xf32>
    %106 = arith.truncf %105 : vector<8x8xf32> to vector<8x8xbf16>
    %107 = vector.extract_strided_slice %29 {offsets = [0, 24], sizes = [8, 8], strides = [1, 1]} : vector<8x32xf32> to vector<8x8xf32>
    %108 = arith.truncf %107 : vector<8x8xf32> to vector<8x8xbf16>
    %cst_47 = arith.constant dense<0.000000e+00> : vector<8x8xf32>
    %109 = tpu.matmul %104, %106, %cst_47 {dimension_numbers = #tpu.dot_dimension_numbers<[1], [1], [0], [0], [0, 0, 1, 0], [], []>} : vector<8x8xbf16>, vector<8x8xbf16>, vector<8x8xf32> -> vector<8x8xf32>
    %110 = vector.broadcast %31 : vector<1x8xf32> to vector<8x8xf32>
    %111 = arith.addf %109, %110 : vector<8x8xf32>
    %cst_48 = arith.constant dense<0xFF800000> : vector<8xf32>
    %112 = vector.multi_reduction <maximumf>, %111, %cst_48 [1] : vector<8x8xf32> to vector<8xf32>
    %113 = vector.shape_cast %112 : vector<8xf32> to vector<8x1xf32>
    %114 = vector.broadcast %113 : vector<8x1xf32> to vector<8x8xf32>
    %115 = arith.subf %111, %114 : vector<8x8xf32>
    %116 = math.exp %115 : vector<8x8xf32>
    %cst_49 = arith.constant dense<0.000000e+00> : vector<8xf32>
    %117 = vector.multi_reduction <add>, %116, %cst_49 [1] : vector<8x8xf32> to vector<8xf32>
    %118 = vector.shape_cast %117 : vector<8xf32> to vector<8x1xf32>
    %119 = tpu.reciprocal %118 {approx = true} : vector<8x1xf32> -> vector<8x1xf32>
    %120 = vector.broadcast %119 : vector<8x1xf32> to vector<8x8xf32>
    %121 = arith.mulf %116, %120 : vector<8x8xf32>
    %122 = arith.truncf %121 : vector<8x8xf32> to vector<8x8xbf16>
    %cst_50 = arith.constant dense<0.000000e+00> : vector<8x8xf32>
    %123 = tpu.matmul %122, %108, %cst_50 {dimension_numbers = #tpu.dot_dimension_numbers<[1], [0], [0], [1], [0, 0, 1, 1], [], []>} : vector<8x8xbf16>, vector<8x8xbf16>, vector<8x8xf32> -> vector<8x8xf32>
    %124 = tpu.concatenate %54, %77, %100, %123 in 1 : vector<8x8xf32>, vector<8x8xf32>, vector<8x8xf32>, vector<8x8xf32> -> vector<8x32xf32>
    %125 = arith.truncf %124 : vector<8x32xf32> to vector<8x32xbf16>
    %c0_51 = arith.constant 0 : index
    %c0_52 = arith.constant 0 : index
    %126 = vector.load %arg12[%c0_51, %c0_52] : memref<32x32xbf16, #tpu.memory_space<vmem>>, vector<32x32xbf16>
    %cst_53 = arith.constant dense<0.000000e+00> : vector<8x32xf32>
    %127 = tpu.matmul %125, %126, %cst_53 {dimension_numbers = #tpu.dot_dimension_numbers<[1], [0], [0], [1], [0, 0, 1, 1], [], []>} : vector<8x32xbf16>, vector<32x32xbf16>, vector<8x32xf32> -> vector<8x32xf32>
    %c0_54 = arith.constant 0 : index
    %c0_55 = arith.constant 0 : index
    %128 = vector.load %arg13[%c0_54, %c0_55] : memref<1x32xf32, #tpu.memory_space<vmem>>, vector<1x32xf32>
    %129 = vector.broadcast %128 : vector<1x32xf32> to vector<8x32xf32>
    %130 = arith.addf %127, %129 : vector<8x32xf32>
    %131 = arith.addf %1, %130 : vector<8x32xf32>
    %cst_56 = arith.constant dense<0.000000e+00> : vector<8xf32>
    %132 = vector.multi_reduction <add>, %131, %cst_56 [1] : vector<8x32xf32> to vector<8xf32>
    %133 = vector.shape_cast %132 : vector<8xf32> to vector<8x1xf32>
    %cst_57 = arith.constant 3.200000e+01 : f32
    %134 = vector.broadcast %cst_57 : f32 to vector<8x1xf32>
    %135 = arith.divf %133, %134 : vector<8x1xf32>
    %136 = vector.broadcast %135 : vector<8x1xf32> to vector<8x32xf32>
    %137 = arith.subf %131, %136 : vector<8x32xf32>
    %138 = arith.mulf %137, %137 : vector<8x32xf32>
    %cst_58 = arith.constant dense<0.000000e+00> : vector<8xf32>
    %139 = vector.multi_reduction <add>, %138, %cst_58 [1] : vector<8x32xf32> to vector<8xf32>
    %140 = vector.shape_cast %139 : vector<8xf32> to vector<8x1xf32>
    %cst_59 = arith.constant 3.200000e+01 : f32
    %141 = vector.broadcast %cst_59 : f32 to vector<8x1xf32>
    %142 = arith.divf %140, %141 : vector<8x1xf32>
    %143 = vector.broadcast %135 : vector<8x1xf32> to vector<8x32xf32>
    %144 = arith.subf %131, %143 : vector<8x32xf32>
    %cst_60 = arith.constant 9.99999974E-6 : f32
    %145 = vector.broadcast %cst_60 : f32 to vector<8x1xf32>
    %146 = arith.addf %142, %145 : vector<8x1xf32>
    %147 = math.rsqrt %146 : vector<8x1xf32>
    %148 = vector.broadcast %147 : vector<8x1xf32> to vector<8x32xf32>
    %149 = arith.mulf %144, %148 : vector<8x32xf32>
    %c0_61 = arith.constant 0 : index
    %c0_62 = arith.constant 0 : index
    %150 = vector.load %arg14[%c0_61, %c0_62] : memref<1x32xf32, #tpu.memory_space<vmem>>, vector<1x32xf32>
    %151 = vector.broadcast %150 : vector<1x32xf32> to vector<8x32xf32>
    %152 = arith.mulf %149, %151 : vector<8x32xf32>
    %c0_63 = arith.constant 0 : index
    %c0_64 = arith.constant 0 : index
    %153 = vector.load %arg15[%c0_63, %c0_64] : memref<1x32xf32, #tpu.memory_space<vmem>>, vector<1x32xf32>
    %154 = vector.broadcast %153 : vector<1x32xf32> to vector<8x32xf32>
    %155 = arith.addf %152, %154 : vector<8x32xf32>
    %c0_65 = arith.constant 0 : index
    %c0_66 = arith.constant 0 : index
    %c0_67 = arith.constant 0 : index
    %156 = vector.load %arg16[%c0_65, %c0_66, %c0_67] : memref<1x8x32xf32, #tpu.memory_space<vmem>>, vector<1x8x32xf32>
    %157 = vector.shape_cast %156 : vector<1x8x32xf32> to vector<8x32xf32>
    %158 = vector.shape_cast %155 : vector<8x32xf32> to vector<1x8x32xf32>
    tpu.vector_store %arg16[%c0_65, %c0_66, %c0_67], %158 {strides = array<i32>} : memref<1x8x32xf32, #tpu.memory_space<vmem>>, vector<1x8x32xf32>,
    return
  }
  func.func @transform_0(%arg0: i32) -> (i32, i32, i32) {
    %c0_i32 = arith.constant 0 : i32
    %c0_i32_0 = arith.constant 0 : i32
    %c0_i32_1 = arith.constant 0 : i32
    return %arg0, %c0_i32, %c0_i32_0 : i32, i32, i32
  }
  func.func @transform_1(%arg0: i32) -> (i32, i32, i32) {
    %c0_i32 = arith.constant 0 : i32
    %c0_i32_0 = arith.constant 0 : i32
    %c0_i32_1 = arith.constant 0 : i32
    return %arg0, %c0_i32, %c0_i32_0 : i32, i32, i32
  }
  func.func @transform_2(%arg0: i32) -> (i32, i32, i32) {
    %c0_i32 = arith.constant 0 : i32
    %c0_i32_0 = arith.constant 0 : i32
    %c0_i32_1 = arith.constant 0 : i32
    return %arg0, %c0_i32, %c0_i32_0 : i32, i32, i32
  }
  func.func @transform_3(%arg0: i32) -> (i32, i32, i32) {
    %c0_i32 = arith.constant 0 : i32
    %c0_i32_0 = arith.constant 0 : i32
    %c0_i32_1 = arith.constant 0 : i32
    return %arg0, %c0_i32, %c0_i32_0 : i32, i32, i32
  }
  func.func @transform_4(%arg0: i32) -> (i32, i32, i32) {
    %c0_i32 = arith.constant 0 : i32
    %c0_i32_0 = arith.constant 0 : i32
    %c0_i32_1 = arith.constant 0 : i32
    return %arg0, %c0_i32, %c0_i32_0 : i32, i32, i32
  }
  func.func @transform_5(%arg0: i32) -> (i32, i32) {
    %c0_i32 = arith.constant 0 : i32
    %c0_i32_0 = arith.constant 0 : i32
    %c0_i32_1 = arith.constant 0 : i32
    return %c0_i32, %c0_i32_0 : i32, i32
  }
  func.func @transform_6(%arg0: i32) -> (i32, i32) {
    %c0_i32 = arith.constant 0 : i32
    %c0_i32_0 = arith.constant 0 : i32
    %c0_i32_1 = arith.constant 0 : i32
    return %c0_i32, %c0_i32_0 : i32, i32
  }
  func.func @transform_7(%arg0: i32) -> (i32, i32) {
    %c0_i32 = arith.constant 0 : i32
    %c0_i32_0 = arith.constant 0 : i32
    %c0_i32_1 = arith.constant 0 : i32
    return %c0_i32, %c0_i32_0 : i32, i32
  }
  func.func @transform_8(%arg0: i32) -> (i32, i32) {
    %c0_i32 = arith.constant 0 : i32
    %c0_i32_0 = arith.constant 0 : i32
    %c0_i32_1 = arith.constant 0 : i32
    return %c0_i32, %c0_i32_0 : i32, i32
  }
  func.func @transform_9(%arg0: i32) -> (i32, i32) {
    %c0_i32 = arith.constant 0 : i32
    %c0_i32_0 = arith.constant 0 : i32
    %c0_i32_1 = arith.constant 0 : i32
    return %c0_i32, %c0_i32_0 : i32, i32
  }
  func.func @transform_10(%arg0: i32) -> (i32, i32) {
    %c0_i32 = arith.constant 0 : i32
    %c0_i32_0 = arith.constant 0 : i32
    %c0_i32_1 = arith.constant 0 : i32
    return %c0_i32, %c0_i32_0 : i32, i32
  }
  func.func @transform_11(%arg0: i32) -> (i32, i32) {
    %c0_i32 = arith.constant 0 : i32
    %c0_i32_0 = arith.constant 0 : i32
    %c0_i32_1 = arith.constant 0 : i32
    return %c0_i32, %c0_i32_0 : i32, i32
  }
  func.func @transform_12(%arg0: i32) -> (i32, i32) {
    %c0_i32 = arith.constant 0 : i32
    %c0_i32_0 = arith.constant 0 : i32
    %c0_i32_1 = arith.constant 0 : i32
    return %c0_i32, %c0_i32_0 : i32, i32
  }
  func.func @transform_13(%arg0: i32) -> (i32, i32) {
    %c0_i32 = arith.constant 0 : i32
    %c0_i32_0 = arith.constant 0 : i32
    %c0_i32_1 = arith.constant 0 : i32
    return %c0_i32, %c0_i32_0 : i32, i32
  }
  func.func @transform_14(%arg0: i32) -> (i32, i32) {
    %c0_i32 = arith.constant 0 : i32
    %c0_i32_0 = arith.constant 0 : i32
    %c0_i32_1 = arith.constant 0 : i32
    return %c0_i32, %c0_i32_0 : i32, i32
  }
  func.func @transform_15(%arg0: i32) -> (i32, i32, i32) {
    %c0_i32 = arith.constant 0 : i32
    %c0_i32_0 = arith.constant 0 : i32
    %c0_i32_1 = arith.constant 0 : i32
    return %arg0, %c0_i32, %c0_i32_0 : i32, i32, i32
  }
}

module attributes {stable_mosaic.version = 11 : i64} {
  func.func @_attn_block_kernel(%arg0: i32, %arg1: memref<1x8x32xf32, #tpu.memory_space<vmem>>, %arg2: memref<1x8x32xf32, #tpu.memory_space<vmem>>, %arg3: memref<1x16x32xf32, #tpu.memory_space<vmem>>, %arg4: memref<1x16x32xf32, #tpu.memory_space<vmem>>, %arg5: memref<1x1x16xf32, #tpu.memory_space<vmem>>, %arg6: memref<32x32xbf16, #tpu.memory_space<vmem>>, %arg7: memref<1x32xf32, #tpu.memory_space<vmem>>, %arg8: memref<32x32xbf16, #tpu.memory_space<vmem>>, %arg9: memref<1x32xf32, #tpu.memory_space<vmem>>, %arg10: memref<32x32xbf16, #tpu.memory_space<vmem>>, %arg11: memref<1x32xf32, #tpu.memory_space<vmem>>, %arg12: memref<32x32xbf16, #tpu.memory_space<vmem>>, %arg13: memref<1x32xf32, #tpu.memory_space<vmem>>, %arg14: memref<1x32xf32, #tpu.memory_space<vmem>>, %arg15: memref<1x32xf32, #tpu.memory_space<vmem>>, %arg16: memref<1x8x32xf32, #tpu.memory_space<vmem>>) attributes {dimension_semantics = [#tpu.dimension_semantics<parallel>], iteration_bounds = array<i64: 2>, scalar_prefetch = 0 : i64, scratch_operands = 0 : i64, tpu.core_type = #tpu.core_type<tc>, window_params = [{transform_indices = @transform_0, window_bounds = array<i64: 1, 8, 32>}, {transform_indices = @transform_1, window_bounds = array<i64: 1, 8, 32>}, {transform_indices = @transform_2, window_bounds = array<i64: 1, 16, 32>}, {transform_indices = @transform_3, window_bounds = array<i64: 1, 16, 32>}, {transform_indices = @transform_4, window_bounds = array<i64: 1, 1, 16>}, {pipeline_mode = #tpu.pipeline_mode<synchronous>, transform_indices = @transform_5, window_bounds = array<i64: 32, 32>}, {pipeline_mode = #tpu.pipeline_mode<synchronous>, transform_indices = @transform_6, window_bounds = array<i64: 1, 32>}, {pipeline_mode = #tpu.pipeline_mode<synchronous>, transform_indices = @transform_7, window_bounds = array<i64: 32, 32>}, {pipeline_mode = #tpu.pipeline_mode<synchronous>, transform_indices = @transform_8, window_bounds = array<i64: 1, 32>}, {pipeline_mode = #tpu.pipeline_mode<synchronous>, transform_indices = @transform_9, window_bounds = array<i64: 32, 32>}, {pipeline_mode = #tpu.pipeline_mode<synchronous>, transform_indices = @transform_10, window_bounds = array<i64: 1, 32>}, {pipeline_mode = #tpu.pipeline_mode<synchronous>, transform_indices = @transform_11, window_bounds = array<i64: 32, 32>}, {pipeline_mode = #tpu.pipeline_mode<synchronous>, transform_indices = @transform_12, window_bounds = array<i64: 1, 32>}, {pipeline_mode = #tpu.pipeline_mode<synchronous>, transform_indices = @transform_13, window_bounds = array<i64: 1, 32>}, {pipeline_mode = #tpu.pipeline_mode<synchronous>, transform_indices = @transform_14, window_bounds = array<i64: 1, 32>}, {transform_indices = @transform_15, window_bounds = array<i64: 1, 8, 32>}]} {
    %c0 = arith.constant 0 : index
    %c0_0 = arith.constant 0 : index
    %c0_1 = arith.constant 0 : index
    %0 = vector.load %arg1[%c0, %c0_0, %c0_1] : memref<1x8x32xf32, #tpu.memory_space<vmem>>, vector<1x8x32xf32>
    %1 = vector.shape_cast %0 : vector<1x8x32xf32> to vector<8x32xf32>
    %c0_2 = arith.constant 0 : index
    %c0_3 = arith.constant 0 : index
    %c0_4 = arith.constant 0 : index
    %2 = vector.load %arg2[%c0_2, %c0_3, %c0_4] : memref<1x8x32xf32, #tpu.memory_space<vmem>>, vector<1x8x32xf32>
    %3 = vector.shape_cast %2 : vector<1x8x32xf32> to vector<8x32xf32>
    %4 = arith.addf %1, %3 : vector<8x32xf32>
    %5 = arith.truncf %4 : vector<8x32xf32> to vector<8x32xbf16>
    %c0_5 = arith.constant 0 : index
    %c0_6 = arith.constant 0 : index
    %c0_7 = arith.constant 0 : index
    %6 = vector.load %arg3[%c0_5, %c0_6, %c0_7] : memref<1x16x32xf32, #tpu.memory_space<vmem>>, vector<1x16x32xf32>
    %7 = vector.shape_cast %6 : vector<1x16x32xf32> to vector<16x32xf32>
    %c0_8 = arith.constant 0 : index
    %c0_9 = arith.constant 0 : index
    %c0_10 = arith.constant 0 : index
    %8 = vector.load %arg4[%c0_8, %c0_9, %c0_10] : memref<1x16x32xf32, #tpu.memory_space<vmem>>, vector<1x16x32xf32>
    %9 = vector.shape_cast %8 : vector<1x16x32xf32> to vector<16x32xf32>
    %10 = arith.addf %7, %9 : vector<16x32xf32>
    %11 = arith.truncf %10 : vector<16x32xf32> to vector<16x32xbf16>
    %c0_11 = arith.constant 0 : index
    %c0_12 = arith.constant 0 : index
    %c0_13 = arith.constant 0 : index
    %12 = vector.load %arg3[%c0_11, %c0_12, %c0_13] : memref<1x16x32xf32, #tpu.memory_space<vmem>>, vector<1x16x32xf32>
    %13 = vector.shape_cast %12 : vector<1x16x32xf32> to vector<16x32xf32>
    %14 = arith.truncf %13 : vector<16x32xf32> to vector<16x32xbf16>
    %c0_14 = arith.constant 0 : index
    %c0_15 = arith.constant 0 : index
    %15 = vector.load %arg6[%c0_14, %c0_15] : memref<32x32xbf16, #tpu.memory_space<vmem>>, vector<32x32xbf16>
    %cst = arith.constant dense<0.000000e+00> : vector<8x32xf32>
    %16 = tpu.matmul %5, %15, %cst {dimension_numbers = #tpu.dot_dimension_numbers<[1], [0], [0], [1], [0, 0, 1, 1], [], []>} : vector<8x32xbf16>, vector<32x32xbf16>, vector<8x32xf32> -> vector<8x32xf32>
    %c0_16 = arith.constant 0 : index
    %c0_17 = arith.constant 0 : index
    %17 = vector.load %arg7[%c0_16, %c0_17] : memref<1x32xf32, #tpu.memory_space<vmem>>, vector<1x32xf32>
    %18 = vector.broadcast %17 : vector<1x32xf32> to vector<8x32xf32>
    %19 = arith.addf %16, %18 : vector<8x32xf32>
    %c0_18 = arith.constant 0 : index
    %c0_19 = arith.constant 0 : index
    %20 = vector.load %arg8[%c0_18, %c0_19] : memref<32x32xbf16, #tpu.memory_space<vmem>>, vector<32x32xbf16>
    %cst_20 = arith.constant dense<0.000000e+00> : vector<16x32xf32>
    %21 = tpu.matmul %11, %20, %cst_20 {dimension_numbers = #tpu.dot_dimension_numbers<[1], [0], [0], [1], [0, 0, 1, 1], [], []>} : vector<16x32xbf16>, vector<32x32xbf16>, vector<16x32xf32> -> vector<16x32xf32>
    %c0_21 = arith.constant 0 : index
    %c0_22 = arith.constant 0 : index
    %22 = vector.load %arg9[%c0_21, %c0_22] : memref<1x32xf32, #tpu.memory_space<vmem>>, vector<1x32xf32>
    %23 = vector.broadcast %22 : vector<1x32xf32> to vector<16x32xf32>
    %24 = arith.addf %21, %23 : vector<16x32xf32>
    %c0_23 = arith.constant 0 : index
    %c0_24 = arith.constant 0 : index
    %25 = vector.load %arg10[%c0_23, %c0_24] : memref<32x32xbf16, #tpu.memory_space<vmem>>, vector<32x32xbf16>
    %cst_25 = arith.constant dense<0.000000e+00> : vector<16x32xf32>
    %26 = tpu.matmul %14, %25, %cst_25 {dimension_numbers = #tpu.dot_dimension_numbers<[1], [0], [0], [1], [0, 0, 1, 1], [], []>} : vector<16x32xbf16>, vector<32x32xbf16>, vector<16x32xf32> -> vector<16x32xf32>
    %c0_26 = arith.constant 0 : index
    %c0_27 = arith.constant 0 : index
    %27 = vector.load %arg11[%c0_26, %c0_27] : memref<1x32xf32, #tpu.memory_space<vmem>>, vector<1x32xf32>
    %28 = vector.broadcast %27 : vector<1x32xf32> to vector<16x32xf32>
    %29 = arith.addf %26, %28 : vector<16x32xf32>
    %c0_28 = arith.constant 0 : index
    %c0_29 = arith.constant 0 : index
    %c0_30 = arith.constant 0 : index
    %30 = vector.load %arg5[%c0_28, %c0_29, %c0_30] : memref<1x1x16xf32, #tpu.memory_space<vmem>>, vector<1x1x16xf32>
    %31 = vector.shape_cast %30 : vector<1x1x16xf32> to vector<1x16xf32>
    %32 = vector.extract_strided_slice %19 {offsets = [0, 0], sizes = [8, 8], strides = [1, 1]} : vector<8x32xf32> to vector<8x8xf32>
    %cst_31 = arith.constant 0.353553385 : f32
    %33 = vector.broadcast %cst_31 : f32 to vector<8x8xf32>
    %34 = arith.mulf %32, %33 : vector<8x8xf32>
    %35 = arith.truncf %34 : vector<8x8xf32> to vector<8x8xbf16>
    %36 = vector.extract_strided_slice %24 {offsets = [0, 0], sizes = [16, 8], strides = [1, 1]} : vector<16x32xf32> to vector<16x8xf32>
    %37 = arith.truncf %36 : vector<16x8xf32> to vector<16x8xbf16>
    %38 = vector.extract_strided_slice %29 {offsets = [0, 0], sizes = [16, 8], strides = [1, 1]} : vector<16x32xf32> to vector<16x8xf32>
    %39 = arith.truncf %38 : vector<16x8xf32> to vector<16x8xbf16>
    %cst_32 = arith.constant dense<0.000000e+00> : vector<8x16xf32>
    %40 = tpu.matmul %35, %37, %cst_32 {dimension_numbers = #tpu.dot_dimension_numbers<[1], [1], [0], [0], [0, 0, 1, 0], [], []>} : vector<8x8xbf16>, vector<16x8xbf16>, vector<8x16xf32> -> vector<8x16xf32>
    %41 = vector.broadcast %31 : vector<1x16xf32> to vector<8x16xf32>
    %42 = arith.addf %40, %41 : vector<8x16xf32>
    %cst_33 = arith.constant dense<0xFF800000> : vector<8xf32>
    %43 = vector.multi_reduction <maximumf>, %42, %cst_33 [1] : vector<8x16xf32> to vector<8xf32>
    %44 = vector.shape_cast %43 : vector<8xf32> to vector<8x1xf32>
    %45 = vector.broadcast %44 : vector<8x1xf32> to vector<8x16xf32>
    %46 = arith.subf %42, %45 : vector<8x16xf32>
    %47 = math.exp %46 : vector<8x16xf32>
    %cst_34 = arith.constant dense<0.000000e+00> : vector<8xf32>
    %48 = vector.multi_reduction <add>, %47, %cst_34 [1] : vector<8x16xf32> to vector<8xf32>
    %49 = vector.shape_cast %48 : vector<8xf32> to vector<8x1xf32>
    %50 = tpu.reciprocal %49 {approx = true} : vector<8x1xf32> -> vector<8x1xf32>
    %51 = vector.broadcast %50 : vector<8x1xf32> to vector<8x16xf32>
    %52 = arith.mulf %47, %51 : vector<8x16xf32>
    %53 = arith.truncf %52 : vector<8x16xf32> to vector<8x16xbf16>
    %cst_35 = arith.constant dense<0.000000e+00> : vector<8x8xf32>
    %54 = tpu.matmul %53, %39, %cst_35 {dimension_numbers = #tpu.dot_dimension_numbers<[1], [0], [0], [1], [0, 0, 1, 1], [], []>} : vector<8x16xbf16>, vector<16x8xbf16>, vector<8x8xf32> -> vector<8x8xf32>
    %55 = vector.extract_strided_slice %19 {offsets = [0, 8], sizes = [8, 8], strides = [1, 1]} : vector<8x32xf32> to vector<8x8xf32>
    %cst_36 = arith.constant 0.353553385 : f32
    %56 = vector.broadcast %cst_36 : f32 to vector<8x8xf32>
    %57 = arith.mulf %55, %56 : vector<8x8xf32>
    %58 = arith.truncf %57 : vector<8x8xf32> to vector<8x8xbf16>
    %59 = vector.extract_strided_slice %24 {offsets = [0, 8], sizes = [16, 8], strides = [1, 1]} : vector<16x32xf32> to vector<16x8xf32>
    %60 = arith.truncf %59 : vector<16x8xf32> to vector<16x8xbf16>
    %61 = vector.extract_strided_slice %29 {offsets = [0, 8], sizes = [16, 8], strides = [1, 1]} : vector<16x32xf32> to vector<16x8xf32>
    %62 = arith.truncf %61 : vector<16x8xf32> to vector<16x8xbf16>
    %cst_37 = arith.constant dense<0.000000e+00> : vector<8x16xf32>
    %63 = tpu.matmul %58, %60, %cst_37 {dimension_numbers = #tpu.dot_dimension_numbers<[1], [1], [0], [0], [0, 0, 1, 0], [], []>} : vector<8x8xbf16>, vector<16x8xbf16>, vector<8x16xf32> -> vector<8x16xf32>
    %64 = vector.broadcast %31 : vector<1x16xf32> to vector<8x16xf32>
    %65 = arith.addf %63, %64 : vector<8x16xf32>
    %cst_38 = arith.constant dense<0xFF800000> : vector<8xf32>
    %66 = vector.multi_reduction <maximumf>, %65, %cst_38 [1] : vector<8x16xf32> to vector<8xf32>
    %67 = vector.shape_cast %66 : vector<8xf32> to vector<8x1xf32>
    %68 = vector.broadcast %67 : vector<8x1xf32> to vector<8x16xf32>
    %69 = arith.subf %65, %68 : vector<8x16xf32>
    %70 = math.exp %69 : vector<8x16xf32>
    %cst_39 = arith.constant dense<0.000000e+00> : vector<8xf32>
    %71 = vector.multi_reduction <add>, %70, %cst_39 [1] : vector<8x16xf32> to vector<8xf32>
    %72 = vector.shape_cast %71 : vector<8xf32> to vector<8x1xf32>
    %73 = tpu.reciprocal %72 {approx = true} : vector<8x1xf32> -> vector<8x1xf32>
    %74 = vector.broadcast %73 : vector<8x1xf32> to vector<8x16xf32>
    %75 = arith.mulf %70, %74 : vector<8x16xf32>
    %76 = arith.truncf %75 : vector<8x16xf32> to vector<8x16xbf16>
    %cst_40 = arith.constant dense<0.000000e+00> : vector<8x8xf32>
    %77 = tpu.matmul %76, %62, %cst_40 {dimension_numbers = #tpu.dot_dimension_numbers<[1], [0], [0], [1], [0, 0, 1, 1], [], []>} : vector<8x16xbf16>, vector<16x8xbf16>, vector<8x8xf32> -> vector<8x8xf32>
    %78 = vector.extract_strided_slice %19 {offsets = [0, 16], sizes = [8, 8], strides = [1, 1]} : vector<8x32xf32> to vector<8x8xf32>
    %cst_41 = arith.constant 0.353553385 : f32
    %79 = vector.broadcast %cst_41 : f32 to vector<8x8xf32>
    %80 = arith.mulf %78, %79 : vector<8x8xf32>
    %81 = arith.truncf %80 : vector<8x8xf32> to vector<8x8xbf16>
    %82 = vector.extract_strided_slice %24 {offsets = [0, 16], sizes = [16, 8], strides = [1, 1]} : vector<16x32xf32> to vector<16x8xf32>
    %83 = arith.truncf %82 : vector<16x8xf32> to vector<16x8xbf16>
    %84 = vector.extract_strided_slice %29 {offsets = [0, 16], sizes = [16, 8], strides = [1, 1]} : vector<16x32xf32> to vector<16x8xf32>
    %85 = arith.truncf %84 : vector<16x8xf32> to vector<16x8xbf16>
    %cst_42 = arith.constant dense<0.000000e+00> : vector<8x16xf32>
    %86 = tpu.matmul %81, %83, %cst_42 {dimension_numbers = #tpu.dot_dimension_numbers<[1], [1], [0], [0], [0, 0, 1, 0], [], []>} : vector<8x8xbf16>, vector<16x8xbf16>, vector<8x16xf32> -> vector<8x16xf32>
    %87 = vector.broadcast %31 : vector<1x16xf32> to vector<8x16xf32>
    %88 = arith.addf %86, %87 : vector<8x16xf32>
    %cst_43 = arith.constant dense<0xFF800000> : vector<8xf32>
    %89 = vector.multi_reduction <maximumf>, %88, %cst_43 [1] : vector<8x16xf32> to vector<8xf32>
    %90 = vector.shape_cast %89 : vector<8xf32> to vector<8x1xf32>
    %91 = vector.broadcast %90 : vector<8x1xf32> to vector<8x16xf32>
    %92 = arith.subf %88, %91 : vector<8x16xf32>
    %93 = math.exp %92 : vector<8x16xf32>
    %cst_44 = arith.constant dense<0.000000e+00> : vector<8xf32>
    %94 = vector.multi_reduction <add>, %93, %cst_44 [1] : vector<8x16xf32> to vector<8xf32>
    %95 = vector.shape_cast %94 : vector<8xf32> to vector<8x1xf32>
    %96 = tpu.reciprocal %95 {approx = true} : vector<8x1xf32> -> vector<8x1xf32>
    %97 = vector.broadcast %96 : vector<8x1xf32> to vector<8x16xf32>
    %98 = arith.mulf %93, %97 : vector<8x16xf32>
    %99 = arith.truncf %98 : vector<8x16xf32> to vector<8x16xbf16>
    %cst_45 = arith.constant dense<0.000000e+00> : vector<8x8xf32>
    %100 = tpu.matmul %99, %85, %cst_45 {dimension_numbers = #tpu.dot_dimension_numbers<[1], [0], [0], [1], [0, 0, 1, 1], [], []>} : vector<8x16xbf16>, vector<16x8xbf16>, vector<8x8xf32> -> vector<8x8xf32>
    %101 = vector.extract_strided_slice %19 {offsets = [0, 24], sizes = [8, 8], strides = [1, 1]} : vector<8x32xf32> to vector<8x8xf32>
    %cst_46 = arith.constant 0.353553385 : f32
    %102 = vector.broadcast %cst_46 : f32 to vector<8x8xf32>
    %103 = arith.mulf %101, %102 : vector<8x8xf32>
    %104 = arith.truncf %103 : vector<8x8xf32> to vector<8x8xbf16>
    %105 = vector.extract_strided_slice %24 {offsets = [0, 24], sizes = [16, 8], strides = [1, 1]} : vector<16x32xf32> to vector<16x8xf32>
    %106 = arith.truncf %105 : vector<16x8xf32> to vector<16x8xbf16>
    %107 = vector.extract_strided_slice %29 {offsets = [0, 24], sizes = [16, 8], strides = [1, 1]} : vector<16x32xf32> to vector<16x8xf32>
    %108 = arith.truncf %107 : vector<16x8xf32> to vector<16x8xbf16>
    %cst_47 = arith.constant dense<0.000000e+00> : vector<8x16xf32>
    %109 = tpu.matmul %104, %106, %cst_47 {dimension_numbers = #tpu.dot_dimension_numbers<[1], [1], [0], [0], [0, 0, 1, 0], [], []>} : vector<8x8xbf16>, vector<16x8xbf16>, vector<8x16xf32> -> vector<8x16xf32>
    %110 = vector.broadcast %31 : vector<1x16xf32> to vector<8x16xf32>
    %111 = arith.addf %109, %110 : vector<8x16xf32>
    %cst_48 = arith.constant dense<0xFF800000> : vector<8xf32>
    %112 = vector.multi_reduction <maximumf>, %111, %cst_48 [1] : vector<8x16xf32> to vector<8xf32>
    %113 = vector.shape_cast %112 : vector<8xf32> to vector<8x1xf32>
    %114 = vector.broadcast %113 : vector<8x1xf32> to vector<8x16xf32>
    %115 = arith.subf %111, %114 : vector<8x16xf32>
    %116 = math.exp %115 : vector<8x16xf32>
    %cst_49 = arith.constant dense<0.000000e+00> : vector<8xf32>
    %117 = vector.multi_reduction <add>, %116, %cst_49 [1] : vector<8x16xf32> to vector<8xf32>
    %118 = vector.shape_cast %117 : vector<8xf32> to vector<8x1xf32>
    %119 = tpu.reciprocal %118 {approx = true} : vector<8x1xf32> -> vector<8x1xf32>
    %120 = vector.broadcast %119 : vector<8x1xf32> to vector<8x16xf32>
    %121 = arith.mulf %116, %120 : vector<8x16xf32>
    %122 = arith.truncf %121 : vector<8x16xf32> to vector<8x16xbf16>
    %cst_50 = arith.constant dense<0.000000e+00> : vector<8x8xf32>
    %123 = tpu.matmul %122, %108, %cst_50 {dimension_numbers = #tpu.dot_dimension_numbers<[1], [0], [0], [1], [0, 0, 1, 1], [], []>} : vector<8x16xbf16>, vector<16x8xbf16>, vector<8x8xf32> -> vector<8x8xf32>
    %124 = tpu.concatenate %54, %77, %100, %123 in 1 : vector<8x8xf32>, vector<8x8xf32>, vector<8x8xf32>, vector<8x8xf32> -> vector<8x32xf32>
    %125 = arith.truncf %124 : vector<8x32xf32> to vector<8x32xbf16>
    %c0_51 = arith.constant 0 : index
    %c0_52 = arith.constant 0 : index
    %126 = vector.load %arg12[%c0_51, %c0_52] : memref<32x32xbf16, #tpu.memory_space<vmem>>, vector<32x32xbf16>
    %cst_53 = arith.constant dense<0.000000e+00> : vector<8x32xf32>
    %127 = tpu.matmul %125, %126, %cst_53 {dimension_numbers = #tpu.dot_dimension_numbers<[1], [0], [0], [1], [0, 0, 1, 1], [], []>} : vector<8x32xbf16>, vector<32x32xbf16>, vector<8x32xf32> -> vector<8x32xf32>
    %c0_54 = arith.constant 0 : index
    %c0_55 = arith.constant 0 : index
    %128 = vector.load %arg13[%c0_54, %c0_55] : memref<1x32xf32, #tpu.memory_space<vmem>>, vector<1x32xf32>
    %129 = vector.broadcast %128 : vector<1x32xf32> to vector<8x32xf32>
    %130 = arith.addf %127, %129 : vector<8x32xf32>
    %131 = arith.addf %1, %130 : vector<8x32xf32>
    %cst_56 = arith.constant dense<0.000000e+00> : vector<8xf32>
    %132 = vector.multi_reduction <add>, %131, %cst_56 [1] : vector<8x32xf32> to vector<8xf32>
    %133 = vector.shape_cast %132 : vector<8xf32> to vector<8x1xf32>
    %cst_57 = arith.constant 3.200000e+01 : f32
    %134 = vector.broadcast %cst_57 : f32 to vector<8x1xf32>
    %135 = arith.divf %133, %134 : vector<8x1xf32>
    %136 = vector.broadcast %135 : vector<8x1xf32> to vector<8x32xf32>
    %137 = arith.subf %131, %136 : vector<8x32xf32>
    %138 = arith.mulf %137, %137 : vector<8x32xf32>
    %cst_58 = arith.constant dense<0.000000e+00> : vector<8xf32>
    %139 = vector.multi_reduction <add>, %138, %cst_58 [1] : vector<8x32xf32> to vector<8xf32>
    %140 = vector.shape_cast %139 : vector<8xf32> to vector<8x1xf32>
    %cst_59 = arith.constant 3.200000e+01 : f32
    %141 = vector.broadcast %cst_59 : f32 to vector<8x1xf32>
    %142 = arith.divf %140, %141 : vector<8x1xf32>
    %143 = vector.broadcast %135 : vector<8x1xf32> to vector<8x32xf32>
    %144 = arith.subf %131, %143 : vector<8x32xf32>
    %cst_60 = arith.constant 9.99999974E-6 : f32
    %145 = vector.broadcast %cst_60 : f32 to vector<8x1xf32>
    %146 = arith.addf %142, %145 : vector<8x1xf32>
    %147 = math.rsqrt %146 : vector<8x1xf32>
    %148 = vector.broadcast %147 : vector<8x1xf32> to vector<8x32xf32>
    %149 = arith.mulf %144, %148 : vector<8x32xf32>
    %c0_61 = arith.constant 0 : index
    %c0_62 = arith.constant 0 : index
    %150 = vector.load %arg14[%c0_61, %c0_62] : memref<1x32xf32, #tpu.memory_space<vmem>>, vector<1x32xf32>
    %151 = vector.broadcast %150 : vector<1x32xf32> to vector<8x32xf32>
    %152 = arith.mulf %149, %151 : vector<8x32xf32>
    %c0_63 = arith.constant 0 : index
    %c0_64 = arith.constant 0 : index
    %153 = vector.load %arg15[%c0_63, %c0_64] : memref<1x32xf32, #tpu.memory_space<vmem>>, vector<1x32xf32>
    %154 = vector.broadcast %153 : vector<1x32xf32> to vector<8x32xf32>
    %155 = arith.addf %152, %154 : vector<8x32xf32>
    %c0_65 = arith.constant 0 : index
    %c0_66 = arith.constant 0 : index
    %c0_67 = arith.constant 0 : index
    %156 = vector.load %arg16[%c0_65, %c0_66, %c0_67] : memref<1x8x32xf32, #tpu.memory_space<vmem>>, vector<1x8x32xf32>
    %157 = vector.shape_cast %156 : vector<1x8x32xf32> to vector<8x32xf32>
    %158 = vector.shape_cast %155 : vector<8x32xf32> to vector<1x8x32xf32>
    tpu.vector_store %arg16[%c0_65, %c0_66, %c0_67], %158 {strides = array<i32>} : memref<1x8x32xf32, #tpu.memory_space<vmem>>, vector<1x8x32xf32>,
    return
  }
  func.func @transform_0(%arg0: i32) -> (i32, i32, i32) {
    %c0_i32 = arith.constant 0 : i32
    %c0_i32_0 = arith.constant 0 : i32
    %c0_i32_1 = arith.constant 0 : i32
    return %arg0, %c0_i32, %c0_i32_0 : i32, i32, i32
  }
  func.func @transform_1(%arg0: i32) -> (i32, i32, i32) {
    %c0_i32 = arith.constant 0 : i32
    %c0_i32_0 = arith.constant 0 : i32
    %c0_i32_1 = arith.constant 0 : i32
    return %arg0, %c0_i32, %c0_i32_0 : i32, i32, i32
  }
  func.func @transform_2(%arg0: i32) -> (i32, i32, i32) {
    %c0_i32 = arith.constant 0 : i32
    %c0_i32_0 = arith.constant 0 : i32
    %c0_i32_1 = arith.constant 0 : i32
    return %arg0, %c0_i32, %c0_i32_0 : i32, i32, i32
  }
  func.func @transform_3(%arg0: i32) -> (i32, i32, i32) {
    %c0_i32 = arith.constant 0 : i32
    %c0_i32_0 = arith.constant 0 : i32
    %c0_i32_1 = arith.constant 0 : i32
    return %arg0, %c0_i32, %c0_i32_0 : i32, i32, i32
  }
  func.func @transform_4(%arg0: i32) -> (i32, i32, i32) {
    %c0_i32 = arith.constant 0 : i32
    %c0_i32_0 = arith.constant 0 : i32
    %c0_i32_1 = arith.constant 0 : i32
    return %arg0, %c0_i32, %c0_i32_0 : i32, i32, i32
  }
  func.func @transform_5(%arg0: i32) -> (i32, i32) {
    %c0_i32 = arith.constant 0 : i32
    %c0_i32_0 = arith.constant 0 : i32
    %c0_i32_1 = arith.constant 0 : i32
    return %c0_i32, %c0_i32_0 : i32, i32
  }
  func.func @transform_6(%arg0: i32) -> (i32, i32) {
    %c0_i32 = arith.constant 0 : i32
    %c0_i32_0 = arith.constant 0 : i32
    %c0_i32_1 = arith.constant 0 : i32
    return %c0_i32, %c0_i32_0 : i32, i32
  }
  func.func @transform_7(%arg0: i32) -> (i32, i32) {
    %c0_i32 = arith.constant 0 : i32
    %c0_i32_0 = arith.constant 0 : i32
    %c0_i32_1 = arith.constant 0 : i32
    return %c0_i32, %c0_i32_0 : i32, i32
  }
  func.func @transform_8(%arg0: i32) -> (i32, i32) {
    %c0_i32 = arith.constant 0 : i32
    %c0_i32_0 = arith.constant 0 : i32
    %c0_i32_1 = arith.constant 0 : i32
    return %c0_i32, %c0_i32_0 : i32, i32
  }
  func.func @transform_9(%arg0: i32) -> (i32, i32) {
    %c0_i32 = arith.constant 0 : i32
    %c0_i32_0 = arith.constant 0 : i32
    %c0_i32_1 = arith.constant 0 : i32
    return %c0_i32, %c0_i32_0 : i32, i32
  }
  func.func @transform_10(%arg0: i32) -> (i32, i32) {
    %c0_i32 = arith.constant 0 : i32
    %c0_i32_0 = arith.constant 0 : i32
    %c0_i32_1 = arith.constant 0 : i32
    return %c0_i32, %c0_i32_0 : i32, i32
  }
  func.func @transform_11(%arg0: i32) -> (i32, i32) {
    %c0_i32 = arith.constant 0 : i32
    %c0_i32_0 = arith.constant 0 : i32
    %c0_i32_1 = arith.constant 0 : i32
    return %c0_i32, %c0_i32_0 : i32, i32
  }
  func.func @transform_12(%arg0: i32) -> (i32, i32) {
    %c0_i32 = arith.constant 0 : i32
    %c0_i32_0 = arith.constant 0 : i32
    %c0_i32_1 = arith.constant 0 : i32
    return %c0_i32, %c0_i32_0 : i32, i32
  }
  func.func @transform_13(%arg0: i32) -> (i32, i32) {
    %c0_i32 = arith.constant 0 : i32
    %c0_i32_0 = arith.constant 0 : i32
    %c0_i32_1 = arith.constant 0 : i32
    return %c0_i32, %c0_i32_0 : i32, i32
  }
  func.func @transform_14(%arg0: i32) -> (i32, i32) {
    %c0_i32 = arith.constant 0 : i32
    %c0_i32_0 = arith.constant 0 : i32
    %c0_i32_1 = arith.constant 0 : i32
    return %c0_i32, %c0_i32_0 : i32, i32
  }
  func.func @transform_15(%arg0: i32) -> (i32, i32, i32) {
    %c0_i32 = arith.constant 0 : i32
    %c0_i32_0 = arith.constant 0 : i32
    %c0_i32_1 = arith.constant 0 : i32
    return %arg0, %c0_i32, %c0_i32_0 : i32, i32, i32
  }
}

module attributes {stable_mosaic.version = 11 : i64} {
  func.func @_attn_block_kernel(%arg0: i32, %arg1: memref<1x8x32xf32, #tpu.memory_space<vmem>>, %arg2: memref<1x8x32xf32, #tpu.memory_space<vmem>>, %arg3: memref<1x8x32xf32, #tpu.memory_space<vmem>>, %arg4: memref<1x8x32xf32, #tpu.memory_space<vmem>>, %arg5: memref<1x1x8xf32, #tpu.memory_space<vmem>>, %arg6: memref<32x32xbf16, #tpu.memory_space<vmem>>, %arg7: memref<1x32xf32, #tpu.memory_space<vmem>>, %arg8: memref<32x32xbf16, #tpu.memory_space<vmem>>, %arg9: memref<1x32xf32, #tpu.memory_space<vmem>>, %arg10: memref<32x32xbf16, #tpu.memory_space<vmem>>, %arg11: memref<1x32xf32, #tpu.memory_space<vmem>>, %arg12: memref<32x32xbf16, #tpu.memory_space<vmem>>, %arg13: memref<1x32xf32, #tpu.memory_space<vmem>>, %arg14: memref<1x32xf32, #tpu.memory_space<vmem>>, %arg15: memref<1x32xf32, #tpu.memory_space<vmem>>, %arg16: memref<1x8x32xf32, #tpu.memory_space<vmem>>) attributes {dimension_semantics = [#tpu.dimension_semantics<parallel>], iteration_bounds = array<i64: 2>, scalar_prefetch = 0 : i64, scratch_operands = 0 : i64, tpu.core_type = #tpu.core_type<tc>, window_params = [{transform_indices = @transform_0, window_bounds = array<i64: 1, 8, 32>}, {transform_indices = @transform_1, window_bounds = array<i64: 1, 8, 32>}, {transform_indices = @transform_2, window_bounds = array<i64: 1, 8, 32>}, {transform_indices = @transform_3, window_bounds = array<i64: 1, 8, 32>}, {transform_indices = @transform_4, window_bounds = array<i64: 1, 1, 8>}, {pipeline_mode = #tpu.pipeline_mode<synchronous>, transform_indices = @transform_5, window_bounds = array<i64: 32, 32>}, {pipeline_mode = #tpu.pipeline_mode<synchronous>, transform_indices = @transform_6, window_bounds = array<i64: 1, 32>}, {pipeline_mode = #tpu.pipeline_mode<synchronous>, transform_indices = @transform_7, window_bounds = array<i64: 32, 32>}, {pipeline_mode = #tpu.pipeline_mode<synchronous>, transform_indices = @transform_8, window_bounds = array<i64: 1, 32>}, {pipeline_mode = #tpu.pipeline_mode<synchronous>, transform_indices = @transform_9, window_bounds = array<i64: 32, 32>}, {pipeline_mode = #tpu.pipeline_mode<synchronous>, transform_indices = @transform_10, window_bounds = array<i64: 1, 32>}, {pipeline_mode = #tpu.pipeline_mode<synchronous>, transform_indices = @transform_11, window_bounds = array<i64: 32, 32>}, {pipeline_mode = #tpu.pipeline_mode<synchronous>, transform_indices = @transform_12, window_bounds = array<i64: 1, 32>}, {pipeline_mode = #tpu.pipeline_mode<synchronous>, transform_indices = @transform_13, window_bounds = array<i64: 1, 32>}, {pipeline_mode = #tpu.pipeline_mode<synchronous>, transform_indices = @transform_14, window_bounds = array<i64: 1, 32>}, {transform_indices = @transform_15, window_bounds = array<i64: 1, 8, 32>}]} {
    %c0 = arith.constant 0 : index
    %c0_0 = arith.constant 0 : index
    %c0_1 = arith.constant 0 : index
    %0 = vector.load %arg1[%c0, %c0_0, %c0_1] : memref<1x8x32xf32, #tpu.memory_space<vmem>>, vector<1x8x32xf32>
    %1 = vector.shape_cast %0 : vector<1x8x32xf32> to vector<8x32xf32>
    %c0_2 = arith.constant 0 : index
    %c0_3 = arith.constant 0 : index
    %c0_4 = arith.constant 0 : index
    %2 = vector.load %arg2[%c0_2, %c0_3, %c0_4] : memref<1x8x32xf32, #tpu.memory_space<vmem>>, vector<1x8x32xf32>
    %3 = vector.shape_cast %2 : vector<1x8x32xf32> to vector<8x32xf32>
    %4 = arith.addf %1, %3 : vector<8x32xf32>
    %5 = arith.truncf %4 : vector<8x32xf32> to vector<8x32xbf16>
    %c0_5 = arith.constant 0 : index
    %c0_6 = arith.constant 0 : index
    %c0_7 = arith.constant 0 : index
    %6 = vector.load %arg3[%c0_5, %c0_6, %c0_7] : memref<1x8x32xf32, #tpu.memory_space<vmem>>, vector<1x8x32xf32>
    %7 = vector.shape_cast %6 : vector<1x8x32xf32> to vector<8x32xf32>
    %c0_8 = arith.constant 0 : index
    %c0_9 = arith.constant 0 : index
    %c0_10 = arith.constant 0 : index
    %8 = vector.load %arg4[%c0_8, %c0_9, %c0_10] : memref<1x8x32xf32, #tpu.memory_space<vmem>>, vector<1x8x32xf32>
    %9 = vector.shape_cast %8 : vector<1x8x32xf32> to vector<8x32xf32>
    %10 = arith.addf %7, %9 : vector<8x32xf32>
    %11 = arith.truncf %10 : vector<8x32xf32> to vector<8x32xbf16>
    %c0_11 = arith.constant 0 : index
    %c0_12 = arith.constant 0 : index
    %c0_13 = arith.constant 0 : index
    %12 = vector.load %arg3[%c0_11, %c0_12, %c0_13] : memref<1x8x32xf32, #tpu.memory_space<vmem>>, vector<1x8x32xf32>
    %13 = vector.shape_cast %12 : vector<1x8x32xf32> to vector<8x32xf32>
    %14 = arith.truncf %13 : vector<8x32xf32> to vector<8x32xbf16>
    %c0_14 = arith.constant 0 : index
    %c0_15 = arith.constant 0 : index
    %15 = vector.load %arg6[%c0_14, %c0_15] : memref<32x32xbf16, #tpu.memory_space<vmem>>, vector<32x32xbf16>
    %cst = arith.constant dense<0.000000e+00> : vector<8x32xf32>
    %16 = tpu.matmul %5, %15, %cst {dimension_numbers = #tpu.dot_dimension_numbers<[1], [0], [0], [1], [0, 0, 1, 1], [], []>} : vector<8x32xbf16>, vector<32x32xbf16>, vector<8x32xf32> -> vector<8x32xf32>
    %c0_16 = arith.constant 0 : index
    %c0_17 = arith.constant 0 : index
    %17 = vector.load %arg7[%c0_16, %c0_17] : memref<1x32xf32, #tpu.memory_space<vmem>>, vector<1x32xf32>
    %18 = vector.broadcast %17 : vector<1x32xf32> to vector<8x32xf32>
    %19 = arith.addf %16, %18 : vector<8x32xf32>
    %c0_18 = arith.constant 0 : index
    %c0_19 = arith.constant 0 : index
    %20 = vector.load %arg8[%c0_18, %c0_19] : memref<32x32xbf16, #tpu.memory_space<vmem>>, vector<32x32xbf16>
    %cst_20 = arith.constant dense<0.000000e+00> : vector<8x32xf32>
    %21 = tpu.matmul %11, %20, %cst_20 {dimension_numbers = #tpu.dot_dimension_numbers<[1], [0], [0], [1], [0, 0, 1, 1], [], []>} : vector<8x32xbf16>, vector<32x32xbf16>, vector<8x32xf32> -> vector<8x32xf32>
    %c0_21 = arith.constant 0 : index
    %c0_22 = arith.constant 0 : index
    %22 = vector.load %arg9[%c0_21, %c0_22] : memref<1x32xf32, #tpu.memory_space<vmem>>, vector<1x32xf32>
    %23 = vector.broadcast %22 : vector<1x32xf32> to vector<8x32xf32>
    %24 = arith.addf %21, %23 : vector<8x32xf32>
    %c0_23 = arith.constant 0 : index
    %c0_24 = arith.constant 0 : index
    %25 = vector.load %arg10[%c0_23, %c0_24] : memref<32x32xbf16, #tpu.memory_space<vmem>>, vector<32x32xbf16>
    %cst_25 = arith.constant dense<0.000000e+00> : vector<8x32xf32>
    %26 = tpu.matmul %14, %25, %cst_25 {dimension_numbers = #tpu.dot_dimension_numbers<[1], [0], [0], [1], [0, 0, 1, 1], [], []>} : vector<8x32xbf16>, vector<32x32xbf16>, vector<8x32xf32> -> vector<8x32xf32>
    %c0_26 = arith.constant 0 : index
    %c0_27 = arith.constant 0 : index
    %27 = vector.load %arg11[%c0_26, %c0_27] : memref<1x32xf32, #tpu.memory_space<vmem>>, vector<1x32xf32>
    %28 = vector.broadcast %27 : vector<1x32xf32> to vector<8x32xf32>
    %29 = arith.addf %26, %28 : vector<8x32xf32>
    %c0_28 = arith.constant 0 : index
    %c0_29 = arith.constant 0 : index
    %c0_30 = arith.constant 0 : index
    %30 = vector.load %arg5[%c0_28, %c0_29, %c0_30] : memref<1x1x8xf32, #tpu.memory_space<vmem>>, vector<1x1x8xf32>
    %31 = vector.shape_cast %30 : vector<1x1x8xf32> to vector<1x8xf32>
    %32 = vector.extract_strided_slice %19 {offsets = [0, 0], sizes = [8, 8], strides = [1, 1]} : vector<8x32xf32> to vector<8x8xf32>
    %cst_31 = arith.constant 0.353553385 : f32
    %33 = vector.broadcast %cst_31 : f32 to vector<8x8xf32>
    %34 = arith.mulf %32, %33 : vector<8x8xf32>
    %35 = arith.truncf %34 : vector<8x8xf32> to vector<8x8xbf16>
    %36 = vector.extract_strided_slice %24 {offsets = [0, 0], sizes = [8, 8], strides = [1, 1]} : vector<8x32xf32> to vector<8x8xf32>
    %37 = arith.truncf %36 : vector<8x8xf32> to vector<8x8xbf16>
    %38 = vector.extract_strided_slice %29 {offsets = [0, 0], sizes = [8, 8], strides = [1, 1]} : vector<8x32xf32> to vector<8x8xf32>
    %39 = arith.truncf %38 : vector<8x8xf32> to vector<8x8xbf16>
    %cst_32 = arith.constant dense<0.000000e+00> : vector<8x8xf32>
    %40 = tpu.matmul %35, %37, %cst_32 {dimension_numbers = #tpu.dot_dimension_numbers<[1], [1], [0], [0], [0, 0, 1, 0], [], []>} : vector<8x8xbf16>, vector<8x8xbf16>, vector<8x8xf32> -> vector<8x8xf32>
    %41 = vector.broadcast %31 : vector<1x8xf32> to vector<8x8xf32>
    %42 = arith.addf %40, %41 : vector<8x8xf32>
    %cst_33 = arith.constant dense<0xFF800000> : vector<8xf32>
    %43 = vector.multi_reduction <maximumf>, %42, %cst_33 [1] : vector<8x8xf32> to vector<8xf32>
    %44 = vector.shape_cast %43 : vector<8xf32> to vector<8x1xf32>
    %45 = vector.broadcast %44 : vector<8x1xf32> to vector<8x8xf32>
    %46 = arith.subf %42, %45 : vector<8x8xf32>
    %47 = math.exp %46 : vector<8x8xf32>
    %cst_34 = arith.constant dense<0.000000e+00> : vector<8xf32>
    %48 = vector.multi_reduction <add>, %47, %cst_34 [1] : vector<8x8xf32> to vector<8xf32>
    %49 = vector.shape_cast %48 : vector<8xf32> to vector<8x1xf32>
    %50 = tpu.reciprocal %49 {approx = true} : vector<8x1xf32> -> vector<8x1xf32>
    %51 = vector.broadcast %50 : vector<8x1xf32> to vector<8x8xf32>
    %52 = arith.mulf %47, %51 : vector<8x8xf32>
    %53 = arith.truncf %52 : vector<8x8xf32> to vector<8x8xbf16>
    %cst_35 = arith.constant dense<0.000000e+00> : vector<8x8xf32>
    %54 = tpu.matmul %53, %39, %cst_35 {dimension_numbers = #tpu.dot_dimension_numbers<[1], [0], [0], [1], [0, 0, 1, 1], [], []>} : vector<8x8xbf16>, vector<8x8xbf16>, vector<8x8xf32> -> vector<8x8xf32>
    %55 = vector.extract_strided_slice %19 {offsets = [0, 8], sizes = [8, 8], strides = [1, 1]} : vector<8x32xf32> to vector<8x8xf32>
    %cst_36 = arith.constant 0.353553385 : f32
    %56 = vector.broadcast %cst_36 : f32 to vector<8x8xf32>
    %57 = arith.mulf %55, %56 : vector<8x8xf32>
    %58 = arith.truncf %57 : vector<8x8xf32> to vector<8x8xbf16>
    %59 = vector.extract_strided_slice %24 {offsets = [0, 8], sizes = [8, 8], strides = [1, 1]} : vector<8x32xf32> to vector<8x8xf32>
    %60 = arith.truncf %59 : vector<8x8xf32> to vector<8x8xbf16>
    %61 = vector.extract_strided_slice %29 {offsets = [0, 8], sizes = [8, 8], strides = [1, 1]} : vector<8x32xf32> to vector<8x8xf32>
    %62 = arith.truncf %61 : vector<8x8xf32> to vector<8x8xbf16>
    %cst_37 = arith.constant dense<0.000000e+00> : vector<8x8xf32>
    %63 = tpu.matmul %58, %60, %cst_37 {dimension_numbers = #tpu.dot_dimension_numbers<[1], [1], [0], [0], [0, 0, 1, 0], [], []>} : vector<8x8xbf16>, vector<8x8xbf16>, vector<8x8xf32> -> vector<8x8xf32>
    %64 = vector.broadcast %31 : vector<1x8xf32> to vector<8x8xf32>
    %65 = arith.addf %63, %64 : vector<8x8xf32>
    %cst_38 = arith.constant dense<0xFF800000> : vector<8xf32>
    %66 = vector.multi_reduction <maximumf>, %65, %cst_38 [1] : vector<8x8xf32> to vector<8xf32>
    %67 = vector.shape_cast %66 : vector<8xf32> to vector<8x1xf32>
    %68 = vector.broadcast %67 : vector<8x1xf32> to vector<8x8xf32>
    %69 = arith.subf %65, %68 : vector<8x8xf32>
    %70 = math.exp %69 : vector<8x8xf32>
    %cst_39 = arith.constant dense<0.000000e+00> : vector<8xf32>
    %71 = vector.multi_reduction <add>, %70, %cst_39 [1] : vector<8x8xf32> to vector<8xf32>
    %72 = vector.shape_cast %71 : vector<8xf32> to vector<8x1xf32>
    %73 = tpu.reciprocal %72 {approx = true} : vector<8x1xf32> -> vector<8x1xf32>
    %74 = vector.broadcast %73 : vector<8x1xf32> to vector<8x8xf32>
    %75 = arith.mulf %70, %74 : vector<8x8xf32>
    %76 = arith.truncf %75 : vector<8x8xf32> to vector<8x8xbf16>
    %cst_40 = arith.constant dense<0.000000e+00> : vector<8x8xf32>
    %77 = tpu.matmul %76, %62, %cst_40 {dimension_numbers = #tpu.dot_dimension_numbers<[1], [0], [0], [1], [0, 0, 1, 1], [], []>} : vector<8x8xbf16>, vector<8x8xbf16>, vector<8x8xf32> -> vector<8x8xf32>
    %78 = vector.extract_strided_slice %19 {offsets = [0, 16], sizes = [8, 8], strides = [1, 1]} : vector<8x32xf32> to vector<8x8xf32>
    %cst_41 = arith.constant 0.353553385 : f32
    %79 = vector.broadcast %cst_41 : f32 to vector<8x8xf32>
    %80 = arith.mulf %78, %79 : vector<8x8xf32>
    %81 = arith.truncf %80 : vector<8x8xf32> to vector<8x8xbf16>
    %82 = vector.extract_strided_slice %24 {offsets = [0, 16], sizes = [8, 8], strides = [1, 1]} : vector<8x32xf32> to vector<8x8xf32>
    %83 = arith.truncf %82 : vector<8x8xf32> to vector<8x8xbf16>
    %84 = vector.extract_strided_slice %29 {offsets = [0, 16], sizes = [8, 8], strides = [1, 1]} : vector<8x32xf32> to vector<8x8xf32>
    %85 = arith.truncf %84 : vector<8x8xf32> to vector<8x8xbf16>
    %cst_42 = arith.constant dense<0.000000e+00> : vector<8x8xf32>
    %86 = tpu.matmul %81, %83, %cst_42 {dimension_numbers = #tpu.dot_dimension_numbers<[1], [1], [0], [0], [0, 0, 1, 0], [], []>} : vector<8x8xbf16>, vector<8x8xbf16>, vector<8x8xf32> -> vector<8x8xf32>
    %87 = vector.broadcast %31 : vector<1x8xf32> to vector<8x8xf32>
    %88 = arith.addf %86, %87 : vector<8x8xf32>
    %cst_43 = arith.constant dense<0xFF800000> : vector<8xf32>
    %89 = vector.multi_reduction <maximumf>, %88, %cst_43 [1] : vector<8x8xf32> to vector<8xf32>
    %90 = vector.shape_cast %89 : vector<8xf32> to vector<8x1xf32>
    %91 = vector.broadcast %90 : vector<8x1xf32> to vector<8x8xf32>
    %92 = arith.subf %88, %91 : vector<8x8xf32>
    %93 = math.exp %92 : vector<8x8xf32>
    %cst_44 = arith.constant dense<0.000000e+00> : vector<8xf32>
    %94 = vector.multi_reduction <add>, %93, %cst_44 [1] : vector<8x8xf32> to vector<8xf32>
    %95 = vector.shape_cast %94 : vector<8xf32> to vector<8x1xf32>
    %96 = tpu.reciprocal %95 {approx = true} : vector<8x1xf32> -> vector<8x1xf32>
    %97 = vector.broadcast %96 : vector<8x1xf32> to vector<8x8xf32>
    %98 = arith.mulf %93, %97 : vector<8x8xf32>
    %99 = arith.truncf %98 : vector<8x8xf32> to vector<8x8xbf16>
    %cst_45 = arith.constant dense<0.000000e+00> : vector<8x8xf32>
    %100 = tpu.matmul %99, %85, %cst_45 {dimension_numbers = #tpu.dot_dimension_numbers<[1], [0], [0], [1], [0, 0, 1, 1], [], []>} : vector<8x8xbf16>, vector<8x8xbf16>, vector<8x8xf32> -> vector<8x8xf32>
    %101 = vector.extract_strided_slice %19 {offsets = [0, 24], sizes = [8, 8], strides = [1, 1]} : vector<8x32xf32> to vector<8x8xf32>
    %cst_46 = arith.constant 0.353553385 : f32
    %102 = vector.broadcast %cst_46 : f32 to vector<8x8xf32>
    %103 = arith.mulf %101, %102 : vector<8x8xf32>
    %104 = arith.truncf %103 : vector<8x8xf32> to vector<8x8xbf16>
    %105 = vector.extract_strided_slice %24 {offsets = [0, 24], sizes = [8, 8], strides = [1, 1]} : vector<8x32xf32> to vector<8x8xf32>
    %106 = arith.truncf %105 : vector<8x8xf32> to vector<8x8xbf16>
    %107 = vector.extract_strided_slice %29 {offsets = [0, 24], sizes = [8, 8], strides = [1, 1]} : vector<8x32xf32> to vector<8x8xf32>
    %108 = arith.truncf %107 : vector<8x8xf32> to vector<8x8xbf16>
    %cst_47 = arith.constant dense<0.000000e+00> : vector<8x8xf32>
    %109 = tpu.matmul %104, %106, %cst_47 {dimension_numbers = #tpu.dot_dimension_numbers<[1], [1], [0], [0], [0, 0, 1, 0], [], []>} : vector<8x8xbf16>, vector<8x8xbf16>, vector<8x8xf32> -> vector<8x8xf32>
    %110 = vector.broadcast %31 : vector<1x8xf32> to vector<8x8xf32>
    %111 = arith.addf %109, %110 : vector<8x8xf32>
    %cst_48 = arith.constant dense<0xFF800000> : vector<8xf32>
    %112 = vector.multi_reduction <maximumf>, %111, %cst_48 [1] : vector<8x8xf32> to vector<8xf32>
    %113 = vector.shape_cast %112 : vector<8xf32> to vector<8x1xf32>
    %114 = vector.broadcast %113 : vector<8x1xf32> to vector<8x8xf32>
    %115 = arith.subf %111, %114 : vector<8x8xf32>
    %116 = math.exp %115 : vector<8x8xf32>
    %cst_49 = arith.constant dense<0.000000e+00> : vector<8xf32>
    %117 = vector.multi_reduction <add>, %116, %cst_49 [1] : vector<8x8xf32> to vector<8xf32>
    %118 = vector.shape_cast %117 : vector<8xf32> to vector<8x1xf32>
    %119 = tpu.reciprocal %118 {approx = true} : vector<8x1xf32> -> vector<8x1xf32>
    %120 = vector.broadcast %119 : vector<8x1xf32> to vector<8x8xf32>
    %121 = arith.mulf %116, %120 : vector<8x8xf32>
    %122 = arith.truncf %121 : vector<8x8xf32> to vector<8x8xbf16>
    %cst_50 = arith.constant dense<0.000000e+00> : vector<8x8xf32>
    %123 = tpu.matmul %122, %108, %cst_50 {dimension_numbers = #tpu.dot_dimension_numbers<[1], [0], [0], [1], [0, 0, 1, 1], [], []>} : vector<8x8xbf16>, vector<8x8xbf16>, vector<8x8xf32> -> vector<8x8xf32>
    %124 = tpu.concatenate %54, %77, %100, %123 in 1 : vector<8x8xf32>, vector<8x8xf32>, vector<8x8xf32>, vector<8x8xf32> -> vector<8x32xf32>
    %125 = arith.truncf %124 : vector<8x32xf32> to vector<8x32xbf16>
    %c0_51 = arith.constant 0 : index
    %c0_52 = arith.constant 0 : index
    %126 = vector.load %arg12[%c0_51, %c0_52] : memref<32x32xbf16, #tpu.memory_space<vmem>>, vector<32x32xbf16>
    %cst_53 = arith.constant dense<0.000000e+00> : vector<8x32xf32>
    %127 = tpu.matmul %125, %126, %cst_53 {dimension_numbers = #tpu.dot_dimension_numbers<[1], [0], [0], [1], [0, 0, 1, 1], [], []>} : vector<8x32xbf16>, vector<32x32xbf16>, vector<8x32xf32> -> vector<8x32xf32>
    %c0_54 = arith.constant 0 : index
    %c0_55 = arith.constant 0 : index
    %128 = vector.load %arg13[%c0_54, %c0_55] : memref<1x32xf32, #tpu.memory_space<vmem>>, vector<1x32xf32>
    %129 = vector.broadcast %128 : vector<1x32xf32> to vector<8x32xf32>
    %130 = arith.addf %127, %129 : vector<8x32xf32>
    %131 = arith.addf %1, %130 : vector<8x32xf32>
    %cst_56 = arith.constant dense<0.000000e+00> : vector<8xf32>
    %132 = vector.multi_reduction <add>, %131, %cst_56 [1] : vector<8x32xf32> to vector<8xf32>
    %133 = vector.shape_cast %132 : vector<8xf32> to vector<8x1xf32>
    %cst_57 = arith.constant 3.200000e+01 : f32
    %134 = vector.broadcast %cst_57 : f32 to vector<8x1xf32>
    %135 = arith.divf %133, %134 : vector<8x1xf32>
    %136 = vector.broadcast %135 : vector<8x1xf32> to vector<8x32xf32>
    %137 = arith.subf %131, %136 : vector<8x32xf32>
    %138 = arith.mulf %137, %137 : vector<8x32xf32>
    %cst_58 = arith.constant dense<0.000000e+00> : vector<8xf32>
    %139 = vector.multi_reduction <add>, %138, %cst_58 [1] : vector<8x32xf32> to vector<8xf32>
    %140 = vector.shape_cast %139 : vector<8xf32> to vector<8x1xf32>
    %cst_59 = arith.constant 3.200000e+01 : f32
    %141 = vector.broadcast %cst_59 : f32 to vector<8x1xf32>
    %142 = arith.divf %140, %141 : vector<8x1xf32>
    %143 = vector.broadcast %135 : vector<8x1xf32> to vector<8x32xf32>
    %144 = arith.subf %131, %143 : vector<8x32xf32>
    %cst_60 = arith.constant 9.99999974E-6 : f32
    %145 = vector.broadcast %cst_60 : f32 to vector<8x1xf32>
    %146 = arith.addf %142, %145 : vector<8x1xf32>
    %147 = math.rsqrt %146 : vector<8x1xf32>
    %148 = vector.broadcast %147 : vector<8x1xf32> to vector<8x32xf32>
    %149 = arith.mulf %144, %148 : vector<8x32xf32>
    %c0_61 = arith.constant 0 : index
    %c0_62 = arith.constant 0 : index
    %150 = vector.load %arg14[%c0_61, %c0_62] : memref<1x32xf32, #tpu.memory_space<vmem>>, vector<1x32xf32>
    %151 = vector.broadcast %150 : vector<1x32xf32> to vector<8x32xf32>
    %152 = arith.mulf %149, %151 : vector<8x32xf32>
    %c0_63 = arith.constant 0 : index
    %c0_64 = arith.constant 0 : index
    %153 = vector.load %arg15[%c0_63, %c0_64] : memref<1x32xf32, #tpu.memory_space<vmem>>, vector<1x32xf32>
    %154 = vector.broadcast %153 : vector<1x32xf32> to vector<8x32xf32>
    %155 = arith.addf %152, %154 : vector<8x32xf32>
    %c0_65 = arith.constant 0 : index
    %c0_66 = arith.constant 0 : index
    %c0_67 = arith.constant 0 : index
    %156 = vector.load %arg16[%c0_65, %c0_66, %c0_67] : memref<1x8x32xf32, #tpu.memory_space<vmem>>, vector<1x8x32xf32>
    %157 = vector.shape_cast %156 : vector<1x8x32xf32> to vector<8x32xf32>
    %158 = vector.shape_cast %155 : vector<8x32xf32> to vector<1x8x32xf32>
    tpu.vector_store %arg16[%c0_65, %c0_66, %c0_67], %158 {strides = array<i32>} : memref<1x8x32xf32, #tpu.memory_space<vmem>>, vector<1x8x32xf32>,
    return
  }
  func.func @transform_0(%arg0: i32) -> (i32, i32, i32) {
    %c0_i32 = arith.constant 0 : i32
    %c0_i32_0 = arith.constant 0 : i32
    %c0_i32_1 = arith.constant 0 : i32
    return %arg0, %c0_i32, %c0_i32_0 : i32, i32, i32
  }
  func.func @transform_1(%arg0: i32) -> (i32, i32, i32) {
    %c0_i32 = arith.constant 0 : i32
    %c0_i32_0 = arith.constant 0 : i32
    %c0_i32_1 = arith.constant 0 : i32
    return %arg0, %c0_i32, %c0_i32_0 : i32, i32, i32
  }
  func.func @transform_2(%arg0: i32) -> (i32, i32, i32) {
    %c0_i32 = arith.constant 0 : i32
    %c0_i32_0 = arith.constant 0 : i32
    %c0_i32_1 = arith.constant 0 : i32
    return %arg0, %c0_i32, %c0_i32_0 : i32, i32, i32
  }
  func.func @transform_3(%arg0: i32) -> (i32, i32, i32) {
    %c0_i32 = arith.constant 0 : i32
    %c0_i32_0 = arith.constant 0 : i32
    %c0_i32_1 = arith.constant 0 : i32
    return %arg0, %c0_i32, %c0_i32_0 : i32, i32, i32
  }
  func.func @transform_4(%arg0: i32) -> (i32, i32, i32) {
    %c0_i32 = arith.constant 0 : i32
    %c0_i32_0 = arith.constant 0 : i32
    %c0_i32_1 = arith.constant 0 : i32
    return %arg0, %c0_i32, %c0_i32_0 : i32, i32, i32
  }
  func.func @transform_5(%arg0: i32) -> (i32, i32) {
    %c0_i32 = arith.constant 0 : i32
    %c0_i32_0 = arith.constant 0 : i32
    %c0_i32_1 = arith.constant 0 : i32
    return %c0_i32, %c0_i32_0 : i32, i32
  }
  func.func @transform_6(%arg0: i32) -> (i32, i32) {
    %c0_i32 = arith.constant 0 : i32
    %c0_i32_0 = arith.constant 0 : i32
    %c0_i32_1 = arith.constant 0 : i32
    return %c0_i32, %c0_i32_0 : i32, i32
  }
  func.func @transform_7(%arg0: i32) -> (i32, i32) {
    %c0_i32 = arith.constant 0 : i32
    %c0_i32_0 = arith.constant 0 : i32
    %c0_i32_1 = arith.constant 0 : i32
    return %c0_i32, %c0_i32_0 : i32, i32
  }
  func.func @transform_8(%arg0: i32) -> (i32, i32) {
    %c0_i32 = arith.constant 0 : i32
    %c0_i32_0 = arith.constant 0 : i32
    %c0_i32_1 = arith.constant 0 : i32
    return %c0_i32, %c0_i32_0 : i32, i32
  }
  func.func @transform_9(%arg0: i32) -> (i32, i32) {
    %c0_i32 = arith.constant 0 : i32
    %c0_i32_0 = arith.constant 0 : i32
    %c0_i32_1 = arith.constant 0 : i32
    return %c0_i32, %c0_i32_0 : i32, i32
  }
  func.func @transform_10(%arg0: i32) -> (i32, i32) {
    %c0_i32 = arith.constant 0 : i32
    %c0_i32_0 = arith.constant 0 : i32
    %c0_i32_1 = arith.constant 0 : i32
    return %c0_i32, %c0_i32_0 : i32, i32
  }
  func.func @transform_11(%arg0: i32) -> (i32, i32) {
    %c0_i32 = arith.constant 0 : i32
    %c0_i32_0 = arith.constant 0 : i32
    %c0_i32_1 = arith.constant 0 : i32
    return %c0_i32, %c0_i32_0 : i32, i32
  }
  func.func @transform_12(%arg0: i32) -> (i32, i32) {
    %c0_i32 = arith.constant 0 : i32
    %c0_i32_0 = arith.constant 0 : i32
    %c0_i32_1 = arith.constant 0 : i32
    return %c0_i32, %c0_i32_0 : i32, i32
  }
  func.func @transform_13(%arg0: i32) -> (i32, i32) {
    %c0_i32 = arith.constant 0 : i32
    %c0_i32_0 = arith.constant 0 : i32
    %c0_i32_1 = arith.constant 0 : i32
    return %c0_i32, %c0_i32_0 : i32, i32
  }
  func.func @transform_14(%arg0: i32) -> (i32, i32) {
    %c0_i32 = arith.constant 0 : i32
    %c0_i32_0 = arith.constant 0 : i32
    %c0_i32_1 = arith.constant 0 : i32
    return %c0_i32, %c0_i32_0 : i32, i32
  }
  func.func @transform_15(%arg0: i32) -> (i32, i32, i32) {
    %c0_i32 = arith.constant 0 : i32
    %c0_i32_0 = arith.constant 0 : i32
    %c0_i32_1 = arith.constant 0 : i32
    return %arg0, %c0_i32, %c0_i32_0 : i32, i32, i32
  }
}

module attributes {stable_mosaic.version = 11 : i64} {
  func.func @_attn_block_kernel(%arg0: i32, %arg1: memref<1x8x32xf32, #tpu.memory_space<vmem>>, %arg2: memref<1x8x32xf32, #tpu.memory_space<vmem>>, %arg3: memref<1x16x32xf32, #tpu.memory_space<vmem>>, %arg4: memref<1x16x32xf32, #tpu.memory_space<vmem>>, %arg5: memref<1x1x16xf32, #tpu.memory_space<vmem>>, %arg6: memref<32x32xbf16, #tpu.memory_space<vmem>>, %arg7: memref<1x32xf32, #tpu.memory_space<vmem>>, %arg8: memref<32x32xbf16, #tpu.memory_space<vmem>>, %arg9: memref<1x32xf32, #tpu.memory_space<vmem>>, %arg10: memref<32x32xbf16, #tpu.memory_space<vmem>>, %arg11: memref<1x32xf32, #tpu.memory_space<vmem>>, %arg12: memref<32x32xbf16, #tpu.memory_space<vmem>>, %arg13: memref<1x32xf32, #tpu.memory_space<vmem>>, %arg14: memref<1x32xf32, #tpu.memory_space<vmem>>, %arg15: memref<1x32xf32, #tpu.memory_space<vmem>>, %arg16: memref<1x8x32xf32, #tpu.memory_space<vmem>>, %arg17: memref<1x8x16xf32, #tpu.memory_space<vmem>>) attributes {dimension_semantics = [#tpu.dimension_semantics<parallel>], iteration_bounds = array<i64: 2>, scalar_prefetch = 0 : i64, scratch_operands = 0 : i64, tpu.core_type = #tpu.core_type<tc>, window_params = [{transform_indices = @transform_0, window_bounds = array<i64: 1, 8, 32>}, {transform_indices = @transform_1, window_bounds = array<i64: 1, 8, 32>}, {transform_indices = @transform_2, window_bounds = array<i64: 1, 16, 32>}, {transform_indices = @transform_3, window_bounds = array<i64: 1, 16, 32>}, {transform_indices = @transform_4, window_bounds = array<i64: 1, 1, 16>}, {pipeline_mode = #tpu.pipeline_mode<synchronous>, transform_indices = @transform_5, window_bounds = array<i64: 32, 32>}, {pipeline_mode = #tpu.pipeline_mode<synchronous>, transform_indices = @transform_6, window_bounds = array<i64: 1, 32>}, {pipeline_mode = #tpu.pipeline_mode<synchronous>, transform_indices = @transform_7, window_bounds = array<i64: 32, 32>}, {pipeline_mode = #tpu.pipeline_mode<synchronous>, transform_indices = @transform_8, window_bounds = array<i64: 1, 32>}, {pipeline_mode = #tpu.pipeline_mode<synchronous>, transform_indices = @transform_9, window_bounds = array<i64: 32, 32>}, {pipeline_mode = #tpu.pipeline_mode<synchronous>, transform_indices = @transform_10, window_bounds = array<i64: 1, 32>}, {pipeline_mode = #tpu.pipeline_mode<synchronous>, transform_indices = @transform_11, window_bounds = array<i64: 32, 32>}, {pipeline_mode = #tpu.pipeline_mode<synchronous>, transform_indices = @transform_12, window_bounds = array<i64: 1, 32>}, {pipeline_mode = #tpu.pipeline_mode<synchronous>, transform_indices = @transform_13, window_bounds = array<i64: 1, 32>}, {pipeline_mode = #tpu.pipeline_mode<synchronous>, transform_indices = @transform_14, window_bounds = array<i64: 1, 32>}, {transform_indices = @transform_15, window_bounds = array<i64: 1, 8, 32>}, {transform_indices = @transform_16, window_bounds = array<i64: 1, 8, 16>}]} {
    %c0 = arith.constant 0 : index
    %c0_0 = arith.constant 0 : index
    %c0_1 = arith.constant 0 : index
    %0 = vector.load %arg1[%c0, %c0_0, %c0_1] : memref<1x8x32xf32, #tpu.memory_space<vmem>>, vector<1x8x32xf32>
    %1 = vector.shape_cast %0 : vector<1x8x32xf32> to vector<8x32xf32>
    %c0_2 = arith.constant 0 : index
    %c0_3 = arith.constant 0 : index
    %c0_4 = arith.constant 0 : index
    %2 = vector.load %arg2[%c0_2, %c0_3, %c0_4] : memref<1x8x32xf32, #tpu.memory_space<vmem>>, vector<1x8x32xf32>
    %3 = vector.shape_cast %2 : vector<1x8x32xf32> to vector<8x32xf32>
    %4 = arith.addf %1, %3 : vector<8x32xf32>
    %5 = arith.truncf %4 : vector<8x32xf32> to vector<8x32xbf16>
    %c0_5 = arith.constant 0 : index
    %c0_6 = arith.constant 0 : index
    %c0_7 = arith.constant 0 : index
    %6 = vector.load %arg3[%c0_5, %c0_6, %c0_7] : memref<1x16x32xf32, #tpu.memory_space<vmem>>, vector<1x16x32xf32>
    %7 = vector.shape_cast %6 : vector<1x16x32xf32> to vector<16x32xf32>
    %c0_8 = arith.constant 0 : index
    %c0_9 = arith.constant 0 : index
    %c0_10 = arith.constant 0 : index
    %8 = vector.load %arg4[%c0_8, %c0_9, %c0_10] : memref<1x16x32xf32, #tpu.memory_space<vmem>>, vector<1x16x32xf32>
    %9 = vector.shape_cast %8 : vector<1x16x32xf32> to vector<16x32xf32>
    %10 = arith.addf %7, %9 : vector<16x32xf32>
    %11 = arith.truncf %10 : vector<16x32xf32> to vector<16x32xbf16>
    %c0_11 = arith.constant 0 : index
    %c0_12 = arith.constant 0 : index
    %c0_13 = arith.constant 0 : index
    %12 = vector.load %arg3[%c0_11, %c0_12, %c0_13] : memref<1x16x32xf32, #tpu.memory_space<vmem>>, vector<1x16x32xf32>
    %13 = vector.shape_cast %12 : vector<1x16x32xf32> to vector<16x32xf32>
    %14 = arith.truncf %13 : vector<16x32xf32> to vector<16x32xbf16>
    %c0_14 = arith.constant 0 : index
    %c0_15 = arith.constant 0 : index
    %15 = vector.load %arg6[%c0_14, %c0_15] : memref<32x32xbf16, #tpu.memory_space<vmem>>, vector<32x32xbf16>
    %cst = arith.constant dense<0.000000e+00> : vector<8x32xf32>
    %16 = tpu.matmul %5, %15, %cst {dimension_numbers = #tpu.dot_dimension_numbers<[1], [0], [0], [1], [0, 0, 1, 1], [], []>} : vector<8x32xbf16>, vector<32x32xbf16>, vector<8x32xf32> -> vector<8x32xf32>
    %c0_16 = arith.constant 0 : index
    %c0_17 = arith.constant 0 : index
    %17 = vector.load %arg7[%c0_16, %c0_17] : memref<1x32xf32, #tpu.memory_space<vmem>>, vector<1x32xf32>
    %18 = vector.broadcast %17 : vector<1x32xf32> to vector<8x32xf32>
    %19 = arith.addf %16, %18 : vector<8x32xf32>
    %c0_18 = arith.constant 0 : index
    %c0_19 = arith.constant 0 : index
    %20 = vector.load %arg8[%c0_18, %c0_19] : memref<32x32xbf16, #tpu.memory_space<vmem>>, vector<32x32xbf16>
    %cst_20 = arith.constant dense<0.000000e+00> : vector<16x32xf32>
    %21 = tpu.matmul %11, %20, %cst_20 {dimension_numbers = #tpu.dot_dimension_numbers<[1], [0], [0], [1], [0, 0, 1, 1], [], []>} : vector<16x32xbf16>, vector<32x32xbf16>, vector<16x32xf32> -> vector<16x32xf32>
    %c0_21 = arith.constant 0 : index
    %c0_22 = arith.constant 0 : index
    %22 = vector.load %arg9[%c0_21, %c0_22] : memref<1x32xf32, #tpu.memory_space<vmem>>, vector<1x32xf32>
    %23 = vector.broadcast %22 : vector<1x32xf32> to vector<16x32xf32>
    %24 = arith.addf %21, %23 : vector<16x32xf32>
    %c0_23 = arith.constant 0 : index
    %c0_24 = arith.constant 0 : index
    %25 = vector.load %arg10[%c0_23, %c0_24] : memref<32x32xbf16, #tpu.memory_space<vmem>>, vector<32x32xbf16>
    %cst_25 = arith.constant dense<0.000000e+00> : vector<16x32xf32>
    %26 = tpu.matmul %14, %25, %cst_25 {dimension_numbers = #tpu.dot_dimension_numbers<[1], [0], [0], [1], [0, 0, 1, 1], [], []>} : vector<16x32xbf16>, vector<32x32xbf16>, vector<16x32xf32> -> vector<16x32xf32>
    %c0_26 = arith.constant 0 : index
    %c0_27 = arith.constant 0 : index
    %27 = vector.load %arg11[%c0_26, %c0_27] : memref<1x32xf32, #tpu.memory_space<vmem>>, vector<1x32xf32>
    %28 = vector.broadcast %27 : vector<1x32xf32> to vector<16x32xf32>
    %29 = arith.addf %26, %28 : vector<16x32xf32>
    %c0_28 = arith.constant 0 : index
    %c0_29 = arith.constant 0 : index
    %c0_30 = arith.constant 0 : index
    %30 = vector.load %arg5[%c0_28, %c0_29, %c0_30] : memref<1x1x16xf32, #tpu.memory_space<vmem>>, vector<1x1x16xf32>
    %31 = vector.shape_cast %30 : vector<1x1x16xf32> to vector<1x16xf32>
    %32 = vector.extract_strided_slice %19 {offsets = [0, 0], sizes = [8, 8], strides = [1, 1]} : vector<8x32xf32> to vector<8x8xf32>
    %cst_31 = arith.constant 0.353553385 : f32
    %33 = vector.broadcast %cst_31 : f32 to vector<8x8xf32>
    %34 = arith.mulf %32, %33 : vector<8x8xf32>
    %35 = arith.truncf %34 : vector<8x8xf32> to vector<8x8xbf16>
    %36 = vector.extract_strided_slice %24 {offsets = [0, 0], sizes = [16, 8], strides = [1, 1]} : vector<16x32xf32> to vector<16x8xf32>
    %37 = arith.truncf %36 : vector<16x8xf32> to vector<16x8xbf16>
    %38 = vector.extract_strided_slice %29 {offsets = [0, 0], sizes = [16, 8], strides = [1, 1]} : vector<16x32xf32> to vector<16x8xf32>
    %39 = arith.truncf %38 : vector<16x8xf32> to vector<16x8xbf16>
    %cst_32 = arith.constant dense<0.000000e+00> : vector<8x16xf32>
    %40 = tpu.matmul %35, %37, %cst_32 {dimension_numbers = #tpu.dot_dimension_numbers<[1], [1], [0], [0], [0, 0, 1, 0], [], []>} : vector<8x8xbf16>, vector<16x8xbf16>, vector<8x16xf32> -> vector<8x16xf32>
    %41 = vector.broadcast %31 : vector<1x16xf32> to vector<8x16xf32>
    %42 = arith.addf %40, %41 : vector<8x16xf32>
    %cst_33 = arith.constant dense<0xFF800000> : vector<8xf32>
    %43 = vector.multi_reduction <maximumf>, %42, %cst_33 [1] : vector<8x16xf32> to vector<8xf32>
    %44 = vector.shape_cast %43 : vector<8xf32> to vector<8x1xf32>
    %45 = vector.broadcast %44 : vector<8x1xf32> to vector<8x16xf32>
    %46 = arith.subf %42, %45 : vector<8x16xf32>
    %47 = math.exp %46 : vector<8x16xf32>
    %cst_34 = arith.constant dense<0.000000e+00> : vector<8xf32>
    %48 = vector.multi_reduction <add>, %47, %cst_34 [1] : vector<8x16xf32> to vector<8xf32>
    %49 = vector.shape_cast %48 : vector<8xf32> to vector<8x1xf32>
    %50 = tpu.reciprocal %49 {approx = true} : vector<8x1xf32> -> vector<8x1xf32>
    %51 = vector.broadcast %50 : vector<8x1xf32> to vector<8x16xf32>
    %52 = arith.mulf %47, %51 : vector<8x16xf32>
    %53 = arith.truncf %52 : vector<8x16xf32> to vector<8x16xbf16>
    %cst_35 = arith.constant dense<0.000000e+00> : vector<8x8xf32>
    %54 = tpu.matmul %53, %39, %cst_35 {dimension_numbers = #tpu.dot_dimension_numbers<[1], [0], [0], [1], [0, 0, 1, 1], [], []>} : vector<8x16xbf16>, vector<16x8xbf16>, vector<8x8xf32> -> vector<8x8xf32>
    %55 = vector.extract_strided_slice %19 {offsets = [0, 8], sizes = [8, 8], strides = [1, 1]} : vector<8x32xf32> to vector<8x8xf32>
    %cst_36 = arith.constant 0.353553385 : f32
    %56 = vector.broadcast %cst_36 : f32 to vector<8x8xf32>
    %57 = arith.mulf %55, %56 : vector<8x8xf32>
    %58 = arith.truncf %57 : vector<8x8xf32> to vector<8x8xbf16>
    %59 = vector.extract_strided_slice %24 {offsets = [0, 8], sizes = [16, 8], strides = [1, 1]} : vector<16x32xf32> to vector<16x8xf32>
    %60 = arith.truncf %59 : vector<16x8xf32> to vector<16x8xbf16>
    %61 = vector.extract_strided_slice %29 {offsets = [0, 8], sizes = [16, 8], strides = [1, 1]} : vector<16x32xf32> to vector<16x8xf32>
    %62 = arith.truncf %61 : vector<16x8xf32> to vector<16x8xbf16>
    %cst_37 = arith.constant dense<0.000000e+00> : vector<8x16xf32>
    %63 = tpu.matmul %58, %60, %cst_37 {dimension_numbers = #tpu.dot_dimension_numbers<[1], [1], [0], [0], [0, 0, 1, 0], [], []>} : vector<8x8xbf16>, vector<16x8xbf16>, vector<8x16xf32> -> vector<8x16xf32>
    %64 = vector.broadcast %31 : vector<1x16xf32> to vector<8x16xf32>
    %65 = arith.addf %63, %64 : vector<8x16xf32>
    %cst_38 = arith.constant dense<0xFF800000> : vector<8xf32>
    %66 = vector.multi_reduction <maximumf>, %65, %cst_38 [1] : vector<8x16xf32> to vector<8xf32>
    %67 = vector.shape_cast %66 : vector<8xf32> to vector<8x1xf32>
    %68 = vector.broadcast %67 : vector<8x1xf32> to vector<8x16xf32>
    %69 = arith.subf %65, %68 : vector<8x16xf32>
    %70 = math.exp %69 : vector<8x16xf32>
    %cst_39 = arith.constant dense<0.000000e+00> : vector<8xf32>
    %71 = vector.multi_reduction <add>, %70, %cst_39 [1] : vector<8x16xf32> to vector<8xf32>
    %72 = vector.shape_cast %71 : vector<8xf32> to vector<8x1xf32>
    %73 = tpu.reciprocal %72 {approx = true} : vector<8x1xf32> -> vector<8x1xf32>
    %74 = vector.broadcast %73 : vector<8x1xf32> to vector<8x16xf32>
    %75 = arith.mulf %70, %74 : vector<8x16xf32>
    %76 = arith.truncf %75 : vector<8x16xf32> to vector<8x16xbf16>
    %cst_40 = arith.constant dense<0.000000e+00> : vector<8x8xf32>
    %77 = tpu.matmul %76, %62, %cst_40 {dimension_numbers = #tpu.dot_dimension_numbers<[1], [0], [0], [1], [0, 0, 1, 1], [], []>} : vector<8x16xbf16>, vector<16x8xbf16>, vector<8x8xf32> -> vector<8x8xf32>
    %78 = arith.addf %52, %75 : vector<8x16xf32>
    %79 = vector.extract_strided_slice %19 {offsets = [0, 16], sizes = [8, 8], strides = [1, 1]} : vector<8x32xf32> to vector<8x8xf32>
    %cst_41 = arith.constant 0.353553385 : f32
    %80 = vector.broadcast %cst_41 : f32 to vector<8x8xf32>
    %81 = arith.mulf %79, %80 : vector<8x8xf32>
    %82 = arith.truncf %81 : vector<8x8xf32> to vector<8x8xbf16>
    %83 = vector.extract_strided_slice %24 {offsets = [0, 16], sizes = [16, 8], strides = [1, 1]} : vector<16x32xf32> to vector<16x8xf32>
    %84 = arith.truncf %83 : vector<16x8xf32> to vector<16x8xbf16>
    %85 = vector.extract_strided_slice %29 {offsets = [0, 16], sizes = [16, 8], strides = [1, 1]} : vector<16x32xf32> to vector<16x8xf32>
    %86 = arith.truncf %85 : vector<16x8xf32> to vector<16x8xbf16>
    %cst_42 = arith.constant dense<0.000000e+00> : vector<8x16xf32>
    %87 = tpu.matmul %82, %84, %cst_42 {dimension_numbers = #tpu.dot_dimension_numbers<[1], [1], [0], [0], [0, 0, 1, 0], [], []>} : vector<8x8xbf16>, vector<16x8xbf16>, vector<8x16xf32> -> vector<8x16xf32>
    %88 = vector.broadcast %31 : vector<1x16xf32> to vector<8x16xf32>
    %89 = arith.addf %87, %88 : vector<8x16xf32>
    %cst_43 = arith.constant dense<0xFF800000> : vector<8xf32>
    %90 = vector.multi_reduction <maximumf>, %89, %cst_43 [1] : vector<8x16xf32> to vector<8xf32>
    %91 = vector.shape_cast %90 : vector<8xf32> to vector<8x1xf32>
    %92 = vector.broadcast %91 : vector<8x1xf32> to vector<8x16xf32>
    %93 = arith.subf %89, %92 : vector<8x16xf32>
    %94 = math.exp %93 : vector<8x16xf32>
    %cst_44 = arith.constant dense<0.000000e+00> : vector<8xf32>
    %95 = vector.multi_reduction <add>, %94, %cst_44 [1] : vector<8x16xf32> to vector<8xf32>
    %96 = vector.shape_cast %95 : vector<8xf32> to vector<8x1xf32>
    %97 = tpu.reciprocal %96 {approx = true} : vector<8x1xf32> -> vector<8x1xf32>
    %98 = vector.broadcast %97 : vector<8x1xf32> to vector<8x16xf32>
    %99 = arith.mulf %94, %98 : vector<8x16xf32>
    %100 = arith.truncf %99 : vector<8x16xf32> to vector<8x16xbf16>
    %cst_45 = arith.constant dense<0.000000e+00> : vector<8x8xf32>
    %101 = tpu.matmul %100, %86, %cst_45 {dimension_numbers = #tpu.dot_dimension_numbers<[1], [0], [0], [1], [0, 0, 1, 1], [], []>} : vector<8x16xbf16>, vector<16x8xbf16>, vector<8x8xf32> -> vector<8x8xf32>
    %102 = arith.addf %78, %99 : vector<8x16xf32>
    %103 = vector.extract_strided_slice %19 {offsets = [0, 24], sizes = [8, 8], strides = [1, 1]} : vector<8x32xf32> to vector<8x8xf32>
    %cst_46 = arith.constant 0.353553385 : f32
    %104 = vector.broadcast %cst_46 : f32 to vector<8x8xf32>
    %105 = arith.mulf %103, %104 : vector<8x8xf32>
    %106 = arith.truncf %105 : vector<8x8xf32> to vector<8x8xbf16>
    %107 = vector.extract_strided_slice %24 {offsets = [0, 24], sizes = [16, 8], strides = [1, 1]} : vector<16x32xf32> to vector<16x8xf32>
    %108 = arith.truncf %107 : vector<16x8xf32> to vector<16x8xbf16>
    %109 = vector.extract_strided_slice %29 {offsets = [0, 24], sizes = [16, 8], strides = [1, 1]} : vector<16x32xf32> to vector<16x8xf32>
    %110 = arith.truncf %109 : vector<16x8xf32> to vector<16x8xbf16>
    %cst_47 = arith.constant dense<0.000000e+00> : vector<8x16xf32>
    %111 = tpu.matmul %106, %108, %cst_47 {dimension_numbers = #tpu.dot_dimension_numbers<[1], [1], [0], [0], [0, 0, 1, 0], [], []>} : vector<8x8xbf16>, vector<16x8xbf16>, vector<8x16xf32> -> vector<8x16xf32>
    %112 = vector.broadcast %31 : vector<1x16xf32> to vector<8x16xf32>
    %113 = arith.addf %111, %112 : vector<8x16xf32>
    %cst_48 = arith.constant dense<0xFF800000> : vector<8xf32>
    %114 = vector.multi_reduction <maximumf>, %113, %cst_48 [1] : vector<8x16xf32> to vector<8xf32>
    %115 = vector.shape_cast %114 : vector<8xf32> to vector<8x1xf32>
    %116 = vector.broadcast %115 : vector<8x1xf32> to vector<8x16xf32>
    %117 = arith.subf %113, %116 : vector<8x16xf32>
    %118 = math.exp %117 : vector<8x16xf32>
    %cst_49 = arith.constant dense<0.000000e+00> : vector<8xf32>
    %119 = vector.multi_reduction <add>, %118, %cst_49 [1] : vector<8x16xf32> to vector<8xf32>
    %120 = vector.shape_cast %119 : vector<8xf32> to vector<8x1xf32>
    %121 = tpu.reciprocal %120 {approx = true} : vector<8x1xf32> -> vector<8x1xf32>
    %122 = vector.broadcast %121 : vector<8x1xf32> to vector<8x16xf32>
    %123 = arith.mulf %118, %122 : vector<8x16xf32>
    %124 = arith.truncf %123 : vector<8x16xf32> to vector<8x16xbf16>
    %cst_50 = arith.constant dense<0.000000e+00> : vector<8x8xf32>
    %125 = tpu.matmul %124, %110, %cst_50 {dimension_numbers = #tpu.dot_dimension_numbers<[1], [0], [0], [1], [0, 0, 1, 1], [], []>} : vector<8x16xbf16>, vector<16x8xbf16>, vector<8x8xf32> -> vector<8x8xf32>
    %126 = arith.addf %102, %123 : vector<8x16xf32>
    %127 = tpu.concatenate %54, %77, %101, %125 in 1 : vector<8x8xf32>, vector<8x8xf32>, vector<8x8xf32>, vector<8x8xf32> -> vector<8x32xf32>
    %128 = arith.truncf %127 : vector<8x32xf32> to vector<8x32xbf16>
    %c0_51 = arith.constant 0 : index
    %c0_52 = arith.constant 0 : index
    %129 = vector.load %arg12[%c0_51, %c0_52] : memref<32x32xbf16, #tpu.memory_space<vmem>>, vector<32x32xbf16>
    %cst_53 = arith.constant dense<0.000000e+00> : vector<8x32xf32>
    %130 = tpu.matmul %128, %129, %cst_53 {dimension_numbers = #tpu.dot_dimension_numbers<[1], [0], [0], [1], [0, 0, 1, 1], [], []>} : vector<8x32xbf16>, vector<32x32xbf16>, vector<8x32xf32> -> vector<8x32xf32>
    %c0_54 = arith.constant 0 : index
    %c0_55 = arith.constant 0 : index
    %131 = vector.load %arg13[%c0_54, %c0_55] : memref<1x32xf32, #tpu.memory_space<vmem>>, vector<1x32xf32>
    %132 = vector.broadcast %131 : vector<1x32xf32> to vector<8x32xf32>
    %133 = arith.addf %130, %132 : vector<8x32xf32>
    %134 = arith.addf %1, %133 : vector<8x32xf32>
    %cst_56 = arith.constant dense<0.000000e+00> : vector<8xf32>
    %135 = vector.multi_reduction <add>, %134, %cst_56 [1] : vector<8x32xf32> to vector<8xf32>
    %136 = vector.shape_cast %135 : vector<8xf32> to vector<8x1xf32>
    %cst_57 = arith.constant 3.200000e+01 : f32
    %137 = vector.broadcast %cst_57 : f32 to vector<8x1xf32>
    %138 = arith.divf %136, %137 : vector<8x1xf32>
    %139 = vector.broadcast %138 : vector<8x1xf32> to vector<8x32xf32>
    %140 = arith.subf %134, %139 : vector<8x32xf32>
    %141 = arith.mulf %140, %140 : vector<8x32xf32>
    %cst_58 = arith.constant dense<0.000000e+00> : vector<8xf32>
    %142 = vector.multi_reduction <add>, %141, %cst_58 [1] : vector<8x32xf32> to vector<8xf32>
    %143 = vector.shape_cast %142 : vector<8xf32> to vector<8x1xf32>
    %cst_59 = arith.constant 3.200000e+01 : f32
    %144 = vector.broadcast %cst_59 : f32 to vector<8x1xf32>
    %145 = arith.divf %143, %144 : vector<8x1xf32>
    %146 = vector.broadcast %138 : vector<8x1xf32> to vector<8x32xf32>
    %147 = arith.subf %134, %146 : vector<8x32xf32>
    %cst_60 = arith.constant 9.99999974E-6 : f32
    %148 = vector.broadcast %cst_60 : f32 to vector<8x1xf32>
    %149 = arith.addf %145, %148 : vector<8x1xf32>
    %150 = math.rsqrt %149 : vector<8x1xf32>
    %151 = vector.broadcast %150 : vector<8x1xf32> to vector<8x32xf32>
    %152 = arith.mulf %147, %151 : vector<8x32xf32>
    %c0_61 = arith.constant 0 : index
    %c0_62 = arith.constant 0 : index
    %153 = vector.load %arg14[%c0_61, %c0_62] : memref<1x32xf32, #tpu.memory_space<vmem>>, vector<1x32xf32>
    %154 = vector.broadcast %153 : vector<1x32xf32> to vector<8x32xf32>
    %155 = arith.mulf %152, %154 : vector<8x32xf32>
    %c0_63 = arith.constant 0 : index
    %c0_64 = arith.constant 0 : index
    %156 = vector.load %arg15[%c0_63, %c0_64] : memref<1x32xf32, #tpu.memory_space<vmem>>, vector<1x32xf32>
    %157 = vector.broadcast %156 : vector<1x32xf32> to vector<8x32xf32>
    %158 = arith.addf %155, %157 : vector<8x32xf32>
    %c0_65 = arith.constant 0 : index
    %c0_66 = arith.constant 0 : index
    %c0_67 = arith.constant 0 : index
    %159 = vector.load %arg16[%c0_65, %c0_66, %c0_67] : memref<1x8x32xf32, #tpu.memory_space<vmem>>, vector<1x8x32xf32>
    %160 = vector.shape_cast %159 : vector<1x8x32xf32> to vector<8x32xf32>
    %161 = vector.shape_cast %158 : vector<8x32xf32> to vector<1x8x32xf32>
    tpu.vector_store %arg16[%c0_65, %c0_66, %c0_67], %161 {strides = array<i32>} : memref<1x8x32xf32, #tpu.memory_space<vmem>>, vector<1x8x32xf32>,
    %cst_68 = arith.constant 2.500000e-01 : f32
    %162 = vector.broadcast %cst_68 : f32 to vector<8x16xf32>
    %163 = arith.mulf %126, %162 : vector<8x16xf32>
    %c0_69 = arith.constant 0 : index
    %c0_70 = arith.constant 0 : index
    %c0_71 = arith.constant 0 : index
    %164 = vector.load %arg17[%c0_69, %c0_70, %c0_71] : memref<1x8x16xf32, #tpu.memory_space<vmem>>, vector<1x8x16xf32>
    %165 = vector.shape_cast %164 : vector<1x8x16xf32> to vector<8x16xf32>
    %166 = vector.shape_cast %163 : vector<8x16xf32> to vector<1x8x16xf32>
    tpu.vector_store %arg17[%c0_69, %c0_70, %c0_71], %166 {strides = array<i32>} : memref<1x8x16xf32, #tpu.memory_space<vmem>>, vector<1x8x16xf32>,
    return
  }
  func.func @transform_0(%arg0: i32) -> (i32, i32, i32) {
    %c0_i32 = arith.constant 0 : i32
    %c0_i32_0 = arith.constant 0 : i32
    %c0_i32_1 = arith.constant 0 : i32
    return %arg0, %c0_i32, %c0_i32_0 : i32, i32, i32
  }
  func.func @transform_1(%arg0: i32) -> (i32, i32, i32) {
    %c0_i32 = arith.constant 0 : i32
    %c0_i32_0 = arith.constant 0 : i32
    %c0_i32_1 = arith.constant 0 : i32
    return %arg0, %c0_i32, %c0_i32_0 : i32, i32, i32
  }
  func.func @transform_2(%arg0: i32) -> (i32, i32, i32) {
    %c0_i32 = arith.constant 0 : i32
    %c0_i32_0 = arith.constant 0 : i32
    %c0_i32_1 = arith.constant 0 : i32
    return %arg0, %c0_i32, %c0_i32_0 : i32, i32, i32
  }
  func.func @transform_3(%arg0: i32) -> (i32, i32, i32) {
    %c0_i32 = arith.constant 0 : i32
    %c0_i32_0 = arith.constant 0 : i32
    %c0_i32_1 = arith.constant 0 : i32
    return %arg0, %c0_i32, %c0_i32_0 : i32, i32, i32
  }
  func.func @transform_4(%arg0: i32) -> (i32, i32, i32) {
    %c0_i32 = arith.constant 0 : i32
    %c0_i32_0 = arith.constant 0 : i32
    %c0_i32_1 = arith.constant 0 : i32
    return %arg0, %c0_i32, %c0_i32_0 : i32, i32, i32
  }
  func.func @transform_5(%arg0: i32) -> (i32, i32) {
    %c0_i32 = arith.constant 0 : i32
    %c0_i32_0 = arith.constant 0 : i32
    %c0_i32_1 = arith.constant 0 : i32
    return %c0_i32, %c0_i32_0 : i32, i32
  }
  func.func @transform_6(%arg0: i32) -> (i32, i32) {
    %c0_i32 = arith.constant 0 : i32
    %c0_i32_0 = arith.constant 0 : i32
    %c0_i32_1 = arith.constant 0 : i32
    return %c0_i32, %c0_i32_0 : i32, i32
  }
  func.func @transform_7(%arg0: i32) -> (i32, i32) {
    %c0_i32 = arith.constant 0 : i32
    %c0_i32_0 = arith.constant 0 : i32
    %c0_i32_1 = arith.constant 0 : i32
    return %c0_i32, %c0_i32_0 : i32, i32
  }
  func.func @transform_8(%arg0: i32) -> (i32, i32) {
    %c0_i32 = arith.constant 0 : i32
    %c0_i32_0 = arith.constant 0 : i32
    %c0_i32_1 = arith.constant 0 : i32
    return %c0_i32, %c0_i32_0 : i32, i32
  }
  func.func @transform_9(%arg0: i32) -> (i32, i32) {
    %c0_i32 = arith.constant 0 : i32
    %c0_i32_0 = arith.constant 0 : i32
    %c0_i32_1 = arith.constant 0 : i32
    return %c0_i32, %c0_i32_0 : i32, i32
  }
  func.func @transform_10(%arg0: i32) -> (i32, i32) {
    %c0_i32 = arith.constant 0 : i32
    %c0_i32_0 = arith.constant 0 : i32
    %c0_i32_1 = arith.constant 0 : i32
    return %c0_i32, %c0_i32_0 : i32, i32
  }
  func.func @transform_11(%arg0: i32) -> (i32, i32) {
    %c0_i32 = arith.constant 0 : i32
    %c0_i32_0 = arith.constant 0 : i32
    %c0_i32_1 = arith.constant 0 : i32
    return %c0_i32, %c0_i32_0 : i32, i32
  }
  func.func @transform_12(%arg0: i32) -> (i32, i32) {
    %c0_i32 = arith.constant 0 : i32
    %c0_i32_0 = arith.constant 0 : i32
    %c0_i32_1 = arith.constant 0 : i32
    return %c0_i32, %c0_i32_0 : i32, i32
  }
  func.func @transform_13(%arg0: i32) -> (i32, i32) {
    %c0_i32 = arith.constant 0 : i32
    %c0_i32_0 = arith.constant 0 : i32
    %c0_i32_1 = arith.constant 0 : i32
    return %c0_i32, %c0_i32_0 : i32, i32
  }
  func.func @transform_14(%arg0: i32) -> (i32, i32) {
    %c0_i32 = arith.constant 0 : i32
    %c0_i32_0 = arith.constant 0 : i32
    %c0_i32_1 = arith.constant 0 : i32
    return %c0_i32, %c0_i32_0 : i32, i32
  }
  func.func @transform_15(%arg0: i32) -> (i32, i32, i32) {
    %c0_i32 = arith.constant 0 : i32
    %c0_i32_0 = arith.constant 0 : i32
    %c0_i32_1 = arith.constant 0 : i32
    return %arg0, %c0_i32, %c0_i32_0 : i32, i32, i32
  }
  func.func @transform_16(%arg0: i32) -> (i32, i32, i32) {
    %c0_i32 = arith.constant 0 : i32
    %c0_i32_0 = arith.constant 0 : i32
    %c0_i32_1 = arith.constant 0 : i32
    return %arg0, %c0_i32, %c0_i32_0 : i32, i32, i32
  }
}

module attributes {stable_mosaic.version = 11 : i64} {
  func.func @_layernorm_kernel(%arg0: i32, %arg1: memref<8x32xf32, #tpu.memory_space<vmem>>, %arg2: memref<1x32xf32, #tpu.memory_space<vmem>>, %arg3: memref<1x32xf32, #tpu.memory_space<vmem>>, %arg4: memref<8x32xf32, #tpu.memory_space<vmem>>) attributes {dimension_semantics = [#tpu.dimension_semantics<parallel>], iteration_bounds = array<i64: 2>, scalar_prefetch = 0 : i64, scratch_operands = 0 : i64, tpu.core_type = #tpu.core_type<tc>, window_params = [{transform_indices = @transform_0, window_bounds = array<i64: 8, 32>}, {pipeline_mode = #tpu.pipeline_mode<synchronous>, transform_indices = @transform_1, window_bounds = array<i64: 1, 32>}, {pipeline_mode = #tpu.pipeline_mode<synchronous>, transform_indices = @transform_2, window_bounds = array<i64: 1, 32>}, {transform_indices = @transform_3, window_bounds = array<i64: 8, 32>}]} {
    %c0 = arith.constant 0 : index
    %c0_0 = arith.constant 0 : index
    %0 = vector.load %arg1[%c0, %c0_0] : memref<8x32xf32, #tpu.memory_space<vmem>>, vector<8x32xf32>
    %cst = arith.constant dense<0.000000e+00> : vector<8xf32>
    %1 = vector.multi_reduction <add>, %0, %cst [1] : vector<8x32xf32> to vector<8xf32>
    %2 = vector.shape_cast %1 : vector<8xf32> to vector<8x1xf32>
    %cst_1 = arith.constant 3.200000e+01 : f32
    %3 = vector.broadcast %cst_1 : f32 to vector<8x1xf32>
    %4 = arith.divf %2, %3 : vector<8x1xf32>
    %5 = vector.broadcast %4 : vector<8x1xf32> to vector<8x32xf32>
    %6 = arith.subf %0, %5 : vector<8x32xf32>
    %7 = arith.mulf %6, %6 : vector<8x32xf32>
    %cst_2 = arith.constant dense<0.000000e+00> : vector<8xf32>
    %8 = vector.multi_reduction <add>, %7, %cst_2 [1] : vector<8x32xf32> to vector<8xf32>
    %9 = vector.shape_cast %8 : vector<8xf32> to vector<8x1xf32>
    %cst_3 = arith.constant 3.200000e+01 : f32
    %10 = vector.broadcast %cst_3 : f32 to vector<8x1xf32>
    %11 = arith.divf %9, %10 : vector<8x1xf32>
    %12 = vector.broadcast %4 : vector<8x1xf32> to vector<8x32xf32>
    %13 = arith.subf %0, %12 : vector<8x32xf32>
    %cst_4 = arith.constant 9.99999974E-6 : f32
    %14 = vector.broadcast %cst_4 : f32 to vector<8x1xf32>
    %15 = arith.addf %11, %14 : vector<8x1xf32>
    %16 = math.rsqrt %15 : vector<8x1xf32>
    %17 = vector.broadcast %16 : vector<8x1xf32> to vector<8x32xf32>
    %18 = arith.mulf %13, %17 : vector<8x32xf32>
    %c0_5 = arith.constant 0 : index
    %c0_6 = arith.constant 0 : index
    %19 = vector.load %arg2[%c0_5, %c0_6] : memref<1x32xf32, #tpu.memory_space<vmem>>, vector<1x32xf32>
    %20 = vector.broadcast %19 : vector<1x32xf32> to vector<8x32xf32>
    %21 = arith.mulf %18, %20 : vector<8x32xf32>
    %c0_7 = arith.constant 0 : index
    %c0_8 = arith.constant 0 : index
    %22 = vector.load %arg3[%c0_7, %c0_8] : memref<1x32xf32, #tpu.memory_space<vmem>>, vector<1x32xf32>
    %23 = vector.broadcast %22 : vector<1x32xf32> to vector<8x32xf32>
    %24 = arith.addf %21, %23 : vector<8x32xf32>
    %c0_9 = arith.constant 0 : index
    %c0_10 = arith.constant 0 : index
    %25 = vector.load %arg4[%c0_9, %c0_10] : memref<8x32xf32, #tpu.memory_space<vmem>>, vector<8x32xf32>
    tpu.vector_store %arg4[%c0_9, %c0_10], %24 {strides = array<i32>} : memref<8x32xf32, #tpu.memory_space<vmem>>, vector<8x32xf32>,
    return
  }
  func.func @transform_0(%arg0: i32) -> (i32, i32) {
    %c0_i32 = arith.constant 0 : i32
    %c0_i32_0 = arith.constant 0 : i32
    return %arg0, %c0_i32 : i32, i32
  }
  func.func @transform_1(%arg0: i32) -> (i32, i32) {
    %c0_i32 = arith.constant 0 : i32
    %c0_i32_0 = arith.constant 0 : i32
    %c0_i32_1 = arith.constant 0 : i32
    return %c0_i32, %c0_i32_0 : i32, i32
  }
  func.func @transform_2(%arg0: i32) -> (i32, i32) {
    %c0_i32 = arith.constant 0 : i32
    %c0_i32_0 = arith.constant 0 : i32
    %c0_i32_1 = arith.constant 0 : i32
    return %c0_i32, %c0_i32_0 : i32, i32
  }
  func.func @transform_3(%arg0: i32) -> (i32, i32) {
    %c0_i32 = arith.constant 0 : i32
    %c0_i32_0 = arith.constant 0 : i32
    return %arg0, %c0_i32 : i32, i32
  }
}

module attributes {stable_mosaic.version = 11 : i64} {
  func.func @_ffn_ln_kernel(%arg0: i32, %arg1: memref<8x32xf32, #tpu.memory_space<vmem>>, %arg2: memref<32x64xbf16, #tpu.memory_space<vmem>>, %arg3: memref<1x64xf32, #tpu.memory_space<vmem>>, %arg4: memref<64x32xbf16, #tpu.memory_space<vmem>>, %arg5: memref<1x32xf32, #tpu.memory_space<vmem>>, %arg6: memref<1x32xf32, #tpu.memory_space<vmem>>, %arg7: memref<1x32xf32, #tpu.memory_space<vmem>>, %arg8: memref<8x32xf32, #tpu.memory_space<vmem>>) attributes {dimension_semantics = [#tpu.dimension_semantics<parallel>], iteration_bounds = array<i64: 2>, scalar_prefetch = 0 : i64, scratch_operands = 0 : i64, tpu.core_type = #tpu.core_type<tc>, window_params = [{transform_indices = @transform_0, window_bounds = array<i64: 8, 32>}, {pipeline_mode = #tpu.pipeline_mode<synchronous>, transform_indices = @transform_1, window_bounds = array<i64: 32, 64>}, {pipeline_mode = #tpu.pipeline_mode<synchronous>, transform_indices = @transform_2, window_bounds = array<i64: 1, 64>}, {pipeline_mode = #tpu.pipeline_mode<synchronous>, transform_indices = @transform_3, window_bounds = array<i64: 64, 32>}, {pipeline_mode = #tpu.pipeline_mode<synchronous>, transform_indices = @transform_4, window_bounds = array<i64: 1, 32>}, {pipeline_mode = #tpu.pipeline_mode<synchronous>, transform_indices = @transform_5, window_bounds = array<i64: 1, 32>}, {pipeline_mode = #tpu.pipeline_mode<synchronous>, transform_indices = @transform_6, window_bounds = array<i64: 1, 32>}, {transform_indices = @transform_7, window_bounds = array<i64: 8, 32>}]} {
    %c0 = arith.constant 0 : index
    %c0_0 = arith.constant 0 : index
    %0 = vector.load %arg1[%c0, %c0_0] : memref<8x32xf32, #tpu.memory_space<vmem>>, vector<8x32xf32>
    %1 = arith.truncf %0 : vector<8x32xf32> to vector<8x32xbf16>
    %c0_1 = arith.constant 0 : index
    %c0_2 = arith.constant 0 : index
    %2 = vector.load %arg2[%c0_1, %c0_2] : memref<32x64xbf16, #tpu.memory_space<vmem>>, vector<32x64xbf16>
    %cst = arith.constant dense<0.000000e+00> : vector<8x64xf32>
    %3 = tpu.matmul %1, %2, %cst {dimension_numbers = #tpu.dot_dimension_numbers<[1], [0], [0], [1], [0, 0, 1, 1], [], []>} : vector<8x32xbf16>, vector<32x64xbf16>, vector<8x64xf32> -> vector<8x64xf32>
    %c0_3 = arith.constant 0 : index
    %c0_4 = arith.constant 0 : index
    %4 = vector.load %arg3[%c0_3, %c0_4] : memref<1x64xf32, #tpu.memory_space<vmem>>, vector<1x64xf32>
    %5 = vector.broadcast %4 : vector<1x64xf32> to vector<8x64xf32>
    %6 = arith.addf %3, %5 : vector<8x64xf32>
    %cst_5 = arith.constant 0.000000e+00 : f32
    %7 = vector.broadcast %cst_5 : f32 to vector<8x64xf32>
    %8 = arith.maximumf %6, %7 : vector<8x64xf32>
    %9 = arith.truncf %8 : vector<8x64xf32> to vector<8x64xbf16>
    %c0_6 = arith.constant 0 : index
    %c0_7 = arith.constant 0 : index
    %10 = vector.load %arg4[%c0_6, %c0_7] : memref<64x32xbf16, #tpu.memory_space<vmem>>, vector<64x32xbf16>
    %cst_8 = arith.constant dense<0.000000e+00> : vector<8x32xf32>
    %11 = tpu.matmul %9, %10, %cst_8 {dimension_numbers = #tpu.dot_dimension_numbers<[1], [0], [0], [1], [0, 0, 1, 1], [], []>} : vector<8x64xbf16>, vector<64x32xbf16>, vector<8x32xf32> -> vector<8x32xf32>
    %c0_9 = arith.constant 0 : index
    %c0_10 = arith.constant 0 : index
    %12 = vector.load %arg5[%c0_9, %c0_10] : memref<1x32xf32, #tpu.memory_space<vmem>>, vector<1x32xf32>
    %13 = vector.broadcast %12 : vector<1x32xf32> to vector<8x32xf32>
    %14 = arith.addf %11, %13 : vector<8x32xf32>
    %15 = arith.addf %0, %14 : vector<8x32xf32>
    %cst_11 = arith.constant dense<0.000000e+00> : vector<8xf32>
    %16 = vector.multi_reduction <add>, %15, %cst_11 [1] : vector<8x32xf32> to vector<8xf32>
    %17 = vector.shape_cast %16 : vector<8xf32> to vector<8x1xf32>
    %cst_12 = arith.constant 3.200000e+01 : f32
    %18 = vector.broadcast %cst_12 : f32 to vector<8x1xf32>
    %19 = arith.divf %17, %18 : vector<8x1xf32>
    %20 = vector.broadcast %19 : vector<8x1xf32> to vector<8x32xf32>
    %21 = arith.subf %15, %20 : vector<8x32xf32>
    %22 = arith.mulf %21, %21 : vector<8x32xf32>
    %cst_13 = arith.constant dense<0.000000e+00> : vector<8xf32>
    %23 = vector.multi_reduction <add>, %22, %cst_13 [1] : vector<8x32xf32> to vector<8xf32>
    %24 = vector.shape_cast %23 : vector<8xf32> to vector<8x1xf32>
    %cst_14 = arith.constant 3.200000e+01 : f32
    %25 = vector.broadcast %cst_14 : f32 to vector<8x1xf32>
    %26 = arith.divf %24, %25 : vector<8x1xf32>
    %27 = vector.broadcast %19 : vector<8x1xf32> to vector<8x32xf32>
    %28 = arith.subf %15, %27 : vector<8x32xf32>
    %cst_15 = arith.constant 9.99999974E-6 : f32
    %29 = vector.broadcast %cst_15 : f32 to vector<8x1xf32>
    %30 = arith.addf %26, %29 : vector<8x1xf32>
    %31 = math.rsqrt %30 : vector<8x1xf32>
    %32 = vector.broadcast %31 : vector<8x1xf32> to vector<8x32xf32>
    %33 = arith.mulf %28, %32 : vector<8x32xf32>
    %c0_16 = arith.constant 0 : index
    %c0_17 = arith.constant 0 : index
    %34 = vector.load %arg6[%c0_16, %c0_17] : memref<1x32xf32, #tpu.memory_space<vmem>>, vector<1x32xf32>
    %35 = vector.broadcast %34 : vector<1x32xf32> to vector<8x32xf32>
    %36 = arith.mulf %33, %35 : vector<8x32xf32>
    %c0_18 = arith.constant 0 : index
    %c0_19 = arith.constant 0 : index
    %37 = vector.load %arg7[%c0_18, %c0_19] : memref<1x32xf32, #tpu.memory_space<vmem>>, vector<1x32xf32>
    %38 = vector.broadcast %37 : vector<1x32xf32> to vector<8x32xf32>
    %39 = arith.addf %36, %38 : vector<8x32xf32>
    %c0_20 = arith.constant 0 : index
    %c0_21 = arith.constant 0 : index
    %40 = vector.load %arg8[%c0_20, %c0_21] : memref<8x32xf32, #tpu.memory_space<vmem>>, vector<8x32xf32>
    tpu.vector_store %arg8[%c0_20, %c0_21], %39 {strides = array<i32>} : memref<8x32xf32, #tpu.memory_space<vmem>>, vector<8x32xf32>,
    return
  }
  func.func @transform_0(%arg0: i32) -> (i32, i32) {
    %c0_i32 = arith.constant 0 : i32
    %c0_i32_0 = arith.constant 0 : i32
    return %arg0, %c0_i32 : i32, i32
  }
  func.func @transform_1(%arg0: i32) -> (i32, i32) {
    %c0_i32 = arith.constant 0 : i32
    %c0_i32_0 = arith.constant 0 : i32
    %c0_i32_1 = arith.constant 0 : i32
    return %c0_i32, %c0_i32_0 : i32, i32
  }
  func.func @transform_2(%arg0: i32) -> (i32, i32) {
    %c0_i32 = arith.constant 0 : i32
    %c0_i32_0 = arith.constant 0 : i32
    %c0_i32_1 = arith.constant 0 : i32
    return %c0_i32, %c0_i32_0 : i32, i32
  }
  func.func @transform_3(%arg0: i32) -> (i32, i32) {
    %c0_i32 = arith.constant 0 : i32
    %c0_i32_0 = arith.constant 0 : i32
    %c0_i32_1 = arith.constant 0 : i32
    return %c0_i32, %c0_i32_0 : i32, i32
  }
  func.func @transform_4(%arg0: i32) -> (i32, i32) {
    %c0_i32 = arith.constant 0 : i32
    %c0_i32_0 = arith.constant 0 : i32
    %c0_i32_1 = arith.constant 0 : i32
    return %c0_i32, %c0_i32_0 : i32, i32
  }
  func.func @transform_5(%arg0: i32) -> (i32, i32) {
    %c0_i32 = arith.constant 0 : i32
    %c0_i32_0 = arith.constant 0 : i32
    %c0_i32_1 = arith.constant 0 : i32
    return %c0_i32, %c0_i32_0 : i32, i32
  }
  func.func @transform_6(%arg0: i32) -> (i32, i32) {
    %c0_i32 = arith.constant 0 : i32
    %c0_i32_0 = arith.constant 0 : i32
    %c0_i32_1 = arith.constant 0 : i32
    return %c0_i32, %c0_i32_0 : i32, i32
  }
  func.func @transform_7(%arg0: i32) -> (i32, i32) {
    %c0_i32 = arith.constant 0 : i32
    %c0_i32_0 = arith.constant 0 : i32
    return %arg0, %c0_i32 : i32, i32
  }
}

</mosaic_0001>

<bundles_post_ra>
// kernel: transformer_forward.9
= control target key start
LH: loop header
LB: loop body
LE: loop exit
PB: predicated region body
PF: predicated region fallthrough
CT: control target
= control target key end

     0   :  { %12 = vsyncpa [#allocation3], 0  ;;  %s788_s0 = inlined_call_operand.vmem [shape: f32[16,32], index: 0, kind: input, shape index: {}]   ;;  %s789_s1 = inlined_call_operand.vmem [shape: bf16[32,64], index: 1, kind: input, shape index: {}]   ;;  %s790_s2 = inlined_call_operand.vmem [shape: f32[1,64], index: 2, kind: input, shape index: {}]   ;;  %s791_s3 = inlined_call_operand.vmem [shape: bf16[64,32], index: 3, kind: input, shape index: {}]   ;;  %s792_s4 = inlined_call_operand.vmem [shape: f32[1,32], index: 4, kind: input, shape index: {}]   ;;  %s793_s5 = inlined_call_operand.hbm [shape: f32[1,32], index: 5, kind: input, shape index: {}]   ;;  %s794_s6 = inlined_call_operand.hbm [shape: f32[1,32], index: 6, kind: input, shape index: {}]   ;;  %s795_s7 = inlined_call_operand.vmem [shape: f32[16,32], index: 7, kind: output, shape index: {}]  }
   0x1   :  { %13 = vsyncpa [#allocation5], 0  ;;  %s717_s24 = smov 0  }
   0x2 LB: > { %s226_s27 = sshll.u32 %s793_s5, 4  ;;  %s515_s28 = sadd.s32 4294967295, %s672_s24   ;;  %s672_s24 = sphi %s717_s24, %s19_s24   ;;  %s227_s27 = int_to_ptr.hbm [resolvable:$true] %s226_s27 }
   0x3   : > { %p517_p0 = scmp.ge.s32.totalorder %s672_s24, 1  ;;  %p202_p1 = scmp.lt.s32.totalorder %s672_s24, 3 }
   0x4   : > { %p575_p2 = scmp.eq.s32.totalorder %s515_s28, 0  ;;  %s674_s30 = smov [#allocation2]  }
   0x5   : > { %p728_p3 = pnand %p517_p0, %p202_p1  ;;  %s228_s8 = sshll.u32 %s674_s30, 4  ;;  %s229_s8 = int_to_ptr.vmem [resolvable:$true] %s228_s8 }
   0x6   : > { %s238_s11 = sshll.u32 %s794_s6, 4  ;;  %s675_s12 = smov [#allocation4]   ;;  %s239_s11 = int_to_ptr.hbm [resolvable:$true] %s238_s11 }
   0x7   : > { %p568_p4 = pneg %p728_p3  ;;  %s240_s13 = sshll.u32 %s675_s12, 4  ;;  %s241_s13 = int_to_ptr.vmem [resolvable:$true] %s240_s13 }
   0x8   : > { %260 = sbr.rel (%p728_p3) target bundleno = 555 (0x22b), region = 48 }
   0x9   : > { %p569_p5 = pnand %p575_p2, %p568_p4 }
   0xb   : > { %571 = dma.hbm_to_vmem [thread:$0]  (!%p569_p5), %s227_s27, 16, %s229_s8, [#allocation3]  }
   0xc   : > { %574 = dma.hbm_to_vmem [thread:$0]  (!%p569_p5), %s239_s11, 16, %s241_s13, [#allocation5]  }
   0xd   : > { %663 = dma.done.wait (%p575_p2), [#allocation3], 16  }
   0xe   : > { %665 = vsyncadd (%p575_p2), [#allocation3], 4294967280 }
   0xf   : > { %667 = dma.done.wait (%p575_p2), [#allocation5], 16  }
  0x10   : > { %669 = vsyncadd (%p575_p2), [#allocation5], 4294967280  ;;  %p296_p6 = scmp.lt.s32.totalorder %s515_s28, 1  ;;  %v555_v0 = vld [vmem:[%s789_s1 + $0x8] sm:$0xff]  ;;  %v554_v1 = vld [vmem:[%s789_s1] sm:$0xff]  ;;  %vm327_vm0 = vcmask 261120  }
  0x11   : > { %v559_v2 = vld [vmem:[%s791_s3 + $0x18] sm:$0xff]  ;;  %337 = vmatpush.bf16.msra.mxu0 %v555_v0  ;;  %v558_v4 = vld [vmem:[%s791_s3 + $0x10] sm:$0xff]  ;;  %v557_v6 = vld [vmem:[%s791_s3 + $0x8] sm:$0xff]  ;;  %vm382_vm1 = vcmask 523264   ;;  %v676_v20 = vmov 32.0  }
  0x12   : > { %s798_s28 = smov (!%p296_p6, %s515_s28), 1  ;;  %390 = vmatpush.bf16.msra.mxu1 %v559_v2  ;;  %v556_v7 = vld [vmem:[%s791_s3] sm:$0xff]  ;;  %594 = vrcp.f32 %v676_v20 }
  0x13   : > { %s524_s14 = sshll.u32 %s798_s28, 3  ;;  %v590_v8 = vld [vmem:[%s790_s2] ss:$0 sm:$0xff]  ;;  %v593_v43 = vld [vmem:[#allocation4] ss:$0 sm:$0xff] }
  0x14   : > { %s299_s17 = scalar_lea.vmem %s788_s0, %s524_s14  ;;  %v591_v14 = vld [vmem:[%s792_s4] ss:$0 sm:$0xff]  ;;  %s303_s16 = scalar_lea.vmem %s795_s7, %s524_s14 }
  0x15   : > { %v305_v3 = vld [vmem:[%s299_s17] sm:$0xff]  ;;  %338 = vmatpush.bf16.msra.mxu0 %v554_v1 }
  0x16   : > { %v306_v5 = vpack.c.bf16 %v305_v3, %v305_v3  ;;  %391 = vmatpush.bf16.msra.mxu1 %v558_v4  ;;  %v592_v41 = vld [vmem:[#allocation2] ss:$0 sm:$0xff] }
  0x18   : > { %534 = vmatmul.msk.bf16.vlgmr.msra.gmra.mxu0 %vm327_vm0, %v306_v5  ;;  %v595_v21 = vpop.eup %594 }
  0x19   : > { %v404_v22 = vmul.f32 32.0, %v595_v21  ;;  %vm408_vm2 = vweird.f32 %v595_v21 }
  0x1a   : > { %392 = vmatpush.bf16.msra.mxu1 %v557_v6 }
  0x1b   : > { %v405_v23 = vsub.f32 1.0, %v404_v22 }
  0x1d   : > { %v406_v24 = vmul.f32 %v595_v21, %v405_v23 }
  0x1e   : > { %393 = vmatpush.bf16.msra.mxu1 %v556_v7 }
  0x1f   : > { %v407_v25 = vadd.f32 %v595_v21, %v406_v24 }
  0x21   : > { %v409_v26 = vsel %vm408_vm2, %v595_v21, %v407_v25 }
  0x95   : > { %v340_v9 = vpop.f32.mrf.mxu0 }
  0x96   : > { %v341_v10 = vadd.f32 %v590_v8, %v340_v9 }
  0x98   : > { %v344_v11 = vmax.f32 %v341_v10, 0.0 }
  0x9a   : > { %v345_v12 = vpack.c.bf16 %v344_v11, %v344_v11 }
  0x9c   : > { %551 = vmatmul.msk.bf16.vlgmr.msra.gmra.mxu1 %vm382_vm1, %v345_v12 }
  0x9d   : > { %v342_v13 = vpop.f32.mrf.mxu0 }
 0x119   : > { %v395_v15 = vpop.f32.mrf.mxu1 }
 0x11a   : > { %v396_v16 = vadd.f32 %v591_v14, %v395_v15 }
 0x11c   : > { %v399_v17 = vadd.f32 %v396_v16, %v305_v3 }
 0x11e   : > { %v400_v18 = vsel %vm327_vm0, %v399_v17, 0.0 }
 0x11f   : > { %401 = vadd.xlane.f32.xlu0 %v400_v18 }
 0x121   : > { %v397_v19 = vpop.f32.mrf.mxu1 }
 0x192   : > { %v402_v27 = vpop.xlane.xlu0 %401 }
 0x193   : > { %v410_v28 = vmul.f32 %v409_v26, %v402_v27 }
 0x195   : > { %v411_v29 = vsub.f32 %v399_v17, %v410_v28 }
 0x197   : > { %v412_v30 = vmul.f32 %v411_v29, %v411_v29 }
 0x199   : > { %v413_v31 = vsel %vm327_vm0, %v412_v30, 0.0 }
 0x19a   : > { %414 = vadd.xlane.f32.xlu0 %v413_v31 }
 0x20d   : > { %v415_v32 = vpop.xlane.xlu0 %414 }
 0x20e   : > { %v416_v33 = vmul.f32 %v415_v32, %v409_v26 }
 0x210   : > { %v417_v34 = vadd.f32 1e-05, %v416_v33 }
 0x212   : > { %596 = vrsqrt.f32 %v417_v34  ;;  %vm424_vm4 = vweird.f32 %v417_v34 }
 0x218   : > { %v597_v35 = vpop.eup %596 }
 0x219   : > { %v419_v36 = vmul.f32 %v597_v35, %v417_v34  ;;  %vm425_vm3 = vweird.f32 %v597_v35 }
 0x21a   : > { %vm426_vm5 = vmor %vm424_vm4, %vm425_vm3 }
 0x21b   : > { %v420_v37 = vmul.f32 %v597_v35, %v419_v36 }
 0x21d   : > { %v421_v38 = vmul.f32 0.5, %v420_v37 }
 0x21f   : > { %v422_v39 = vsub.f32 1.5, %v421_v38 }
 0x221   : > { %v423_v40 = vmul.f32 %v597_v35, %v422_v39 }
 0x223   : > { %v427_v42 = vsel %vm426_vm5, %v597_v35, %v423_v40 }
 0x224   : > { %v428_v44 = vmul.f32 %v427_v42, %v411_v29 }
 0x226   : > { %v433_v45 = vmul.f32 %v592_v41, %v428_v44 }
 0x228   : > { %v438_v46 = vadd.f32 %v593_v43, %v433_v45 }
 0x22a   : > { %439 = vst.msk [vmem:[%s303_s16] sm:$0xff] %vm327_vm0, %v438_v46 }
 0x22b PF: > { %s19_s24 = sadd.s32 1, %s672_s24  }
 0x22c   : > { %p16_p7 = scmp.ge.s32.totalorder %s19_s24, 4  }
 0x22e   :  { %18 = sbr.rel (!%p16_p7) target bundleno = 2 (0x2), region = 87 }
 0x233   :  { %459 = vsyncpa [#allocation3], 1 }
 0x234   :  { %461 = vsyncpa [#allocation3 + $0x1], 1 }
 0x235   :  { %462 = vsyncpa [#allocation5], 1 }

// kernel: transformer_forward.8
= control target key start
LH: loop header
LB: loop body
LE: loop exit
PB: predicated region body
PF: predicated region fallthrough
CT: control target
= control target key end

     0   :  { %s2197_s0 = inlined_call_operand.vmem [shape: f32[2,8,32], index: 0, kind: input, shape index: {}]   ;;  %s2198_s1 = inlined_call_operand.vmem [shape: f32[2,8,32], index: 1, kind: input, shape index: {}]   ;;  %s2199_s2 = inlined_call_operand.vmem [shape: f32[2,16,32], index: 2, kind: input, shape index: {}]   ;;  %s2200_s3 = inlined_call_operand.vmem [shape: f32[2,16,32], index: 3, kind: input, shape index: {}]   ;;  %s2201_s4 = inlined_call_operand.vmem [shape: f32[2,1,16], index: 4, kind: input, shape index: {}]   ;;  %s2202_s5 = inlined_call_operand.hbm [shape: bf16[32,32], index: 5, kind: input, shape index: {}]   ;;  %s2203_s6 = inlined_call_operand.hbm [shape: f32[1,32], index: 6, kind: input, shape index: {}]   ;;  %s2204_s7 = inlined_call_operand.hbm [shape: bf16[32,32], index: 7, kind: input, shape index: {}]   ;;  %s2205_s8 = inlined_call_operand.hbm [shape: f32[1,32], index: 8, kind: input, shape index: {}]   ;;  %s2206_s9 = inlined_call_operand.hbm [shape: bf16[32,32], index: 9, kind: input, shape index: {}]   ;;  %s2207_s10 = inlined_call_operand.hbm [shape: f32[1,32], index: 10, kind: input, shape index: {}]   ;;  %s2208_s11 = inlined_call_operand.hbm [shape: bf16[32,32], index: 11, kind: input, shape index: {}]   ;;  %s2209_s12 = inlined_call_operand.hbm [shape: f32[1,32], index: 12, kind: input, shape index: {}]   ;;  %s2210_s13 = inlined_call_operand.hbm [shape: f32[1,32], index: 13, kind: input, shape index: {}]   ;;  %s2211_s14 = inlined_call_operand.hbm [shape: f32[1,32], index: 14, kind: input, shape index: {}]   ;;  %s2212_s15 = inlined_call_operand.vmem [shape: f32[2,8,32], index: 15, kind: output, shape index: {}]  }
   0x1   :  { %2214 = sst [smem:[#allocation25_spill]] %s2203_s6 }
   0x2   :  { %2215 = sst [smem:[#allocation26_spill]] %s2205_s8 }
   0x3   :  { %2216 = sst [smem:[#allocation27_spill]] %s2207_s10 }
   0x4   :  { %20 = vsyncpa [#allocation3], 0 }
   0x5   :  { %21 = vsyncpa [#allocation5], 0 }
   0x6   :  { %22 = vsyncpa [#allocation8], 0 }
   0x7   :  { %23 = vsyncpa [#allocation11], 0 }
   0x8   :  { %24 = vsyncpa [#allocation14], 0 }
   0x9   :  { %25 = vsyncpa [#allocation17], 0  ;;  %s2015_s18 = smov 0  }
   0xa LB: > { %2217 = sst [smem:[#allocation24_spill]] %s1914_s18  ;;  %s2024_s22 = sadd.s32 4294967295, %s1914_s18   ;;  %s1914_s18 = sphi %s2015_s18, %s31_s18  }
   0xb   : > { %s2218_s6 = sld [smem:[#allocation25_spill]]  ;;  %p1353_p0 = scmp.ge.s32.totalorder %s1914_s18, 1 }
   0xc   : > { %p402_p1 = scmp.lt.s32.totalorder %s1914_s18, 3  ;;  %p1510_p2 = scmp.eq.s32.totalorder %s2024_s22, 0 }
   0xd   : > { %s1916_s24 = smov [#allocation4]   ;;  %s2220_s8 = sld [smem:[#allocation26_spill]] }
   0xe   : > { %p2029_p3 = pnand %p1353_p0, %p402_p1  ;;  %s430_s25 = sshll.u32 %s1916_s24, 4  ;;  %s431_s25 = int_to_ptr.vmem [resolvable:$true] %s430_s25 }
   0xf   : > { %s2221_s10 = sld [smem:[#allocation27_spill]]  ;;  %s1917_s19 = smov [#allocation7]  }
  0x10   : > { %p1479_p4 = pneg %p2029_p3  ;;  %s456_s20 = sshll.u32 %s1917_s19, 4  ;;  %s457_s20 = int_to_ptr.vmem [resolvable:$true] %s456_s20 }
  0x11   : > { %s428_s21 = sshll.u32 %s2218_s6, 4  ;;  %s1918_s24 = smov [#allocation10]   ;;  %s429_s21 = int_to_ptr.hbm [resolvable:$true] %s428_s21 }
  0x12   : > { %p2043_p5 = pnand %p1510_p2, %p1479_p4  ;;  %s482_s26 = sshll.u32 %s1918_s24, 4  ;;  %s483_s26 = int_to_ptr.vmem [resolvable:$true] %s482_s26 }
  0x13   : > { %s454_s28 = sshll.u32 %s2220_s8, 4  ;;  %s506_s30 = sshll.u32 %s2209_s12, 4  ;;  %s455_s28 = int_to_ptr.hbm [resolvable:$true] %s454_s28  ;;  %s507_s30 = int_to_ptr.hbm [resolvable:$true] %s506_s30 }
  0x14   : > { %1485 = dma.hbm_to_vmem [thread:$0]  (!%p2043_p5), %s429_s21, 16, %s431_s25, [#allocation5]  }
  0x15   : > { %s480_s16 = sshll.u32 %s2221_s10, 4  ;;  %s413_s8 = sshll.u32 %s2202_s5, 4  ;;  %s481_s16 = int_to_ptr.hbm [resolvable:$true] %s480_s16  ;;  %s414_s8 = int_to_ptr.hbm [resolvable:$true] %s413_s8 }
  0x16   : > { %1491 = dma.hbm_to_vmem [thread:$0]  (!%p2043_p5), %s455_s28, 16, %s457_s20, [#allocation8]  }
  0x17   : > { %1497 = dma.hbm_to_vmem [thread:$0]  (!%p2043_p5), %s481_s16, 16, %s483_s26, [#allocation11]  }
  0x18   : > { %s1919_s10 = smov [#allocation13]   ;;  %s1920_s21 = smov [#allocation2]  }
  0x19   : > { %s508_s18 = sshll.u32 %s1919_s10, 4  ;;  %s415_s25 = sshll.u32 %s1920_s21, 4  ;;  %s509_s18 = int_to_ptr.vmem [resolvable:$true] %s508_s18  ;;  %s416_s25 = int_to_ptr.vmem [resolvable:$true] %s415_s25 }
  0x1a   : > { %1503 = dma.hbm_to_vmem [thread:$0]  (!%p2043_p5), %s507_s30, 16, %s509_s18, [#allocation14]  }
  0x1b   : > { %s1921_s28 = smov 64   ;;  %s1922_s20 = smov 4  }
  0x1c   : > { %1482 = dma.hbm_to_vmem [thread:$0]  (!%p2043_p5), %s414_s8, 256, %s416_s25, [#allocation3], %s1921_s28, %s1921_s28, %s1922_s20  }
  0x1d   : > { %s439_s6 = sshll.u32 %s2204_s7, 4  ;;  %s1923_s26 = smov [#allocation6]   ;;  %s440_s6 = int_to_ptr.hbm [resolvable:$true] %s439_s6 }
  0x1e   : > { %s441_s10 = sshll.u32 %s1923_s26, 4  ;;  %s465_s18 = sshll.u32 %s2206_s9, 4  ;;  %s442_s10 = int_to_ptr.vmem [resolvable:$true] %s441_s10  ;;  %s466_s18 = int_to_ptr.hbm [resolvable:$true] %s465_s18 }
  0x1f   : > { %1488 = dma.hbm_to_vmem [thread:$0]  (!%p2043_p5), %s440_s6, 256, %s442_s10, [#allocation5], %s1921_s28, %s1921_s28, %s1922_s20  }
  0x20   : > { %s1924_s30 = smov [#allocation9]   ;;  %s491_s25 = sshll.u32 %s2208_s11, 4  ;;  %s492_s25 = int_to_ptr.hbm [resolvable:$true] %s491_s25 }
  0x21   : > { %s467_s19 = sshll.u32 %s1924_s30, 4  ;;  %s518_s26 = sshll.u32 %s2210_s13, 4  ;;  %s468_s19 = int_to_ptr.vmem [resolvable:$true] %s467_s19  ;;  %s519_s26 = int_to_ptr.hbm [resolvable:$true] %s518_s26 }
  0x22   : > { %1494 = dma.hbm_to_vmem [thread:$0]  (!%p2043_p5), %s466_s18, 256, %s468_s19, [#allocation8], %s1921_s28, %s1921_s28, %s1922_s20  }
  0x23   : > { %s1925_s27 = smov [#allocation12]   ;;  %s1926_s6 = smov [#allocation15]  }
  0x24   : > { %s493_s29 = sshll.u32 %s1925_s27, 4  ;;  %s520_s10 = sshll.u32 %s1926_s6, 4  ;;  %s494_s29 = int_to_ptr.vmem [resolvable:$true] %s493_s29  ;;  %s521_s10 = int_to_ptr.vmem [resolvable:$true] %s520_s10 }
  0x25   : > { %1500 = dma.hbm_to_vmem [thread:$0]  (!%p2043_p5), %s492_s25, 256, %s494_s29, [#allocation11], %s1921_s28, %s1921_s28, %s1922_s20  }
  0x26   : > { %s530_s21 = sshll.u32 %s2211_s14, 4  ;;  %s1927_s18 = smov [#allocation16]   ;;  %s531_s21 = int_to_ptr.hbm [resolvable:$true] %s530_s21 }
  0x27   : > { %1506 = dma.hbm_to_vmem [thread:$0]  (!%p2043_p5), %s519_s26, 16, %s521_s10, [#allocation14]  }
  0x28   : > { %s532_s19 = sshll.u32 %s1927_s18, 4  ;;  %581 = sbr.rel (%p2029_p3) target bundleno = 1402 (0x57a), region = 80  ;;  %s533_s19 = int_to_ptr.vmem [resolvable:$true] %s532_s19 }
  0x29   : > { %1509 = dma.hbm_to_vmem [thread:$0]  (!%p2043_p5), %s531_s21, 16, %s533_s19, [#allocation17]  }
  0x2d   : > { %1889 = dma.done.wait (%p1510_p2), [#allocation3], 256  }
  0x2e   : > { %1891 = vsyncadd (%p1510_p2), [#allocation3], 4294967040 }
  0x2f   : > { %1893 = dma.done.wait (%p1510_p2), [#allocation5], 272  }
  0x30   : > { %1895 = vsyncadd (%p1510_p2), [#allocation5], 4294967024 }
  0x31   : > { %1897 = dma.done.wait (%p1510_p2), [#allocation8], 272  }
  0x32   : > { %1899 = vsyncadd (%p1510_p2), [#allocation8], 4294967024 }
  0x33   : > { %1901 = dma.done.wait (%p1510_p2), [#allocation11], 272  }
  0x34   : > { %1903 = vsyncadd (%p1510_p2), [#allocation11], 4294967024 }
  0x35   : > { %1905 = dma.done.wait (%p1510_p2), [#allocation14], 32  }
  0x36   : > { %1907 = vsyncadd (%p1510_p2), [#allocation14], 4294967264 }
  0x37   : > { %1909 = dma.done.wait (%p1510_p2), [#allocation17], 16  }
  0x38   : > { %1911 = vsyncadd (%p1510_p2), [#allocation17], 4294967280  ;;  %p690_p6 = scmp.lt.s32.totalorder %s2024_s22, 1  ;;  %v1434_v0 = vld [vmem:[#allocation6 + $0x8] sm:$0xff]  ;;  %v1433_v1 = vld [vmem:[#allocation6] sm:$0xff]  ;;  %vm748_vm0 = vcmask 261120  }
  0x39   : > { %v1432_v2 = vld [vmem:[#allocation2 + $0x8] sm:$0xff]  ;;  %794 = vmatpush.bf16.msra.mxu1 %v1434_v0  ;;  %v1431_v8 = vld [vmem:[#allocation2] sm:$0xff]  ;;  %v1558_v15 = vld [vmem:[#allocation4] ss:$0 sm:$0xff]  ;;  %s1928_s21 = smov 112   ;;  %vm847_vm1 = vcmask 64512  }
  0x3a   : > { %s2225_s22 = smov (!%p690_p6, %s2024_s22), 1  ;;  %758 = vmatpush.bf16.msra.mxu0 %v1432_v2  ;;  %v1557_v20 = vld [vmem:[#allocation7] ss:$0 sm:$0xff]  ;;  %s1929_s28 = smov 120   ;;  %v1436_v32 = vld [vmem:[#allocation9 + $0x8] sm:$0xff]  ;;  %v1435_v33 = vld [vmem:[#allocation9] sm:$0xff] }
  0x3b   : > { %s1429_s23 = sshll.u32 %s2225_s22, 4  ;;  %s2120_s17 = sshll.u32 %s2225_s22, 3  ;;  %831 = vmatpush.bf16.msra.mxu2 %v1436_v32  ;;  %vm867_vm2 = vcmask 130048   ;;  %v1560_v63 = vld [vmem:[#allocation10] ss:$0 sm:$0xff]  ;;  %vm1075_vm3 = vcmask 195584  }
  0x3c   : > { %s702_s25 = scalar_lea.vmem %s2199_s2, %s1429_s23  ;;  %s707_s26 = scalar_lea.vmem %s2200_s3, %s1429_s23 }
  0x3d   : > { %s693_s6 = scalar_lea.vmem %s2197_s0, %s2120_s17  ;;  %s697_s8 = scalar_lea.vmem %s2198_s1, %s2120_s17  ;;  %v2136_v3 = vld [vmem:[%s702_s25] sm:$0xff]  ;;  %v2138_v4 = vld [vmem:[%s702_s25 + $0x8] sm:$0xff]  ;;  %795 = vmatpush.bf16.msra.mxu1 %v1433_v1 }
  0x3e   : > { %v722_v5 = vld [vmem:[%s707_s26] sm:$0xff]  ;;  %v723_v6 = vld [vmem:[%s707_s26 + $0x8] sm:$0xff]  ;;  %759 = vmatpush.bf16.msra.mxu0 %v1431_v8  ;;  %s710_s23 = scalar_lea.vmem %s2201_s4, %s2225_s22  ;;  %s1930_s20 = smov 104   ;;  %v727_v44 = vpack.c.bf16 %v2138_v4, %v2136_v3 }
  0x3f   : > { %v724_v7 = vadd.f32 %v722_v5, %v2136_v3  ;;  %v2141_v9 = vld [vmem:[%s693_s6] sm:$0xff]  ;;  %v725_v10 = vadd.f32 %v723_v6, %v2138_v4  ;;  %832 = vmatpush.bf16.msra.mxu2 %v1435_v33  ;;  %s1931_s22 = smov 8   ;;  %s1932_s25 = smov 24  }
  0x40   : > { %v717_v11 = vld [vmem:[%s697_s8] sm:$0xff]  ;;  %s1933_s16 = smov 16   ;;  %s714_s27 = scalar_lea.vmem %s2212_s15, %s2120_s17 }
  0x41   : > { %v718_v12 = vadd.f32 %v717_v11, %v2141_v9  ;;  %v726_v13 = vpack.c.bf16 %v725_v10, %v724_v7  ;;  %v1559_v38 = vld [vmem:[%s710_s23] ss:$0 sm:$0xff] }
  0x42   : > { %1409 = vmatmul.msk.bf16.vlgmr.msra.gmra.mxu2 %vm748_vm0, %v727_v44 }
  0x43   : > { %v719_v14 = vpack.c.bf16 %v718_v12, %v718_v12  ;;  %1400 = vmatmul.msk.bf16.vlgmr.msra.gmra.mxu1 %vm748_vm0, %v726_v13 }
  0x45   : > { %1391 = vmatmul.msk.bf16.vlgmr.msra.gmra.mxu0 %vm748_vm0, %v719_v14 }
  0xc0   : > { %v797_v16 = vpop.f32.mrf.mxu1 }
  0xc1   : > { %v798_v24 = vadd.f32 %v1557_v20, %v797_v16 }
  0xc2   : > { %v761_v17 = vpop.f32.mrf.mxu0 }
  0xc3   : > { %v762_v18 = vadd.f32 %v1558_v15, %v761_v17 }
  0xc5   : > { %v840_v19 = vmul.f32 0.35355338, %v762_v18  ;;  %v834_v62 = vpop.f32.mrf.mxu2 }
  0xc6   : > { %v835_v0 = vadd.f32 %v1560_v63, %v834_v62  ;;  %v1934_v62 = vmov 32.0  }
  0xc7   : > { %v841_v21 = vpack.c.bf16 %v840_v19, %v840_v19 }
  0xc8   : > { %v799_v22 = vpop.f32.mrf.mxu1 }
  0xc9   : > { %953 = vrot.lane.b32.xlu2 %v841_v21, %s1928_s21  ;;  %v800_v25 = vadd.f32 %v1557_v20, %v799_v22 }
  0xca   : > { %v763_v23 = vpop.f32.mrf.mxu0 }
  0xcb   : > { %v842_v26 = vpack.c.bf16 %v800_v25, %v798_v24 }
  0xcd   : > { %955 = vrot.lane.b32.xlu1 %v842_v26, %s1928_s21  ;;  %900 = vrot.lane.b32.xlu0 %v842_v26, %s1929_s28  ;;  %v852_v27 = vsel %vm847_vm1, %v842_v26, 0  ;;  %v836_v1 = vpop.f32.mrf.mxu2 }
  0xce   : > { %861 = vmatpush.bf16.xpose.msra.mxu3 %v852_v27  ;;  %v837_v2 = vadd.f32 %v1560_v63, %v836_v1 }
  0xd0   : > { %v843_v3 = vpack.c.bf16 %v837_v2, %v835_v0 }
  0xd1   : > { %1007 = vrot.lane.b32.xlu2 %v841_v21, %s1930_s20 }
  0xd2   : > { %890 = vmatpush.bf16.msrb.mxu0 %v843_v3 }
  0xd5   : > { %1009 = vrot.lane.b32.xlu1 %v842_v26, %s1930_s20  ;;  %897 = vrot.lane.b32.xlu0 %v841_v21, %s1929_s28 }
  0xd6   : > { %1410 = vmatmul.msk.bf16.vlgmr.msra.gmra.mxu3 %vm847_vm1, %v841_v21 }
 0x123   : > { %v954_v34 = vpop.permute.xlu2 %953 }
 0x12b   : > { %v1008_v39 = vpop.permute.xlu2 %1007 }
 0x13f   : > { %v956_v28 = vpop.permute.xlu1 %955  ;;  %v901_v29 = vpop.permute.xlu0 %900 }
 0x140   : > { %v906_v30 = vsel %vm847_vm1, %v901_v29, 0  ;;  %v961_v31 = vsel %vm847_vm1, %v956_v28, 0 }
 0x141   : > { %915 = vmatpush.bf16.xpose.msrb.mxu1 %v906_v30  ;;  %970 = vmatpush.bf16.xpose.msrb.mxu3 %v961_v31 }
 0x147   : > { %v1010_v35 = vpop.permute.xlu1 %1009  ;;  %v898_v36 = vpop.permute.xlu0 %897 }
 0x148   : > { %v1015_v37 = vsel %vm847_vm1, %v1010_v35, 0  ;;  %1412 = vmatmul.msk.bf16.vlgmr.msrb.gmra.mxu1 %vm847_vm1, %v898_v36  ;;  %1414 = vmatmul.msk.bf16.vlgmr.msrb.gmra.mxu3 %vm847_vm1, %v954_v34 }
 0x149   : > { %1024 = vmatpush.bf16.xpose.msra.mxu1 %v1015_v37 }
 0x158   : > { %1416 = vmatmul.msk.bf16.vlgmr.msra.gmra.mxu1 %vm847_vm1, %v1008_v39 }
 0x159   : > { %v863_v40 = vpop.f32.mrf.mxu3 }
 0x15a   : > { %v864_v41 = vadd.f32 %v1559_v38, %v863_v40 }
 0x15c   : > { %v868_v42 = vsel %vm867_vm2, %v864_v41, -inf }
 0x15d   : > { %869 = vmax.xlane.f32.xlu1 %v868_v42 }
 0x161   : > { %v865_v43 = vpop.f32.mrf.mxu3 }
 0x1c5   : > { %v917_v45 = vpop.f32.mrf.mxu1 }
 0x1c6   : > { %v918_v46 = vadd.f32 %v1559_v38, %v917_v45 }
 0x1c8   : > { %v921_v47 = vsel %vm867_vm2, %v918_v46, -inf }
 0x1c9   : > { %922 = vmax.xlane.f32.xlu0 %v921_v47  ;;  %v1438_v47 = vld [vmem:[#allocation12 + $0x8] sm:$0xff] }
 0x1ca   : > { %1107 = vmatpush.bf16.msra.mxu3 %v1438_v47 }
 0x1cb   : > { %v972_v48 = vpop.f32.mrf.mxu3 }
 0x1cc   : > { %v973_v58 = vadd.f32 %v1559_v38, %v972_v48  ;;  %v1437_v48 = vld [vmem:[#allocation12] sm:$0xff] }
 0x1cd   : > { %v919_v49 = vpop.f32.mrf.mxu1 }
 0x1ce   : > { %v976_v61 = vsel %vm867_vm2, %v973_v58, -inf  ;;  %1108 = vmatpush.bf16.msra.mxu3 %v1437_v48 }
 0x1d0   : > { %v870_v50 = vpop.xlane.xlu1 %869 }
 0x1d1   : > { %v871_v51 = vsub.f32 %v864_v41, %v870_v50 }
 0x1d3   : > { %v872_v52 = vmul.f32 1.442695, %v871_v51  ;;  %v974_v53 = vpop.f32.mrf.mxu3 }
 0x1d5   : > { %1564 = vpow2.f32 %v872_v52  ;;  %v1026_v54 = vpop.f32.mrf.mxu1 }
 0x1d6   : > { %v1027_v55 = vadd.f32 %v1559_v38, %v1026_v54 }
 0x1d8   : > { %v1030_v56 = vsel %vm867_vm2, %v1027_v55, -inf }
 0x1d9   : > { %1031 = vmax.xlane.f32.xlu2 %v1030_v56  ;;  %v1561_v56 = vld [vmem:[#allocation13] ss:$0 sm:$0xff] }
 0x1db   : > { %v1565_v57 = vpop.eup %1564 }
 0x1dc   : > { %v874_v59 = vsel %vm867_vm2, %v1565_v57, 0.0 }
 0x1dd   : > { %875 = vadd.xlane.f32.xlu1 %v874_v59  ;;  %v1028_v60 = vpop.f32.mrf.mxu1 }
 0x1e1   : > { %977 = vmax.xlane.f32.xlu2 %v976_v61 }
 0x1f9   : > { %934 = vrot.lane.b32.xlu2 %v843_v3, %s1929_s28 }
 0x23c   : > { %v923_v4 = vpop.xlane.xlu0 %922 }
 0x23d   : > { %v924_v5 = vsub.f32 %v918_v46, %v923_v4 }
 0x23f   : > { %v925_v6 = vmul.f32 1.442695, %v924_v5 }
 0x241   : > { %1566 = vpow2.f32 %v925_v6 }
 0x247   : > { %v1567_v7 = vpop.eup %1566 }
 0x248   : > { %v927_v8 = vsel %vm867_vm2, %v1567_v7, 0.0 }
 0x249   : > { %928 = vadd.xlane.f32.xlu0 %v927_v8 }
 0x24c   : > { %v1032_v10 = vpop.xlane.xlu2 %1031 }
 0x24d   : > { %v1033_v11 = vsub.f32 %v1027_v55, %v1032_v10 }
 0x24f   : > { %v1034_v12 = vmul.f32 1.442695, %v1033_v11 }
 0x250   : > { %v876_v13 = vpop.xlane.xlu1 %875 }
 0x251   : > { %1568 = vpow2.f32 %v1034_v12 }
 0x252   : > { %1570 = vrcp.f32 %v876_v13 }
 0x254   : > { %v978_v14 = vpop.xlane.xlu2 %977 }
 0x255   : > { %v979_v15 = vsub.f32 %v973_v58, %v978_v14 }
 0x257   : > { %v1569_v16 = vpop.eup %1568  ;;  %v980_v17 = vmul.f32 1.442695, %v979_v15 }
 0x258   : > { %v1571_v18 = vpop.eup %1570  ;;  %v1036_v19 = vsel %vm867_vm2, %v1569_v16, 0.0 }
 0x259   : > { %v878_v20 = vmul.f32 %v1571_v18, %v1565_v57  ;;  %1572 = vpow2.f32 %v980_v17  ;;  %1037 = vadd.xlane.f32.xlu0 %v1036_v19  ;;  %v1562_v19 = vld [vmem:[#allocation15] ss:$0 sm:$0xff] }
 0x25b   : > { %v879_v21 = vpack.c.bf16 %v878_v20, %v878_v20 }
 0x25c   : > { %v935_v24 = vpop.permute.xlu2 %934 }
 0x25d   : > { %1411 = vmatmul.msk.bf16.vlgmr.msrb.gmra.mxu0 %vm867_vm2, %v879_v21  ;;  %947 = vmatpush.bf16.msrb.mxu2 %v935_v24  ;;  %v1563_v21 = vld [vmem:[#allocation16] ss:$0 sm:$0xff] }
 0x25f   : > { %v1573_v22 = vpop.eup %1572 }
 0x260   : > { %v982_v23 = vsel %vm867_vm2, %v1573_v22, 0.0 }
 0x261   : > { %983 = vadd.xlane.f32.xlu1 %v982_v23 }
 0x26d   : > { %1042 = vrot.lane.b32.xlu0 %v843_v3, %s1930_s20 }
 0x27a   : > { %988 = vrot.lane.b32.xlu1 %v843_v3, %s1928_s21 }
 0x2bc   : > { %v929_v25 = vpop.xlane.xlu0 %928 }
 0x2bd   : > { %1574 = vrcp.f32 %v929_v25 }
 0x2c3   : > { %v1575_v26 = vpop.eup %1574 }
 0x2c4   : > { %v931_v27 = vmul.f32 %v1575_v26, %v1567_v7 }
 0x2c6   : > { %v932_v28 = vpack.c.bf16 %v931_v27, %v931_v27 }
 0x2c8   : > { %1413 = vmatmul.msk.bf16.vlgmr.msrb.gmra.mxu2 %vm867_vm2, %v932_v28 }
 0x2cc   : > { %v1038_v29 = vpop.xlane.xlu0 %1037 }
 0x2cd   : > { %1576 = vrcp.f32 %v1038_v29 }
 0x2d3   : > { %v1577_v30 = vpop.eup %1576 }
 0x2d4   : > { %v1040_v32 = vmul.f32 %v1577_v30, %v1569_v16  ;;  %v984_v33 = vpop.xlane.xlu1 %983 }
 0x2d5   : > { %1578 = vrcp.f32 %v984_v33 }
 0x2d6   : > { %v1041_v35 = vpack.c.bf16 %v1040_v32, %v1040_v32  ;;  %1580 = vrcp.f32 %v1934_v62 }
 0x2da   : > { %v892_v31 = vpop.f32.mrf.mxu0 }
 0x2db   : > { %v1579_v37 = vpop.eup %1578 }
 0x2dc   : > { %v986_v38 = vmul.f32 %v1579_v37, %v1573_v22  ;;  %v1581_v63 = vpop.eup %1580 }
 0x2dd   : > { %v1119_v0 = vmul.f32 32.0, %v1581_v63  ;;  %vm1123_vm4 = vweird.f32 %v1581_v63 }
 0x2de   : > { %v987_v40 = vpack.c.bf16 %v986_v38, %v986_v38 }
 0x2df   : > { %v1043_v34 = vpop.permute.xlu0 %1042  ;;  %v1120_v1 = vsub.f32 1.0, %v1119_v0 }
 0x2e0   : > { %1055 = vmatpush.bf16.msra.mxu2 %v1043_v34 }
 0x2e1   : > { %v1121_v2 = vmul.f32 %v1581_v63, %v1120_v1 }
 0x2e2   : > { %v894_v36 = vpop.f32.mrf.mxu0 }
 0x2e3   : > { %1417 = vmatmul.msk.bf16.vlgmr.msra.gmra.mxu2 %vm867_vm2, %v1041_v35  ;;  %v1122_v3 = vadd.f32 %v1581_v63, %v1121_v2 }
 0x2e5   : > { %v1124_v4 = vsel %vm1123_vm4, %v1581_v63, %v1122_v3 }
 0x2ec   : > { %v989_v39 = vpop.permute.xlu1 %988 }
 0x2ed   : > { %1001 = vmatpush.bf16.msra.mxu0 %v989_v39 }
 0x2f0   : > { %1415 = vmatmul.msk.bf16.vlgmr.msra.gmra.mxu0 %vm867_vm2, %v987_v40 }
 0x34b   : > { %v949_v41 = vpop.f32.mrf.mxu2 }
 0x34c   : > { %1062 = vrot.lane.b32.xlu2 %v949_v41, %s1931_s22 }
 0x353   : > { %v951_v42 = vpop.f32.mrf.mxu2 }
 0x366   : > { %v1057_v43 = vpop.f32.mrf.mxu2 }
 0x367   : > { %1070 = vrot.lane.b32.xlu2 %v1057_v43, %s1932_s25 }
 0x36d   : > { %v1003_v44 = vpop.f32.mrf.mxu0 }
 0x36e   : > { %v1059_v45 = vpop.f32.mrf.mxu2  ;;  %1066 = vrot.lane.b32.xlu0 %v1003_v44, %s1933_s16 }
 0x375   : > { %v1005_v46 = vpop.f32.mrf.mxu0 }
 0x3a6   : > { %v1063_v49 = vpop.permute.xlu2 %1062 }
 0x3a7   : > { %v1073_v50 = vsel %vm847_vm1, %v892_v31, %v1063_v49 }
 0x3c1   : > { %v1071_v52 = vpop.permute.xlu2 %1070 }
 0x3e0   : > { %v1067_v51 = vpop.permute.xlu0 %1066 }
 0x3e1   : > { %v1074_v53 = vsel %vm867_vm2, %v1073_v50, %v1067_v51 }
 0x3e2   : > { %v1076_v54 = vsel %vm1075_vm3, %v1074_v53, %v1071_v52 }
 0x3e3   : > { %v1077_v55 = vpack.c.bf16 %v1076_v54, %v1076_v54 }
 0x3e5   : > { %1426 = vmatmul.msk.bf16.vlgmr.msra.gmra.mxu3 %vm748_vm0, %v1077_v55 }
 0x468   : > { %v1110_v57 = vpop.f32.mrf.mxu3 }
 0x469   : > { %v1111_v58 = vadd.f32 %v1561_v56, %v1110_v57 }
 0x46b   : > { %v1114_v59 = vadd.f32 %v1111_v58, %v2141_v9 }
 0x46d   : > { %v1115_v60 = vsel %vm748_vm0, %v1114_v59, 0.0 }
 0x46e   : > { %1116 = vadd.xlane.f32.xlu1 %v1115_v60 }
 0x470   : > { %v1112_v61 = vpop.f32.mrf.mxu3 }
 0x4e1   : > { %v1117_v5 = vpop.xlane.xlu1 %1116 }
 0x4e2   : > { %v1125_v6 = vmul.f32 %v1124_v4, %v1117_v5 }
 0x4e4   : > { %v1126_v7 = vsub.f32 %v1114_v59, %v1125_v6 }
 0x4e6   : > { %v1127_v8 = vmul.f32 %v1126_v7, %v1126_v7 }
 0x4e8   : > { %v1128_v10 = vsel %vm748_vm0, %v1127_v8, 0.0 }
 0x4e9   : > { %1129 = vadd.xlane.f32.xlu0 %v1128_v10 }
 0x55c   : > { %v1130_v9 = vpop.xlane.xlu0 %1129 }
 0x55d   : > { %v1131_v11 = vmul.f32 %v1130_v9, %v1124_v4 }
 0x55f   : > { %v1132_v12 = vadd.f32 1e-05, %v1131_v11 }
 0x561   : > { %1582 = vrsqrt.f32 %v1132_v12  ;;  %vm1139_vm6 = vweird.f32 %v1132_v12 }
 0x567   : > { %v1583_v13 = vpop.eup %1582 }
 0x568   : > { %v1134_v14 = vmul.f32 %v1583_v13, %v1132_v12  ;;  %vm1140_vm5 = vweird.f32 %v1583_v13 }
 0x569   : > { %vm1141_vm7 = vmor %vm1139_vm6, %vm1140_vm5 }
 0x56a   : > { %v1135_v15 = vmul.f32 %v1583_v13, %v1134_v14 }
 0x56c   : > { %v1136_v16 = vmul.f32 0.5, %v1135_v15 }
 0x56e   : > { %v1137_v17 = vsub.f32 1.5, %v1136_v16 }
 0x570   : > { %v1138_v18 = vmul.f32 %v1583_v13, %v1137_v17 }
 0x572   : > { %v1142_v20 = vsel %vm1141_vm7, %v1583_v13, %v1138_v18 }
 0x573   : > { %v1143_v22 = vmul.f32 %v1142_v20, %v1126_v7 }
 0x575   : > { %v1148_v23 = vmul.f32 %v1562_v19, %v1143_v22 }
 0x577   : > { %v1153_v24 = vadd.f32 %v1563_v21, %v1148_v23 }
 0x579   : > { %1154 = vst.msk [vmem:[%s714_s27] sm:$0xff] %vm748_vm0, %v1153_v24 }
 0x57a PF: > { %s2223_s29 = sld [smem:[#allocation24_spill]] }
 0x580   : > { %s31_s18 = sadd.s32 1, %s2223_s29  }
 0x581   : > { %p28_p7 = scmp.ge.s32.totalorder %s31_s18, 4  }
 0x583   :  { %30 = sbr.rel (!%p28_p7) target bundleno = 10 (0xa), region = 163 }
 0x588   :  { %1174 = vsyncpa [#allocation3], 1 }
 0x589   :  { %1176 = vsyncpa [#allocation3 + $0x1], 1 }
 0x58a   :  { %1177 = vsyncpa [#allocation5], 1 }
 0x58b   :  { %1178 = vsyncpa [#allocation8], 1 }
 0x58c   :  { %1179 = vsyncpa [#allocation11], 1 }
 0x58d   :  { %1180 = vsyncpa [#allocation14], 1 }
 0x58e   :  { %1181 = vsyncpa [#allocation17], 1 }

// kernel: transformer_forward.7
= control target key start
LH: loop header
LB: loop body
LE: loop exit
PB: predicated region body
PF: predicated region fallthrough
CT: control target
= control target key end

     0   :  { %s1901_s0 = inlined_call_operand.vmem [shape: f32[2,8,32], index: 0, kind: input, shape index: {}, may-alias: {0,2}]   ;;  %s1902_s1 = inlined_call_operand.vmem [shape: f32[2,8,32], index: 1, kind: input, shape index: {}, may-alias: {1,3}]   ;;  %s1903_s2 = inlined_call_operand.vmem [shape: f32[2,8,32], index: 2, kind: input, shape index: {}, may-alias: {0,2}]   ;;  %s1904_s3 = inlined_call_operand.vmem [shape: f32[2,8,32], index: 3, kind: input, shape index: {}, may-alias: {1,3}]   ;;  %s1905_s4 = inlined_call_operand.vmem [shape: f32[2,1,8], index: 4, kind: input, shape index: {}]   ;;  %s1906_s5 = inlined_call_operand.hbm [shape: bf16[32,32], index: 5, kind: input, shape index: {}]   ;;  %s1907_s6 = inlined_call_operand.vmem [shape: f32[1,32], index: 6, kind: input, shape index: {}]   ;;  %s1908_s7 = inlined_call_operand.hbm [shape: bf16[32,32], index: 7, kind: input, shape index: {}]   ;;  %s1909_s8 = inlined_call_operand.vmem [shape: f32[1,32], index: 8, kind: input, shape index: {}]   ;;  %s1910_s9 = inlined_call_operand.hbm [shape: bf16[32,32], index: 9, kind: input, shape index: {}]   ;;  %s1911_s10 = inlined_call_operand.vmem [shape: f32[1,32], index: 10, kind: input, shape index: {}]   ;;  %s1912_s11 = inlined_call_operand.hbm [shape: bf16[32,32], index: 11, kind: input, shape index: {}]   ;;  %s1913_s12 = inlined_call_operand.vmem [shape: f32[1,32], index: 12, kind: input, shape index: {}]   ;;  %s1914_s13 = inlined_call_operand.hbm [shape: f32[1,32], index: 13, kind: input, shape index: {}]   ;;  %s1915_s14 = inlined_call_operand.hbm [shape: f32[1,32], index: 14, kind: input, shape index: {}]   ;;  %s1916_s15 = inlined_call_operand.vmem [shape: f32[2,8,32], index: 15, kind: output, shape index: {}]  }
   0x1   :  { %1918 = sst [smem:[#allocation17_spill]] %s1906_s5 }
   0x2   :  { %1919 = sst [smem:[#allocation18_spill]] %s1908_s7 }
   0x3   :  { %1920 = sst [smem:[#allocation19_spill]] %s1912_s11 }
   0x4   :  { %20 = vsyncpa [#allocation3], 0 }
   0x5   :  { %21 = vsyncpa [#allocation5], 0 }
   0x6   :  { %22 = vsyncpa [#allocation8], 0 }
   0x7   :  { %23 = vsyncpa [#allocation11], 0  ;;  %s1734_s18 = smov 0  }
   0x8 LB: > { %1921 = sst [smem:[#allocation16_spill]] %s1637_s18  ;;  %s1740_s19 = sadd.s32 4294967295, %s1637_s18   ;;  %s1637_s18 = sphi %s1734_s18, %s29_s18  }
   0x9   : > { %p1256_p0 = scmp.ge.s32.totalorder %s1637_s18, 1  ;;  %p400_p1 = scmp.lt.s32.totalorder %s1637_s18, 3 }
   0xa   : > { %p1373_p2 = scmp.eq.s32.totalorder %s1740_s19, 0  ;;  %s1922_s7 = sld [smem:[#allocation18_spill]] }
   0xb   : > { %p1748_p3 = pnand %p1256_p0, %p400_p1  ;;  %s1924_s11 = sld [smem:[#allocation19_spill]] }
   0xc   : > { %s1639_s27 = smov [#allocation4]   ;;  %s1640_s30 = smov [#allocation7]  }
   0xd   : > { %p1354_p4 = pneg %p1748_p3  ;;  %s430_s28 = sshll.u32 %s1639_s27, 4  ;;  %s431_s28 = int_to_ptr.vmem [resolvable:$true] %s430_s28 }
   0xe   : > { %s464_s16 = sshll.u32 %s1640_s30, 4  ;;  %s1926_s5 = sld [smem:[#allocation17_spill]]  ;;  %s465_s16 = int_to_ptr.vmem [resolvable:$true] %s464_s16 }
   0xf   : > { %p1759_p5 = pnand %p1373_p2, %p1354_p4  ;;  %s1641_s24 = smov 64  }
  0x10   : > { %s428_s22 = sshll.u32 %s1922_s7, 4  ;;  %s1642_s25 = smov 4   ;;  %s429_s22 = int_to_ptr.hbm [resolvable:$true] %s428_s22 }
  0x11   : > { %s462_s26 = sshll.u32 %s1924_s11, 4  ;;  %s1643_s27 = smov [#allocation2]   ;;  %s463_s26 = int_to_ptr.hbm [resolvable:$true] %s462_s26 }
  0x12   : > { %1360 = dma.hbm_to_vmem [thread:$0]  (!%p1759_p5), %s429_s22, 256, %s431_s28, [#allocation5], %s1641_s24, %s1641_s24, %s1642_s25  }
  0x13   : > { %1366 = dma.hbm_to_vmem [thread:$0]  (!%p1759_p5), %s463_s26, 256, %s465_s16, [#allocation8], %s1641_s24, %s1641_s24, %s1642_s25  }
  0x14   : > { %s411_s21 = sshll.u32 %s1926_s5, 4  ;;  %s413_s7 = sshll.u32 %s1643_s27, 4  ;;  %s412_s21 = int_to_ptr.hbm [resolvable:$true] %s411_s21  ;;  %s414_s7 = int_to_ptr.vmem [resolvable:$true] %s413_s7 }
  0x15   : > { %s445_s30 = sshll.u32 %s1910_s9, 4  ;;  %s480_s5 = sshll.u32 %s1914_s13, 4  ;;  %s446_s30 = int_to_ptr.hbm [resolvable:$true] %s445_s30  ;;  %s481_s5 = int_to_ptr.hbm [resolvable:$true] %s480_s5 }
  0x16   : > { %1357 = dma.hbm_to_vmem [thread:$0]  (!%p1759_p5), %s412_s21, 256, %s414_s7, [#allocation3], %s1641_s24, %s1641_s24, %s1642_s25  }
  0x17   : > { %s1644_s22 = smov [#allocation6]   ;;  %s1645_s26 = smov [#allocation9]  }
  0x18   : > { %s447_s28 = sshll.u32 %s1644_s22, 4  ;;  %s482_s16 = sshll.u32 %s1645_s26, 4  ;;  %s448_s28 = int_to_ptr.vmem [resolvable:$true] %s447_s28  ;;  %s483_s16 = int_to_ptr.vmem [resolvable:$true] %s482_s16 }
  0x19   : > { %1363 = dma.hbm_to_vmem [thread:$0]  (!%p1759_p5), %s446_s30, 256, %s448_s28, [#allocation5], %s1641_s24, %s1641_s24, %s1642_s25  }
  0x1a   : > { %s492_s18 = sshll.u32 %s1915_s14, 4  ;;  %s1646_s7 = smov [#allocation10]   ;;  %s493_s18 = int_to_ptr.hbm [resolvable:$true] %s492_s18 }
  0x1b   : > { %1369 = dma.hbm_to_vmem [thread:$0]  (!%p1759_p5), %s481_s5, 16, %s483_s16, [#allocation8]  }
  0x1c   : > { %s494_s21 = sshll.u32 %s1646_s7, 4  ;;  %541 = sbr.rel (%p1748_p3) target bundleno = 1381 (0x565), region = 80  ;;  %s495_s21 = int_to_ptr.vmem [resolvable:$true] %s494_s21 }
  0x1d   : > { %1372 = dma.hbm_to_vmem [thread:$0]  (!%p1759_p5), %s493_s18, 16, %s495_s21, [#allocation11]  }
  0x21   : > { %1620 = dma.done.wait (%p1373_p2), [#allocation3], 256  }
  0x22   : > { %1622 = vsyncadd (%p1373_p2), [#allocation3], 4294967040 }
  0x23   : > { %1624 = dma.done.wait (%p1373_p2), [#allocation5], 512  }
  0x24   : > { %1626 = vsyncadd (%p1373_p2), [#allocation5], 4294966784 }
  0x25   : > { %1628 = dma.done.wait (%p1373_p2), [#allocation8], 272  }
  0x26   : > { %1630 = vsyncadd (%p1373_p2), [#allocation8], 4294967024 }
  0x27   : > { %1632 = dma.done.wait (%p1373_p2), [#allocation11], 16  }
  0x28   : > { %1634 = vsyncadd (%p1373_p2), [#allocation11], 4294967280  ;;  %p628_p6 = scmp.lt.s32.totalorder %s1740_s19, 1  ;;  %v1323_v0 = vld [vmem:[#allocation2 + $0x8] sm:$0xff]  ;;  %v1325_v1 = vld [vmem:[#allocation4 + $0x8] sm:$0xff]  ;;  %vm681_vm0 = vcmask 261120  }
  0x29   : > { %v1322_v2 = vld [vmem:[#allocation2] sm:$0xff]  ;;  %v1324_v3 = vld [vmem:[#allocation4] sm:$0xff]  ;;  %691 = vmatpush.bf16.msra.mxu0 %v1323_v0  ;;  %727 = vmatpush.bf16.msra.mxu1 %v1325_v1  ;;  %vm778_vm1 = vcmask 64512   ;;  %s1647_s25 = smov 112   ;;  %s1648_s30 = smov 120   ;;  %v1327_v38 = vld [vmem:[#allocation6 + $0x8] sm:$0xff] }
  0x2a   : > { %s1929_s19 = smov (!%p628_p6, %s1740_s19), 1  ;;  %v1408_v12 = vld [vmem:[%s1907_s6] ss:$0 sm:$0xff]  ;;  %763 = vmatpush.bf16.msra.mxu2 %v1327_v38  ;;  %vm813_vm2 = vcmask 1043456   ;;  %s1650_s26 = smov 8   ;;  %vm1014_vm3 = vcmask 130048  }
  0x2b   : > { %s1810_s5 = sshll.u32 %s1929_s19, 3  ;;  %v1409_v13 = vld [vmem:[%s1909_s8] ss:$0 sm:$0xff]  ;;  %s1651_s16 = smov 24   ;;  %vm1016_vm4 = vcmask 195584  }
  0x2c   : > { %s631_s24 = scalar_lea.vmem %s1901_s0, %s1810_s5  ;;  %s635_s17 = scalar_lea.vmem %s1902_s1, %s1810_s5  ;;  %v1326_v39 = vld [vmem:[#allocation6] sm:$0xff] }
  0x2d   : > { %s639_s28 = scalar_lea.vmem %s1903_s2, %s1810_s5  ;;  %s643_s27 = scalar_lea.vmem %s1904_s3, %s1810_s5  ;;  %v1828_v4 = vld [vmem:[%s631_s24] sm:$0xff]  ;;  %692 = vmatpush.bf16.msra.mxu0 %v1322_v2  ;;  %728 = vmatpush.bf16.msra.mxu1 %v1324_v3 }
  0x2e   : > { %v653_v5 = vld [vmem:[%s635_s17] sm:$0xff]  ;;  %s646_s24 = scalar_lea.vmem %s1905_s4, %s1929_s19  ;;  %s1649_s17 = smov 104   ;;  %764 = vmatpush.bf16.msra.mxu2 %v1326_v39 }
  0x2f   : > { %v654_v6 = vadd.f32 %v653_v5, %v1828_v4  ;;  %v656_v7 = vld [vmem:[%s639_s28] sm:$0xff]  ;;  %s650_s23 = scalar_lea.vmem %s1916_s15, %s1810_s5 }
  0x30   : > { %v657_v8 = vld [vmem:[%s643_s27] sm:$0xff]  ;;  %v660_v40 = vpack.c.bf16 %v656_v7, %v656_v7  ;;  %s1652_s27 = smov 16  }
  0x31   : > { %v658_v9 = vadd.f32 %v657_v8, %v656_v7  ;;  %v655_v10 = vpack.c.bf16 %v654_v6, %v654_v6  ;;  %v1410_v32 = vld [vmem:[%s646_s24] ss:$0 sm:$0xff] }
  0x32   : > { %1302 = vmatmul.msk.bf16.vlgmr.msra.gmra.mxu2 %vm681_vm0, %v660_v40  ;;  %v1411_v58 = vld [vmem:[%s1911_s10] ss:$0 sm:$0xff] }
  0x33   : > { %v659_v11 = vpack.c.bf16 %v658_v9, %v658_v9  ;;  %1284 = vmatmul.msk.bf16.vlgmr.msra.gmra.mxu0 %vm681_vm0, %v655_v10 }
  0x35   : > { %1293 = vmatmul.msk.bf16.vlgmr.msra.gmra.mxu1 %vm681_vm0, %v659_v11 }
  0xb0   : > { %v694_v14 = vpop.f32.mrf.mxu0 }
  0xb1   : > { %v695_v16 = vadd.f32 %v1408_v12, %v694_v14 }
  0xb2   : > { %v730_v15 = vpop.f32.mrf.mxu1 }
  0xb3   : > { %v731_v17 = vadd.f32 %v1409_v13, %v730_v15  ;;  %v771_v18 = vmul.f32 0.35355338, %v695_v16 }
  0xb5   : > { %v773_v19 = vpack.c.bf16 %v731_v17, %v731_v17  ;;  %v772_v20 = vpack.c.bf16 %v771_v18, %v771_v18  ;;  %v766_v59 = vpop.f32.mrf.mxu2 }
  0xb6   : > { %v767_v60 = vadd.f32 %v1411_v58, %v766_v59 }
  0xb7   : > { %891 = vrot.lane.b32.xlu1 %v773_v19, %s1647_s25  ;;  %834 = vrot.lane.b32.xlu0 %v773_v19, %s1648_s30  ;;  %v783_v21 = vsel %vm778_vm1, %v773_v19, 0 }
  0xb8   : > { %792 = vmatpush.bf16.xpose.msra.mxu3 %v783_v21  ;;  %889 = vrot.lane.b32.xlu2 %v772_v20, %s1647_s25  ;;  %v696_v22 = vpop.f32.mrf.mxu0  ;;  %v774_v61 = vpack.c.bf16 %v767_v60, %v767_v60 }
  0xba   : > { %v732_v23 = vpop.f32.mrf.mxu1  ;;  %v815_v62 = vsel %vm813_vm2, %v774_v61, 0 }
  0xbb   : > { %824 = vmatpush.bf16.msrb.mxu0 %v815_v62 }
  0xbd   : > { %v768_v0 = vpop.f32.mrf.mxu2 }
  0xbf   : > { %947 = vrot.lane.b32.xlu1 %v773_v19, %s1649_s17  ;;  %831 = vrot.lane.b32.xlu0 %v772_v20, %s1648_s30 }
  0xc0   : > { %1303 = vmatmul.msk.bf16.vlgmr.msra.gmra.mxu3 %vm778_vm1, %v772_v20  ;;  %945 = vrot.lane.b32.xlu2 %v772_v20, %s1649_s17 }
 0x112   : > { %v890_v28 = vpop.permute.xlu2 %889 }
 0x11a   : > { %v946_v33 = vpop.permute.xlu2 %945 }
 0x129   : > { %v892_v24 = vpop.permute.xlu1 %891  ;;  %v835_v25 = vpop.permute.xlu0 %834 }
 0x12a   : > { %v840_v26 = vsel %vm778_vm1, %v835_v25, 0  ;;  %v897_v27 = vsel %vm778_vm1, %v892_v24, 0 }
 0x12b   : > { %849 = vmatpush.bf16.xpose.msrb.mxu1 %v840_v26  ;;  %906 = vmatpush.bf16.xpose.msrb.mxu3 %v897_v27 }
 0x131   : > { %v948_v29 = vpop.permute.xlu1 %947  ;;  %v832_v30 = vpop.permute.xlu0 %831 }
 0x132   : > { %v953_v31 = vsel %vm778_vm1, %v948_v29, 0  ;;  %1305 = vmatmul.msk.bf16.vlgmr.msrb.gmra.mxu1 %vm778_vm1, %v832_v30  ;;  %1307 = vmatmul.msk.bf16.vlgmr.msrb.gmra.mxu3 %vm778_vm1, %v890_v28 }
 0x133   : > { %962 = vmatpush.bf16.xpose.msra.mxu1 %v953_v31 }
 0x142   : > { %1309 = vmatmul.msk.bf16.vlgmr.msra.gmra.mxu1 %vm778_vm1, %v946_v33 }
 0x143   : > { %v794_v34 = vpop.f32.mrf.mxu3 }
 0x144   : > { %v795_v35 = vadd.f32 %v1410_v32, %v794_v34 }
 0x146   : > { %v798_v36 = vsel %vm778_vm1, %v795_v35, -inf }
 0x147   : > { %799 = vmax.xlane.f32.xlu1 %v798_v36 }
 0x14b   : > { %v796_v37 = vpop.f32.mrf.mxu3 }
 0x1af   : > { %v851_v41 = vpop.f32.mrf.mxu1 }
 0x1b0   : > { %v852_v42 = vadd.f32 %v1410_v32, %v851_v41 }
 0x1b2   : > { %v855_v43 = vsel %vm778_vm1, %v852_v42, -inf }
 0x1b3   : > { %856 = vmax.xlane.f32.xlu0 %v855_v43 }
 0x1b5   : > { %v908_v44 = vpop.f32.mrf.mxu3 }
 0x1b6   : > { %v909_v54 = vadd.f32 %v1410_v32, %v908_v44 }
 0x1b7   : > { %v853_v45 = vpop.f32.mrf.mxu1 }
 0x1b8   : > { %v912_v57 = vsel %vm778_vm1, %v909_v54, -inf }
 0x1ba   : > { %v800_v46 = vpop.xlane.xlu1 %799 }
 0x1bb   : > { %v801_v47 = vsub.f32 %v795_v35, %v800_v46  ;;  %v1329_v46 = vld [vmem:[#allocation7 + $0x8] sm:$0xff] }
 0x1bc   : > { %1048 = vmatpush.bf16.msra.mxu3 %v1329_v46 }
 0x1bd   : > { %v802_v48 = vmul.f32 1.442695, %v801_v47  ;;  %v910_v49 = vpop.f32.mrf.mxu3  ;;  %v1328_v47 = vld [vmem:[#allocation7] sm:$0xff] }
 0x1bf   : > { %1415 = vpow2.f32 %v802_v48  ;;  %v964_v50 = vpop.f32.mrf.mxu1 }
 0x1c0   : > { %v965_v51 = vadd.f32 %v1410_v32, %v964_v50  ;;  %1049 = vmatpush.bf16.msra.mxu3 %v1328_v47 }
 0x1c2   : > { %v968_v52 = vsel %vm778_vm1, %v965_v51, -inf }
 0x1c3   : > { %969 = vmax.xlane.f32.xlu2 %v968_v52 }
 0x1c5   : > { %v1416_v53 = vpop.eup %1415 }
 0x1c6   : > { %v804_v55 = vsel %vm778_vm1, %v1416_v53, 0.0 }
 0x1c7   : > { %805 = vadd.xlane.f32.xlu1 %v804_v55  ;;  %v966_v56 = vpop.f32.mrf.mxu1  ;;  %v1412_v55 = vld [vmem:[%s1913_s12] ss:$0 sm:$0xff] }
 0x1cb   : > { %913 = vmax.xlane.f32.xlu2 %v912_v57 }
 0x1e3   : > { %868 = vrot.lane.b32.xlu2 %v774_v61, %s1648_s30 }
 0x226   : > { %v857_v63 = vpop.xlane.xlu0 %856 }
 0x227   : > { %v858_v1 = vsub.f32 %v852_v42, %v857_v63 }
 0x229   : > { %v859_v2 = vmul.f32 1.442695, %v858_v1 }
 0x22b   : > { %1417 = vpow2.f32 %v859_v2 }
 0x231   : > { %v1418_v3 = vpop.eup %1417 }
 0x232   : > { %v861_v5 = vsel %vm778_vm1, %v1418_v3, 0.0 }
 0x233   : > { %862 = vadd.xlane.f32.xlu0 %v861_v5 }
 0x236   : > { %v970_v6 = vpop.xlane.xlu2 %969 }
 0x237   : > { %v971_v7 = vsub.f32 %v965_v51, %v970_v6 }
 0x239   : > { %v972_v8 = vmul.f32 1.442695, %v971_v7 }
 0x23a   : > { %v806_v9 = vpop.xlane.xlu1 %805 }
 0x23b   : > { %1419 = vpow2.f32 %v972_v8 }
 0x23c   : > { %1421 = vrcp.f32 %v806_v9 }
 0x23e   : > { %v914_v10 = vpop.xlane.xlu2 %913 }
 0x23f   : > { %v915_v11 = vsub.f32 %v909_v54, %v914_v10 }
 0x241   : > { %v1420_v12 = vpop.eup %1419  ;;  %v916_v13 = vmul.f32 1.442695, %v915_v11 }
 0x242   : > { %v1422_v14 = vpop.eup %1421  ;;  %v974_v15 = vsel %vm778_vm1, %v1420_v12, 0.0 }
 0x243   : > { %v808_v16 = vmul.f32 %v1422_v14, %v1416_v53  ;;  %1423 = vpow2.f32 %v916_v13  ;;  %975 = vadd.xlane.f32.xlu0 %v974_v15 }
 0x245   : > { %v809_v17 = vpack.c.bf16 %v808_v16, %v808_v16 }
 0x246   : > { %v869_v20 = vpop.permute.xlu2 %868 }
 0x247   : > { %1304 = vmatmul.msk.bf16.vlgmr.msrb.gmra.mxu0 %vm778_vm1, %v809_v17  ;;  %v874_v21 = vsel %vm813_vm2, %v869_v20, 0  ;;  %v1414_v20 = vld [vmem:[#allocation10] ss:$0 sm:$0xff] }
 0x248   : > { %883 = vmatpush.bf16.msrb.mxu2 %v874_v21 }
 0x249   : > { %v1424_v18 = vpop.eup %1423 }
 0x24a   : > { %v918_v19 = vsel %vm778_vm1, %v1424_v18, 0.0 }
 0x24b   : > { %919 = vadd.xlane.f32.xlu1 %v918_v19 }
 0x257   : > { %980 = vrot.lane.b32.xlu0 %v774_v61, %s1649_s17 }
 0x264   : > { %924 = vrot.lane.b32.xlu1 %v774_v61, %s1647_s25  ;;  %v1653_v61 = vmov 32.0  }
 0x2a6   : > { %v863_v22 = vpop.xlane.xlu0 %862 }
 0x2a7   : > { %1425 = vrcp.f32 %v863_v22 }
 0x2ad   : > { %v1426_v23 = vpop.eup %1425 }
 0x2ae   : > { %v865_v24 = vmul.f32 %v1426_v23, %v1418_v3 }
 0x2b0   : > { %v866_v25 = vpack.c.bf16 %v865_v24, %v865_v24 }
 0x2b2   : > { %1306 = vmatmul.msk.bf16.vlgmr.msrb.gmra.mxu2 %vm778_vm1, %v866_v25 }
 0x2b6   : > { %v976_v26 = vpop.xlane.xlu0 %975 }
 0x2b7   : > { %1427 = vrcp.f32 %v976_v26 }
 0x2bd   : > { %v1428_v28 = vpop.eup %1427 }
 0x2be   : > { %v978_v29 = vmul.f32 %v1428_v28, %v1420_v12  ;;  %v920_v30 = vpop.xlane.xlu1 %919 }
 0x2bf   : > { %1429 = vrcp.f32 %v920_v30 }
 0x2c0   : > { %v979_v33 = vpack.c.bf16 %v978_v29, %v978_v29  ;;  %1431 = vrcp.f32 %v1653_v61 }
 0x2c4   : > { %v826_v27 = vpop.f32.mrf.mxu0 }
 0x2c5   : > { %v1430_v35 = vpop.eup %1429 }
 0x2c6   : > { %v922_v36 = vmul.f32 %v1430_v35, %v1424_v18  ;;  %v1432_v62 = vpop.eup %1431  ;;  %v1413_v18 = vld [vmem:[#allocation9] ss:$0 sm:$0xff] }
 0x2c7   : > { %v1060_v63 = vmul.f32 32.0, %v1432_v62  ;;  %vm1064_vm5 = vweird.f32 %v1432_v62 }
 0x2c8   : > { %v923_v39 = vpack.c.bf16 %v922_v36, %v922_v36 }
 0x2c9   : > { %v981_v31 = vpop.permute.xlu0 %980  ;;  %v1061_v0 = vsub.f32 1.0, %v1060_v63 }
 0x2ca   : > { %v986_v32 = vsel %vm813_vm2, %v981_v31, 0 }
 0x2cb   : > { %995 = vmatpush.bf16.msra.mxu2 %v986_v32  ;;  %v1062_v1 = vmul.f32 %v1432_v62, %v1061_v0 }
 0x2cc   : > { %v828_v34 = vpop.f32.mrf.mxu0 }
 0x2cd   : > { %v1063_v2 = vadd.f32 %v1432_v62, %v1062_v1 }
 0x2ce   : > { %1310 = vmatmul.msk.bf16.vlgmr.msra.gmra.mxu2 %vm778_vm1, %v979_v33 }
 0x2cf   : > { %v1065_v3 = vsel %vm1064_vm5, %v1432_v62, %v1063_v2 }
 0x2d6   : > { %v925_v37 = vpop.permute.xlu1 %924 }
 0x2d7   : > { %v930_v38 = vsel %vm813_vm2, %v925_v37, 0 }
 0x2d8   : > { %939 = vmatpush.bf16.msra.mxu0 %v930_v38 }
 0x2db   : > { %1308 = vmatmul.msk.bf16.vlgmr.msra.gmra.mxu0 %vm778_vm1, %v923_v39 }
 0x335   : > { %v885_v40 = vpop.f32.mrf.mxu2 }
 0x336   : > { %1002 = vrot.lane.b32.xlu2 %v885_v40, %s1650_s26 }
 0x33d   : > { %v887_v41 = vpop.f32.mrf.mxu2 }
 0x351   : > { %v997_v42 = vpop.f32.mrf.mxu2 }
 0x352   : > { %1010 = vrot.lane.b32.xlu2 %v997_v42, %s1651_s16 }
 0x358   : > { %v941_v43 = vpop.f32.mrf.mxu0 }
 0x359   : > { %v999_v44 = vpop.f32.mrf.mxu2  ;;  %1006 = vrot.lane.b32.xlu0 %v941_v43, %s1652_s27 }
 0x360   : > { %v943_v45 = vpop.f32.mrf.mxu0 }
 0x390   : > { %v1003_v48 = vpop.permute.xlu2 %1002 }
 0x391   : > { %v1013_v49 = vsel %vm778_vm1, %v826_v27, %v1003_v48 }
 0x3ac   : > { %v1011_v51 = vpop.permute.xlu2 %1010 }
 0x3cb   : > { %v1007_v50 = vpop.permute.xlu0 %1006 }
 0x3cc   : > { %v1015_v52 = vsel %vm1014_vm3, %v1013_v49, %v1007_v50 }
 0x3cd   : > { %v1017_v53 = vsel %vm1016_vm4, %v1015_v52, %v1011_v51 }
 0x3ce   : > { %v1018_v54 = vpack.c.bf16 %v1017_v53, %v1017_v53 }
 0x3d0   : > { %1319 = vmatmul.msk.bf16.vlgmr.msra.gmra.mxu3 %vm681_vm0, %v1018_v54 }
 0x453   : > { %v1051_v56 = vpop.f32.mrf.mxu3 }
 0x454   : > { %v1052_v57 = vadd.f32 %v1412_v55, %v1051_v56 }
 0x456   : > { %v1055_v58 = vadd.f32 %v1052_v57, %v1828_v4 }
 0x458   : > { %v1056_v59 = vsel %vm681_vm0, %v1055_v58, 0.0 }
 0x459   : > { %1057 = vadd.xlane.f32.xlu1 %v1056_v59 }
 0x45b   : > { %v1053_v60 = vpop.f32.mrf.mxu3 }
 0x4cc   : > { %v1058_v5 = vpop.xlane.xlu1 %1057 }
 0x4cd   : > { %v1066_v6 = vmul.f32 %v1065_v3, %v1058_v5 }
 0x4cf   : > { %v1067_v7 = vsub.f32 %v1055_v58, %v1066_v6 }
 0x4d1   : > { %v1068_v8 = vmul.f32 %v1067_v7, %v1067_v7 }
 0x4d3   : > { %v1069_v9 = vsel %vm681_vm0, %v1068_v8, 0.0 }
 0x4d4   : > { %1070 = vadd.xlane.f32.xlu0 %v1069_v9 }
 0x547   : > { %v1071_v4 = vpop.xlane.xlu0 %1070 }
 0x548   : > { %v1072_v10 = vmul.f32 %v1071_v4, %v1065_v3 }
 0x54a   : > { %v1073_v11 = vadd.f32 1e-05, %v1072_v10 }
 0x54c   : > { %1433 = vrsqrt.f32 %v1073_v11  ;;  %vm1080_vm7 = vweird.f32 %v1073_v11 }
 0x552   : > { %v1434_v12 = vpop.eup %1433 }
 0x553   : > { %v1075_v13 = vmul.f32 %v1434_v12, %v1073_v11  ;;  %vm1081_vm6 = vweird.f32 %v1434_v12 }
 0x554   : > { %vm1082_vm8 = vmor %vm1080_vm7, %vm1081_vm6 }
 0x555   : > { %v1076_v14 = vmul.f32 %v1434_v12, %v1075_v13 }
 0x557   : > { %v1077_v15 = vmul.f32 0.5, %v1076_v14 }
 0x559   : > { %v1078_v16 = vsub.f32 1.5, %v1077_v15 }
 0x55b   : > { %v1079_v17 = vmul.f32 %v1434_v12, %v1078_v16 }
 0x55d   : > { %v1083_v19 = vsel %vm1082_vm8, %v1434_v12, %v1079_v17 }
 0x55e   : > { %v1084_v21 = vmul.f32 %v1083_v19, %v1067_v7 }
 0x560   : > { %v1089_v22 = vmul.f32 %v1413_v18, %v1084_v21 }
 0x562   : > { %v1094_v23 = vadd.f32 %v1414_v20, %v1089_v22 }
 0x564   : > { %1095 = vst.msk [vmem:[%s650_s23] sm:$0xff] %vm681_vm0, %v1094_v23 }
 0x565 PF: > { %s1927_s29 = sld [smem:[#allocation16_spill]] }
 0x56b   : > { %s29_s18 = sadd.s32 1, %s1927_s29  }
 0x56c   : > { %p26_p7 = scmp.ge.s32.totalorder %s29_s18, 4  }
 0x56e   :  { %28 = sbr.rel (!%p26_p7) target bundleno = 8 (0x8), region = 147 }
 0x573   :  { %1115 = vsyncpa [#allocation3], 1 }
 0x574   :  { %1117 = vsyncpa [#allocation3 + $0x1], 1 }
 0x575   :  { %1118 = vsyncpa [#allocation5], 1 }
 0x576   :  { %1119 = vsyncpa [#allocation8], 1 }
 0x577   :  { %1120 = vsyncpa [#allocation11], 1 }

// kernel: transformer_forward.10
= control target key start
LH: loop header
LB: loop body
LE: loop exit
PB: predicated region body
PF: predicated region fallthrough
CT: control target
= control target key end

     0   :  { %s2048_s0 = inlined_call_operand.vmem [shape: f32[2,8,32], index: 0, kind: input, shape index: {}, may-alias: {0,2}]   ;;  %s2049_s1 = inlined_call_operand.vmem [shape: f32[2,8,32], index: 1, kind: input, shape index: {}, may-alias: {1,3}]   ;;  %s2050_s2 = inlined_call_operand.vmem [shape: f32[2,8,32], index: 2, kind: input, shape index: {}, may-alias: {0,2}]   ;;  %s2051_s3 = inlined_call_operand.vmem [shape: f32[2,8,32], index: 3, kind: input, shape index: {}, may-alias: {1,3}]   ;;  %s2052_s4 = inlined_call_operand.vmem [shape: f32[2,1,8], index: 4, kind: input, shape index: {}]   ;;  %s2053_s5 = inlined_call_operand.vmem [shape: bf16[32,32], index: 5, kind: input, shape index: {}]   ;;  %s2054_s6 = inlined_call_operand.vmem [shape: f32[1,32], index: 6, kind: input, shape index: {}]   ;;  %s2055_s7 = inlined_call_operand.hbm [shape: bf16[32,32], index: 7, kind: input, shape index: {}]   ;;  %s2056_s8 = inlined_call_operand.hbm [shape: f32[1,32], index: 8, kind: input, shape index: {}]   ;;  %s2057_s9 = inlined_call_operand.hbm [shape: bf16[32,32], index: 9, kind: input, shape index: {}]   ;;  %s2058_s10 = inlined_call_operand.hbm [shape: f32[1,32], index: 10, kind: input, shape index: {}]   ;;  %s2059_s11 = inlined_call_operand.hbm [shape: bf16[32,32], index: 11, kind: input, shape index: {}]   ;;  %s2060_s12 = inlined_call_operand.hbm [shape: f32[1,32], index: 12, kind: input, shape index: {}]   ;;  %s2061_s13 = inlined_call_operand.hbm [shape: f32[1,32], index: 13, kind: input, shape index: {}]   ;;  %s2062_s14 = inlined_call_operand.hbm [shape: f32[1,32], index: 14, kind: input, shape index: {}]   ;;  %s2063_s15 = inlined_call_operand.vmem [shape: f32[2,8,32], index: 15, kind: output, shape index: {}]  }
   0x1   :  { %2064 = sst [smem:[#allocation20_spill]] %s2055_s7 }
   0x2   :  { %2065 = sst [smem:[#allocation21_spill]] %s2056_s8 }
   0x3   :  { %2066 = sst [smem:[#allocation22_spill]] %s2058_s10 }
   0x4   :  { %2067 = sst [smem:[#allocation23_spill]] %s2060_s12 }
   0x5   :  { %20 = vsyncpa [#allocation3], 0 }
   0x6   :  { %21 = vsyncpa [#allocation5], 0 }
   0x7   :  { %22 = vsyncpa [#allocation8], 0 }
   0x8   :  { %23 = vsyncpa [#allocation11], 0 }
   0x9   :  { %24 = vsyncpa [#allocation14], 0  ;;  %s1870_s18 = smov 0  }
   0xa LB: > { %s2068_s8 = sld [smem:[#allocation21_spill]]  ;;  %s1879_s22 = sadd.s32 4294967295, %s1771_s18   ;;  %s1771_s18 = sphi %s1870_s18, %s30_s18  }
   0xb   : > { %p1302_p0 = scmp.ge.s32.totalorder %s1771_s18, 1  ;;  %p401_p1 = scmp.lt.s32.totalorder %s1771_s18, 3 }
   0xc   : > { %p1437_p2 = scmp.eq.s32.totalorder %s1879_s22, 0  ;;  %s1773_s24 = smov [#allocation4]  }
   0xd   : > { %p1884_p3 = pnand %p1302_p0, %p401_p1  ;;  %s435_s25 = sshll.u32 %s1773_s24, 4  ;;  %s436_s25 = int_to_ptr.vmem [resolvable:$true] %s435_s25 }
   0xe   : > { %s2070_s10 = sld [smem:[#allocation22_spill]]  ;;  %s1774_s19 = smov [#allocation7]  }
   0xf   : > { %p1412_p4 = pneg %p1884_p3  ;;  %s2071_s12 = sld [smem:[#allocation23_spill]] }
  0x10   : > { %s433_s21 = sshll.u32 %s2068_s8, 4  ;;  %s461_s20 = sshll.u32 %s1774_s19, 4  ;;  %s434_s21 = int_to_ptr.hbm [resolvable:$true] %s433_s21  ;;  %s462_s20 = int_to_ptr.vmem [resolvable:$true] %s461_s20 }
  0x11   : > { %p1898_p5 = pnand %p1437_p2, %p1412_p4  ;;  %s1775_s24 = smov [#allocation10]  }
  0x12   : > { %s487_s26 = sshll.u32 %s1775_s24, 4  ;;  %s2073_s7 = sld [smem:[#allocation20_spill]]  ;;  %s488_s26 = int_to_ptr.vmem [resolvable:$true] %s487_s26 }
  0x13   : > { %1418 = dma.hbm_to_vmem [thread:$0]  (!%p1898_p5), %s434_s21, 16, %s436_s25, [#allocation5]  }
  0x14   : > { %s459_s28 = sshll.u32 %s2070_s10, 4  ;;  %s1776_s8 = smov [#allocation2]   ;;  %s460_s28 = int_to_ptr.hbm [resolvable:$true] %s459_s28 }
  0x15   : > { %s485_s16 = sshll.u32 %s2071_s12, 4  ;;  %s420_s19 = sshll.u32 %s1776_s8, 4  ;;  %s486_s16 = int_to_ptr.hbm [resolvable:$true] %s485_s16  ;;  %s421_s19 = int_to_ptr.vmem [resolvable:$true] %s420_s19 }
  0x16   : > { %1424 = dma.hbm_to_vmem [thread:$0]  (!%p1898_p5), %s460_s28, 16, %s462_s20, [#allocation8]  }
  0x17   : > { %1430 = dma.hbm_to_vmem [thread:$0]  (!%p1898_p5), %s486_s16, 16, %s488_s26, [#allocation11]  }
  0x18   : > { %s418_s30 = sshll.u32 %s2073_s7, 4  ;;  %s444_s21 = sshll.u32 %s2057_s9, 4  ;;  %s419_s30 = int_to_ptr.hbm [resolvable:$true] %s418_s30  ;;  %s445_s21 = int_to_ptr.hbm [resolvable:$true] %s444_s21 }
  0x19   : > { %s1777_s25 = smov 64   ;;  %s1778_s28 = smov 4  }
  0x1a   : > { %1415 = dma.hbm_to_vmem [thread:$0]  (!%p1898_p5), %s419_s30, 256, %s421_s19, [#allocation3], %s1777_s25, %s1777_s25, %s1778_s28  }
  0x1b   : > { %s1779_s20 = smov [#allocation6]   ;;  %s470_s16 = sshll.u32 %s2059_s11, 4  ;;  %s471_s16 = int_to_ptr.hbm [resolvable:$true] %s470_s16 }
  0x1c   : > { %s446_s24 = sshll.u32 %s1779_s20, 4  ;;  %s497_s12 = sshll.u32 %s2061_s13, 4  ;;  %s447_s24 = int_to_ptr.vmem [resolvable:$true] %s446_s24  ;;  %s498_s12 = int_to_ptr.hbm [resolvable:$true] %s497_s12 }
  0x1d   : > { %1421 = dma.hbm_to_vmem [thread:$0]  (!%p1898_p5), %s445_s21, 256, %s447_s24, [#allocation5], %s1777_s25, %s1777_s25, %s1778_s28  }
  0x1e   : > { %s1780_s26 = smov [#allocation9]   ;;  %s1781_s30 = smov [#allocation12]  }
  0x1f   : > { %s472_s7 = sshll.u32 %s1780_s26, 4  ;;  %s499_s19 = sshll.u32 %s1781_s30, 4  ;;  %s473_s7 = int_to_ptr.vmem [resolvable:$true] %s472_s7  ;;  %s500_s19 = int_to_ptr.vmem [resolvable:$true] %s499_s19 }
  0x20   : > { %1427 = dma.hbm_to_vmem [thread:$0]  (!%p1898_p5), %s471_s16, 256, %s473_s7, [#allocation8], %s1777_s25, %s1777_s25, %s1778_s28  }
  0x21   : > { %s509_s29 = sshll.u32 %s2062_s14, 4  ;;  %s1782_s21 = smov [#allocation13]   ;;  %s510_s29 = int_to_ptr.hbm [resolvable:$true] %s509_s29 }
  0x22   : > { %1433 = dma.hbm_to_vmem [thread:$0]  (!%p1898_p5), %s498_s12, 16, %s500_s19, [#allocation11]  }
  0x23   : > { %s511_s24 = sshll.u32 %s1782_s21, 4  ;;  %558 = sbr.rel (%p1884_p3) target bundleno = 1390 (0x56e), region = 80  ;;  %s512_s24 = int_to_ptr.vmem [resolvable:$true] %s511_s24 }
  0x24   : > { %1436 = dma.hbm_to_vmem [thread:$0]  (!%p1898_p5), %s510_s29, 16, %s512_s24, [#allocation14]  }
  0x28   : > { %1750 = dma.done.wait (%p1437_p2), [#allocation3], 256  }
  0x29   : > { %1752 = vsyncadd (%p1437_p2), [#allocation3], 4294967040 }
  0x2a   : > { %1754 = dma.done.wait (%p1437_p2), [#allocation5], 272  }
  0x2b   : > { %1756 = vsyncadd (%p1437_p2), [#allocation5], 4294967024 }
  0x2c   : > { %1758 = dma.done.wait (%p1437_p2), [#allocation8], 272  }
  0x2d   : > { %1760 = vsyncadd (%p1437_p2), [#allocation8], 4294967024 }
  0x2e   : > { %1762 = dma.done.wait (%p1437_p2), [#allocation11], 32  }
  0x2f   : > { %1764 = vsyncadd (%p1437_p2), [#allocation11], 4294967264 }
  0x30   : > { %1766 = dma.done.wait (%p1437_p2), [#allocation14], 16  }
  0x31   : > { %1768 = vsyncadd (%p1437_p2), [#allocation14], 4294967280  ;;  %p655_p6 = scmp.lt.s32.totalorder %s1879_s22, 1  ;;  %v1373_v0 = vld [vmem:[%s2053_s5 + $0x8] sm:$0xff]  ;;  %v1372_v2 = vld [vmem:[%s2053_s5] sm:$0xff]  ;;  %vm708_vm0 = vcmask 261120  }
  0x32   : > { %v1375_v1 = vld [vmem:[#allocation2 + $0x8] sm:$0xff]  ;;  %v1374_v3 = vld [vmem:[#allocation2] sm:$0xff]  ;;  %718 = vmatpush.bf16.msra.mxu0 %v1373_v0  ;;  %v1479_v13 = vld [vmem:[#allocation4] ss:$0 sm:$0xff]  ;;  %vm805_vm1 = vcmask 64512   ;;  %s1784_s10 = smov 120  }
  0x33   : > { %s2075_s22 = smov (!%p655_p6, %s1879_s22), 1  ;;  %754 = vmatpush.bf16.msra.mxu1 %v1375_v1  ;;  %v1478_v12 = vld [vmem:[%s2054_s6] ss:$0 sm:$0xff]  ;;  %s1785_s12 = smov 104   ;;  %v1376_v39 = vld [vmem:[#allocation6] sm:$0xff]  ;;  %vm840_vm2 = vcmask 1043456  }
  0x34   : > { %s1960_s7 = sshll.u32 %s2075_s22, 3  ;;  %s673_s16 = scalar_lea.vmem %s2052_s4, %s2075_s22  ;;  %v1377_v38 = vld [vmem:[#allocation6 + $0x8] sm:$0xff]  ;;  %v1481_v58 = vld [vmem:[#allocation7] ss:$0 sm:$0xff]  ;;  %vm1041_vm3 = vcmask 130048   ;;  %vm1043_vm4 = vcmask 195584  }
  0x35   : > { %s658_s25 = scalar_lea.vmem %s2048_s0, %s1960_s7  ;;  %s662_s8 = scalar_lea.vmem %s2049_s1, %s1960_s7  ;;  %v1480_v32 = vld [vmem:[%s673_s16] ss:$0 sm:$0xff]  ;;  %790 = vmatpush.bf16.msra.mxu2 %v1377_v38 }
  0x36   : > { %s666_s26 = scalar_lea.vmem %s2050_s2, %s1960_s7  ;;  %s670_s24 = scalar_lea.vmem %s2051_s3, %s1960_s7  ;;  %v1984_v4 = vld [vmem:[%s658_s25] sm:$0xff]  ;;  %719 = vmatpush.bf16.msra.mxu0 %v1372_v2 }
  0x37   : > { %v680_v5 = vld [vmem:[%s662_s8] sm:$0xff]  ;;  %755 = vmatpush.bf16.msra.mxu1 %v1374_v3  ;;  %s1783_s8 = smov 112   ;;  %s1786_s22 = smov 8  }
  0x38   : > { %v681_v6 = vadd.f32 %v680_v5, %v1984_v4  ;;  %v683_v7 = vld [vmem:[%s666_s26] sm:$0xff]  ;;  %s1787_s19 = smov 24   ;;  %s1788_s20 = smov 16  }
  0x39   : > { %v684_v8 = vld [vmem:[%s670_s24] sm:$0xff]  ;;  %791 = vmatpush.bf16.msra.mxu2 %v1376_v39  ;;  %v687_v40 = vpack.c.bf16 %v683_v7, %v683_v7  ;;  %s677_s21 = scalar_lea.vmem %s2063_s15, %s1960_s7 }
  0x3a   : > { %v685_v9 = vadd.f32 %v684_v8, %v683_v7  ;;  %v682_v10 = vpack.c.bf16 %v681_v6, %v681_v6 }
  0x3c   : > { %v686_v11 = vpack.c.bf16 %v685_v9, %v685_v9  ;;  %1334 = vmatmul.msk.bf16.vlgmr.msra.gmra.mxu0 %vm708_vm0, %v682_v10  ;;  %1352 = vmatmul.msk.bf16.vlgmr.msra.gmra.mxu2 %vm708_vm0, %v687_v40 }
  0x3e   : > { %1343 = vmatmul.msk.bf16.vlgmr.msra.gmra.mxu1 %vm708_vm0, %v686_v11 }
  0xb9   : > { %v721_v14 = vpop.f32.mrf.mxu0 }
  0xba   : > { %v722_v16 = vadd.f32 %v1478_v12, %v721_v14 }
  0xbb   : > { %v757_v15 = vpop.f32.mrf.mxu1 }
  0xbc   : > { %v758_v17 = vadd.f32 %v1479_v13, %v757_v15  ;;  %v798_v18 = vmul.f32 0.35355338, %v722_v16 }
  0xbe   : > { %v800_v19 = vpack.c.bf16 %v758_v17, %v758_v17  ;;  %v799_v20 = vpack.c.bf16 %v798_v18, %v798_v18 }
  0xbf   : > { %v793_v59 = vpop.f32.mrf.mxu2 }
  0xc0   : > { %918 = vrot.lane.b32.xlu1 %v800_v19, %s1783_s8  ;;  %861 = vrot.lane.b32.xlu0 %v800_v19, %s1784_s10  ;;  %v810_v21 = vsel %vm805_vm1, %v800_v19, 0  ;;  %v794_v60 = vadd.f32 %v1481_v58, %v793_v59 }
  0xc1   : > { %819 = vmatpush.bf16.xpose.msra.mxu3 %v810_v21  ;;  %916 = vrot.lane.b32.xlu2 %v799_v20, %s1783_s8  ;;  %v723_v22 = vpop.f32.mrf.mxu0 }
  0xc2   : > { %v801_v61 = vpack.c.bf16 %v794_v60, %v794_v60 }
  0xc3   : > { %v759_v23 = vpop.f32.mrf.mxu1 }
  0xc4   : > { %v842_v62 = vsel %vm840_vm2, %v801_v61, 0 }
  0xc5   : > { %851 = vmatpush.bf16.msrb.mxu0 %v842_v62 }
  0xc7   : > { %v795_v0 = vpop.f32.mrf.mxu2 }
  0xc8   : > { %974 = vrot.lane.b32.xlu1 %v800_v19, %s1785_s12  ;;  %858 = vrot.lane.b32.xlu0 %v799_v20, %s1784_s10 }
  0xc9   : > { %1353 = vmatmul.msk.bf16.vlgmr.msra.gmra.mxu3 %vm805_vm1, %v799_v20  ;;  %972 = vrot.lane.b32.xlu2 %v799_v20, %s1785_s12 }
 0x11b   : > { %v917_v28 = vpop.permute.xlu2 %916 }
 0x123   : > { %v973_v33 = vpop.permute.xlu2 %972 }
 0x132   : > { %v919_v24 = vpop.permute.xlu1 %918  ;;  %v862_v25 = vpop.permute.xlu0 %861 }
 0x133   : > { %v867_v26 = vsel %vm805_vm1, %v862_v25, 0  ;;  %v924_v27 = vsel %vm805_vm1, %v919_v24, 0 }
 0x134   : > { %876 = vmatpush.bf16.xpose.msrb.mxu1 %v867_v26  ;;  %933 = vmatpush.bf16.xpose.msrb.mxu3 %v924_v27 }
 0x13a   : > { %v975_v29 = vpop.permute.xlu1 %974  ;;  %v859_v30 = vpop.permute.xlu0 %858 }
 0x13b   : > { %v980_v31 = vsel %vm805_vm1, %v975_v29, 0  ;;  %1355 = vmatmul.msk.bf16.vlgmr.msrb.gmra.mxu1 %vm805_vm1, %v859_v30  ;;  %1357 = vmatmul.msk.bf16.vlgmr.msrb.gmra.mxu3 %vm805_vm1, %v917_v28 }
 0x13c   : > { %989 = vmatpush.bf16.xpose.msra.mxu1 %v980_v31 }
 0x14b   : > { %1359 = vmatmul.msk.bf16.vlgmr.msra.gmra.mxu1 %vm805_vm1, %v973_v33 }
 0x14c   : > { %v821_v34 = vpop.f32.mrf.mxu3 }
 0x14d   : > { %v822_v35 = vadd.f32 %v1480_v32, %v821_v34 }
 0x14f   : > { %v825_v36 = vsel %vm805_vm1, %v822_v35, -inf }
 0x150   : > { %826 = vmax.xlane.f32.xlu1 %v825_v36 }
 0x154   : > { %v823_v37 = vpop.f32.mrf.mxu3 }
 0x1b8   : > { %v878_v41 = vpop.f32.mrf.mxu1 }
 0x1b9   : > { %v879_v42 = vadd.f32 %v1480_v32, %v878_v41 }
 0x1bb   : > { %v882_v43 = vsel %vm805_vm1, %v879_v42, -inf }
 0x1bc   : > { %883 = vmax.xlane.f32.xlu0 %v882_v43 }
 0x1be   : > { %v935_v44 = vpop.f32.mrf.mxu3 }
 0x1bf   : > { %v936_v54 = vadd.f32 %v1480_v32, %v935_v44 }
 0x1c0   : > { %v880_v45 = vpop.f32.mrf.mxu1 }
 0x1c1   : > { %v939_v57 = vsel %vm805_vm1, %v936_v54, -inf }
 0x1c3   : > { %v827_v46 = vpop.xlane.xlu1 %826 }
 0x1c4   : > { %v828_v47 = vsub.f32 %v822_v35, %v827_v46  ;;  %v1379_v46 = vld [vmem:[#allocation9 + $0x8] sm:$0xff] }
 0x1c5   : > { %1075 = vmatpush.bf16.msra.mxu3 %v1379_v46 }
 0x1c6   : > { %v829_v48 = vmul.f32 1.442695, %v828_v47  ;;  %v937_v49 = vpop.f32.mrf.mxu3  ;;  %v1378_v47 = vld [vmem:[#allocation9] sm:$0xff] }
 0x1c8   : > { %1485 = vpow2.f32 %v829_v48  ;;  %v991_v50 = vpop.f32.mrf.mxu1 }
 0x1c9   : > { %v992_v51 = vadd.f32 %v1480_v32, %v991_v50  ;;  %1076 = vmatpush.bf16.msra.mxu3 %v1378_v47 }
 0x1cb   : > { %v995_v52 = vsel %vm805_vm1, %v992_v51, -inf }
 0x1cc   : > { %996 = vmax.xlane.f32.xlu2 %v995_v52 }
 0x1ce   : > { %v1486_v53 = vpop.eup %1485 }
 0x1cf   : > { %v831_v55 = vsel %vm805_vm1, %v1486_v53, 0.0 }
 0x1d0   : > { %832 = vadd.xlane.f32.xlu1 %v831_v55  ;;  %v993_v56 = vpop.f32.mrf.mxu1  ;;  %v1482_v55 = vld [vmem:[#allocation10] ss:$0 sm:$0xff] }
 0x1d4   : > { %940 = vmax.xlane.f32.xlu2 %v939_v57 }
 0x1ec   : > { %895 = vrot.lane.b32.xlu2 %v801_v61, %s1784_s10 }
 0x22f   : > { %v884_v63 = vpop.xlane.xlu0 %883 }
 0x230   : > { %v885_v1 = vsub.f32 %v879_v42, %v884_v63 }
 0x232   : > { %v886_v2 = vmul.f32 1.442695, %v885_v1 }
 0x234   : > { %1487 = vpow2.f32 %v886_v2 }
 0x23a   : > { %v1488_v3 = vpop.eup %1487 }
 0x23b   : > { %v888_v5 = vsel %vm805_vm1, %v1488_v3, 0.0 }
 0x23c   : > { %889 = vadd.xlane.f32.xlu0 %v888_v5 }
 0x23f   : > { %v997_v6 = vpop.xlane.xlu2 %996 }
 0x240   : > { %v998_v7 = vsub.f32 %v992_v51, %v997_v6 }
 0x242   : > { %v999_v8 = vmul.f32 1.442695, %v998_v7 }
 0x243   : > { %v833_v9 = vpop.xlane.xlu1 %832 }
 0x244   : > { %1489 = vpow2.f32 %v999_v8 }
 0x245   : > { %1491 = vrcp.f32 %v833_v9 }
 0x247   : > { %v941_v10 = vpop.xlane.xlu2 %940 }
 0x248   : > { %v942_v11 = vsub.f32 %v936_v54, %v941_v10 }
 0x24a   : > { %v1490_v12 = vpop.eup %1489  ;;  %v943_v13 = vmul.f32 1.442695, %v942_v11 }
 0x24b   : > { %v1492_v14 = vpop.eup %1491  ;;  %v1001_v15 = vsel %vm805_vm1, %v1490_v12, 0.0 }
 0x24c   : > { %v835_v16 = vmul.f32 %v1492_v14, %v1486_v53  ;;  %1493 = vpow2.f32 %v943_v13  ;;  %1002 = vadd.xlane.f32.xlu0 %v1001_v15 }
 0x24e   : > { %v836_v17 = vpack.c.bf16 %v835_v16, %v835_v16 }
 0x24f   : > { %v896_v20 = vpop.permute.xlu2 %895 }
 0x250   : > { %1354 = vmatmul.msk.bf16.vlgmr.msrb.gmra.mxu0 %vm805_vm1, %v836_v17  ;;  %v901_v21 = vsel %vm840_vm2, %v896_v20, 0  ;;  %v1484_v20 = vld [vmem:[#allocation13] ss:$0 sm:$0xff] }
 0x251   : > { %910 = vmatpush.bf16.msrb.mxu2 %v901_v21 }
 0x252   : > { %v1494_v18 = vpop.eup %1493 }
 0x253   : > { %v945_v19 = vsel %vm805_vm1, %v1494_v18, 0.0 }
 0x254   : > { %946 = vadd.xlane.f32.xlu1 %v945_v19 }
 0x260   : > { %1007 = vrot.lane.b32.xlu0 %v801_v61, %s1785_s12 }
 0x26d   : > { %951 = vrot.lane.b32.xlu1 %v801_v61, %s1783_s8  ;;  %v1789_v61 = vmov 32.0  }
 0x2af   : > { %v890_v22 = vpop.xlane.xlu0 %889 }
 0x2b0   : > { %1495 = vrcp.f32 %v890_v22 }
 0x2b6   : > { %v1496_v23 = vpop.eup %1495 }
 0x2b7   : > { %v892_v24 = vmul.f32 %v1496_v23, %v1488_v3 }
 0x2b9   : > { %v893_v25 = vpack.c.bf16 %v892_v24, %v892_v24 }
 0x2bb   : > { %1356 = vmatmul.msk.bf16.vlgmr.msrb.gmra.mxu2 %vm805_vm1, %v893_v25 }
 0x2bf   : > { %v1003_v26 = vpop.xlane.xlu0 %1002 }
 0x2c0   : > { %1497 = vrcp.f32 %v1003_v26 }
 0x2c6   : > { %v1498_v28 = vpop.eup %1497 }
 0x2c7   : > { %v1005_v29 = vmul.f32 %v1498_v28, %v1490_v12  ;;  %v947_v30 = vpop.xlane.xlu1 %946 }
 0x2c8   : > { %1499 = vrcp.f32 %v947_v30 }
 0x2c9   : > { %v1006_v33 = vpack.c.bf16 %v1005_v29, %v1005_v29  ;;  %1501 = vrcp.f32 %v1789_v61 }
 0x2cd   : > { %v853_v27 = vpop.f32.mrf.mxu0 }
 0x2ce   : > { %v1500_v35 = vpop.eup %1499 }
 0x2cf   : > { %v949_v36 = vmul.f32 %v1500_v35, %v1494_v18  ;;  %v1502_v62 = vpop.eup %1501  ;;  %v1483_v18 = vld [vmem:[#allocation12] ss:$0 sm:$0xff] }
 0x2d0   : > { %v1087_v63 = vmul.f32 32.0, %v1502_v62  ;;  %vm1091_vm5 = vweird.f32 %v1502_v62 }
 0x2d1   : > { %v950_v39 = vpack.c.bf16 %v949_v36, %v949_v36 }
 0x2d2   : > { %v1008_v31 = vpop.permute.xlu0 %1007  ;;  %v1088_v0 = vsub.f32 1.0, %v1087_v63 }
 0x2d3   : > { %v1013_v32 = vsel %vm840_vm2, %v1008_v31, 0 }
 0x2d4   : > { %1022 = vmatpush.bf16.msra.mxu2 %v1013_v32  ;;  %v1089_v1 = vmul.f32 %v1502_v62, %v1088_v0 }
 0x2d5   : > { %v855_v34 = vpop.f32.mrf.mxu0 }
 0x2d6   : > { %v1090_v2 = vadd.f32 %v1502_v62, %v1089_v1 }
 0x2d7   : > { %1360 = vmatmul.msk.bf16.vlgmr.msra.gmra.mxu2 %vm805_vm1, %v1006_v33 }
 0x2d8   : > { %v1092_v3 = vsel %vm1091_vm5, %v1502_v62, %v1090_v2 }
 0x2df   : > { %v952_v37 = vpop.permute.xlu1 %951 }
 0x2e0   : > { %v957_v38 = vsel %vm840_vm2, %v952_v37, 0 }
 0x2e1   : > { %966 = vmatpush.bf16.msra.mxu0 %v957_v38 }
 0x2e4   : > { %1358 = vmatmul.msk.bf16.vlgmr.msra.gmra.mxu0 %vm805_vm1, %v950_v39 }
 0x33e   : > { %v912_v40 = vpop.f32.mrf.mxu2 }
 0x33f   : > { %1029 = vrot.lane.b32.xlu2 %v912_v40, %s1786_s22 }
 0x346   : > { %v914_v41 = vpop.f32.mrf.mxu2 }
 0x35a   : > { %v1024_v42 = vpop.f32.mrf.mxu2 }
 0x35b   : > { %1037 = vrot.lane.b32.xlu2 %v1024_v42, %s1787_s19 }
 0x361   : > { %v968_v43 = vpop.f32.mrf.mxu0 }
 0x362   : > { %v1026_v44 = vpop.f32.mrf.mxu2  ;;  %1033 = vrot.lane.b32.xlu0 %v968_v43, %s1788_s20 }
 0x369   : > { %v970_v45 = vpop.f32.mrf.mxu0 }
 0x399   : > { %v1030_v48 = vpop.permute.xlu2 %1029 }
 0x39a   : > { %v1040_v49 = vsel %vm805_vm1, %v853_v27, %v1030_v48 }
 0x3b5   : > { %v1038_v51 = vpop.permute.xlu2 %1037 }
 0x3d4   : > { %v1034_v50 = vpop.permute.xlu0 %1033 }
 0x3d5   : > { %v1042_v52 = vsel %vm1041_vm3, %v1040_v49, %v1034_v50 }
 0x3d6   : > { %v1044_v53 = vsel %vm1043_vm4, %v1042_v52, %v1038_v51 }
 0x3d7   : > { %v1045_v54 = vpack.c.bf16 %v1044_v53, %v1044_v53 }
 0x3d9   : > { %1369 = vmatmul.msk.bf16.vlgmr.msra.gmra.mxu3 %vm708_vm0, %v1045_v54 }
 0x45c   : > { %v1078_v56 = vpop.f32.mrf.mxu3 }
 0x45d   : > { %v1079_v57 = vadd.f32 %v1482_v55, %v1078_v56 }
 0x45f   : > { %v1082_v58 = vadd.f32 %v1079_v57, %v1984_v4 }
 0x461   : > { %v1083_v59 = vsel %vm708_vm0, %v1082_v58, 0.0 }
 0x462   : > { %1084 = vadd.xlane.f32.xlu1 %v1083_v59 }
 0x464   : > { %v1080_v60 = vpop.f32.mrf.mxu3 }
 0x4d5   : > { %v1085_v5 = vpop.xlane.xlu1 %1084 }
 0x4d6   : > { %v1093_v6 = vmul.f32 %v1092_v3, %v1085_v5 }
 0x4d8   : > { %v1094_v7 = vsub.f32 %v1082_v58, %v1093_v6 }
 0x4da   : > { %v1095_v8 = vmul.f32 %v1094_v7, %v1094_v7 }
 0x4dc   : > { %v1096_v9 = vsel %vm708_vm0, %v1095_v8, 0.0 }
 0x4dd   : > { %1097 = vadd.xlane.f32.xlu0 %v1096_v9 }
 0x550   : > { %v1098_v4 = vpop.xlane.xlu0 %1097 }
 0x551   : > { %v1099_v10 = vmul.f32 %v1098_v4, %v1092_v3 }
 0x553   : > { %v1100_v11 = vadd.f32 1e-05, %v1099_v10 }
 0x555   : > { %1503 = vrsqrt.f32 %v1100_v11  ;;  %vm1107_vm7 = vweird.f32 %v1100_v11 }
 0x55b   : > { %v1504_v12 = vpop.eup %1503 }
 0x55c   : > { %v1102_v13 = vmul.f32 %v1504_v12, %v1100_v11  ;;  %vm1108_vm6 = vweird.f32 %v1504_v12 }
 0x55d   : > { %vm1109_vm8 = vmor %vm1107_vm7, %vm1108_vm6 }
 0x55e   : > { %v1103_v14 = vmul.f32 %v1504_v12, %v1102_v13 }
 0x560   : > { %v1104_v15 = vmul.f32 0.5, %v1103_v14 }
 0x562   : > { %v1105_v16 = vsub.f32 1.5, %v1104_v15 }
 0x564   : > { %v1106_v17 = vmul.f32 %v1504_v12, %v1105_v16 }
 0x566   : > { %v1110_v19 = vsel %vm1109_vm8, %v1504_v12, %v1106_v17 }
 0x567   : > { %v1111_v21 = vmul.f32 %v1110_v19, %v1094_v7 }
 0x569   : > { %v1116_v22 = vmul.f32 %v1483_v18, %v1111_v21 }
 0x56b   : > { %v1121_v23 = vadd.f32 %v1484_v20, %v1116_v22 }
 0x56d   : > { %1122 = vst.msk [vmem:[%s677_s21] sm:$0xff] %vm708_vm0, %v1121_v23 }
 0x56e PF: > { %s30_s18 = sadd.s32 1, %s1771_s18  }
 0x56f   : > { %p27_p7 = scmp.ge.s32.totalorder %s30_s18, 4  }
 0x571   :  { %29 = sbr.rel (!%p27_p7) target bundleno = 10 (0xa), region = 155 }
 0x576   :  { %1142 = vsyncpa [#allocation3], 1 }
 0x577   :  { %1144 = vsyncpa [#allocation3 + $0x1], 1 }
 0x578   :  { %1145 = vsyncpa [#allocation5], 1 }
 0x579   :  { %1146 = vsyncpa [#allocation8], 1 }
 0x57a   :  { %1147 = vsyncpa [#allocation11], 1 }
 0x57b   :  { %1148 = vsyncpa [#allocation14], 1 }

// kernel: transformer_forward.13
= control target key start
LH: loop header
LB: loop body
LE: loop exit
PB: predicated region body
PF: predicated region fallthrough
CT: control target
= control target key end

     0   :  { %8 = vsyncpa [#allocation3], 0  ;;  %s518_s0 = inlined_call_operand.vmem [shape: f32[16,32], index: 0, kind: input, shape index: {}]   ;;  %s519_s1 = inlined_call_operand.vmem [shape: f32[1,32], index: 1, kind: input, shape index: {}]   ;;  %s520_s2 = inlined_call_operand.vmem [shape: f32[1,32], index: 2, kind: input, shape index: {}]   ;;  %s521_s3 = inlined_call_operand.hbm [shape: f32[16,32], index: 3, kind: output, shape index: {}]  }
   0x1   :  { %10 = vsyncpa [#allocation3 + $0x1], 0  ;;  %s424_s12 = smov 0   ;;  %s426_s13 = smov 0  }
   0x2   :  { %s428_s14 = smov 0   ;;  %s430_s15 = smov 0  }
   0x3 LB: > { %s445_s16 = sadd.s32 4294967295, %s401_s15   ;;  %s283_s17 = sadd.s32 4294967294, %s401_s15   ;;  %s401_s15 = sphi %s430_s15, %s527_s15   ;;  %s397_s14 = sphi %s428_s14, %s526_s14   ;;  %s393_s13 = sphi %s426_s13, %s525_s13   ;;  %s389_s12 = sphi %s424_s12, %s524_s12  }
   0x4   : > { %s449_s18 = sadd.s32 1, %s401_s15   ;;  %s91_s19 = sadd.s32 1, %s397_s14 }
   0x5   : > { %s88_s20 = ssub.s32 %s401_s15, %s449_s18  ;;  %p101_p0 = scmp.ne.s32.totalorder %s397_s14, %s393_s13 }
   0x6   : > { %p89_p1 = scmp.eq.s32.totalorder %s88_s20, 0  ;;  %p102_p2 = scmp.eq.s32.totalorder %s445_s16, 1 }
   0x7   : > { %p107_p3 = scmp.ne.s32.totalorder %s393_s13, %s389_s12  ;;  %p108_p4 = scmp.eq.s32.totalorder %s283_s17, 1 }
   0x8   : > { %s460_s21 = scalar_select %p89_p1, %s397_s14, %s91_s19  }
   0x9   : > { %p462_p5 = por %p102_p2, %p101_p0  ;;  %p466_p6 = por %p108_p4, %p107_p3 }
   0xa   : > { %p286_p7 = scmp.ge.s32.totalorder %s401_s15, 1  ;;  %p139_p8 = scmp.lt.s32.totalorder %s401_s15, 3 }
   0xc   : > { %p140_p9 = pnand %p286_p7, %p139_p8 }
   0xd   : > { %p162_p10 = scmp.lt.s32.totalorder (!%p140_p9), %s445_s16, 1  ;;  %s159_s29 = sand.u32 (!%p140_p9), 1, %s393_s13  }
   0xe   : > { %143 = sbr.rel (%p140_p9) target bundleno = 295 (0x127), region = 32  ;;  %s287_s30 = sshll.u32 (!%p140_p9), %s159_s29, 3 }
   0xf   : > { %s290_s4 = sshll.u32 (!%p140_p9), %s445_s16, 3  ;;  %s161_s17 = scalar_lea.vmem (!%p140_p9), [#allocation2], %s287_s30 }
  0x10   : > { %s219_s9 = scalar_lea.hbm (!%p140_p9), %s521_s3, %s290_s4  ;;  %s209_s20 = scalar_lea.sflag (!%p140_p9), [#allocation3], %s159_s29 }
  0x11   : > { %s223_s19 = sshll.u32 (!%p140_p9), %s219_s9, 4  ;;  %s224_s19 = int_to_ptr.hbm [resolvable:$true] %s223_s19 }
  0x13   : > { %s163_s24 = scalar_select %p162_p10, %s445_s16, 1  ;;  %vm167_vm0 = vcmask 261120   ;;  %v403_v2 = vmov 32.0   ;;  %v333_v23 = vld [vmem:[%s519_s1] ss:$0 sm:$0xff] }
  0x14   : > { %335 = vrcp.f32 %v403_v2  ;;  %v334_v26 = vld [vmem:[%s520_s2] ss:$0 sm:$0xff]  ;;  %s221_s16 = sshll.u32 %s161_s17, 4  ;;  %s222_s16 = int_to_ptr.vmem [resolvable:$true] %s221_s16 }
  0x15   : > { %s288_s25 = sshll.u32 %s163_s24, 3  ;;  %s353_s24 = sshra.s32 %s224_s19, 4  ;;  %s354_s24 = int_to_ptr.hbm [resolvable:$true] %s353_s24 }
  0x16   : > { %s165_s28 = scalar_lea.vmem %s518_s0, %s288_s25  ;;  %s355_s25 = scalar_lea.hbm %s354_s24, 8 }
  0x17   : > { %v166_v0 = vld [vmem:[%s165_s28] sm:$0xff]  ;;  %p356_p11 = scmp.ne.s32.totalorder %s354_s24, %s355_s25  ;;  %s359_s28 = scalar_lea.hbm %s521_s3, 16 }
  0x18   : > { %v168_v1 = vsel %vm167_vm0, %v166_v0, 0.0  ;;  %p360_p0 = scmp.lt.s32.totalorder %s354_s24, %s521_s3  ;;  %p361_p1 = scmp.lt.s32.totalorder %s359_s28, %s355_s25 }
  0x19   : > { %169 = vadd.xlane.f32.xlu0 %v168_v1  ;;  %p357_p12 = pnand %p356_p11, %p462_p5 }
  0x1a   : > { %v336_v3 = vpop.eup %335  ;;  %p362_p2 = por %p361_p1, %p360_p0 }
  0x1b   : > { %v172_v4 = vmul.f32 32.0, %v336_v3  ;;  %vm176_vm1 = vweird.f32 %v336_v3  ;;  %p358_p13 = pneg %p357_p12 }
  0x1d   : > { %v173_v5 = vsub.f32 1.0, %v172_v4  ;;  %p363_p3 = pnand %p362_p2, %p358_p13 }
  0x1f   : > { %v174_v6 = vmul.f32 %v336_v3, %v173_v5 }
  0x21   : > { %v175_v7 = vadd.f32 %v336_v3, %v174_v6 }
  0x23   : > { %v177_v8 = vsel %vm176_vm1, %v336_v3, %v175_v7 }
  0x8c   : > { %v170_v9 = vpop.xlane.xlu0 %169 }
  0x8d   : > { %v178_v10 = vmul.f32 %v177_v8, %v170_v9 }
  0x8f   : > { %v179_v11 = vsub.f32 %v166_v0, %v178_v10 }
  0x91   : > { %v180_v12 = vmul.f32 %v179_v11, %v179_v11 }
  0x93   : > { %v181_v13 = vsel %vm167_vm0, %v180_v12, 0.0 }
  0x94   : > { %182 = vadd.xlane.f32.xlu0 %v181_v13 }
 0x107   : > { %v183_v14 = vpop.xlane.xlu0 %182 }
 0x108   : > { %v184_v15 = vmul.f32 %v183_v14, %v177_v8 }
 0x10a   : > { %v185_v16 = vadd.f32 1e-05, %v184_v15 }
 0x10c   : > { %337 = vrsqrt.f32 %v185_v16  ;;  %vm192_vm3 = vweird.f32 %v185_v16 }
 0x112   : > { %v338_v17 = vpop.eup %337 }
 0x113   : > { %v187_v18 = vmul.f32 %v338_v17, %v185_v16  ;;  %vm193_vm2 = vweird.f32 %v338_v17 }
 0x114   : > { %vm194_vm4 = vmor %vm192_vm3, %vm193_vm2 }
 0x115   : > { %v188_v19 = vmul.f32 %v338_v17, %v187_v18 }
 0x117   : > { %v189_v20 = vmul.f32 0.5, %v188_v19 }
 0x119   : > { %v190_v21 = vsub.f32 1.5, %v189_v20 }
 0x11b   : > { %v191_v22 = vmul.f32 %v338_v17, %v190_v21 }
 0x11d   : > { %v195_v24 = vsel %vm194_vm4, %v338_v17, %v191_v22 }
 0x11e   : > { %v196_v25 = vmul.f32 %v195_v24, %v179_v11 }
 0x120   : > { %v201_v27 = vmul.f32 %v333_v23, %v196_v25 }
 0x122   : > { %v206_v28 = vadd.f32 %v334_v26, %v201_v27 }
 0x124   : > { %207 = vst.msk [vmem:[%s161_s17] sm:$0xff] %vm167_vm0, %v206_v28 }
 0x125   : > { %366 = shalt.err (!%p363_p3)
}
 0x126   : > { %293 = dma.vmem_to_hbm [thread:$0]  (%p462_p5), %s222_s16, 128, %s224_s19, %s209_s20  }
 0x127 PF: > { %p299_p4 = scmp.ge.s32.totalorder %s401_s15, 2  ;;  %s235_s29 = sand.u32 1, %s389_s12  }
 0x128   : > { %s236_s5 = scalar_lea.sflag [#allocation3], %s235_s29 }
 0x129   : > { %p296_p7 = pnand %p299_p4, %p466_p6 }
 0x12b   : > { %p297_p8 = pneg %p296_p7 }
 0x12d   : > { %384 = dma.done.wait (%p297_p8), %s236_s5, 128  }
 0x12e   : > { %386 = vsyncadd (%p297_p8), %s236_s5, 4294967168  ;;  %p13_p9 = scmp.ge.s32.totalorder %s449_s18, 4   ;;  %s524_s12 = smov %s393_s13 }
 0x12f   : > { %s525_s13 = smov %s397_s14  ;;  %s526_s14 = smov %s460_s21 }
 0x130   : > { %s527_s15 = smov %s449_s18  ;;  %15 = sbr.rel (!%p13_p9) target bundleno = 3 (0x3), region = 67 }
 0x135   :  { %242 = vsyncpa [#allocation3], 1 }
 0x136   :  { %244 = vsyncpa [#allocation3 + $0x1], 1 }

// kernel: transformer_forward.11
= control target key start
LH: loop header
LB: loop body
LE: loop exit
PB: predicated region body
PF: predicated region fallthrough
CT: control target
= control target key end

     0   :  { %s2466_s0 = inlined_call_operand.vmem [shape: f32[2,8,32], index: 0, kind: input, shape index: {}]   ;;  %s2467_s1 = inlined_call_operand.vmem [shape: f32[2,8,32], index: 1, kind: input, shape index: {}]   ;;  %s2468_s2 = inlined_call_operand.vmem [shape: f32[2,16,32], index: 2, kind: input, shape index: {}]   ;;  %s2469_s3 = inlined_call_operand.vmem [shape: f32[2,16,32], index: 3, kind: input, shape index: {}]   ;;  %s2470_s4 = inlined_call_operand.vmem [shape: f32[2,1,16], index: 4, kind: input, shape index: {}]   ;;  %s2471_s5 = inlined_call_operand.hbm [shape: bf16[32,32], index: 5, kind: input, shape index: {}]   ;;  %s2472_s6 = inlined_call_operand.hbm [shape: f32[1,32], index: 6, kind: input, shape index: {}]   ;;  %s2473_s7 = inlined_call_operand.hbm [shape: bf16[32,32], index: 7, kind: input, shape index: {}]   ;;  %s2474_s8 = inlined_call_operand.hbm [shape: f32[1,32], index: 8, kind: input, shape index: {}]   ;;  %s2475_s9 = inlined_call_operand.hbm [shape: bf16[32,32], index: 9, kind: input, shape index: {}]   ;;  %s2476_s10 = inlined_call_operand.hbm [shape: f32[1,32], index: 10, kind: input, shape index: {}]   ;;  %s2477_s11 = inlined_call_operand.hbm [shape: bf16[32,32], index: 11, kind: input, shape index: {}]   ;;  %s2478_s12 = inlined_call_operand.hbm [shape: f32[1,32], index: 12, kind: input, shape index: {}]   ;;  %s2479_s13 = inlined_call_operand.hbm [shape: f32[1,32], index: 13, kind: input, shape index: {}]   ;;  %s2480_s14 = inlined_call_operand.hbm [shape: f32[1,32], index: 14, kind: input, shape index: {}]   ;;  %s2481_s15 = inlined_call_operand.vmem [shape: f32[2,8,32], index: 15, kind: output, shape index: {0}]   ;;  %s2482_s16 = inlined_call_operand.hbm [shape: f32[2,8,16], index: 16, kind: output, shape index: {1}]  }
   0x1   :  { %2489 = sst [smem:[#allocation33_spill]] %s2466_s0 }
   0x2   :  { %2490 = sst [smem:[#allocation34_spill]] %s2471_s5 }
   0x3   :  { %2491 = sst [smem:[#allocation35_spill]] %s2472_s6 }
   0x4   :  { %2492 = sst [smem:[#allocation36_spill]] %s2474_s8 }
   0x5   :  { %2493 = sst [smem:[#allocation37_spill]] %s2476_s10 }
   0x6   :  { %2494 = sst [smem:[#allocation38_spill]] %s2481_s15 }
   0x7   :  { %22 = vsyncpa [#allocation3], 0 }
   0x8   :  { %23 = vsyncpa [#allocation6], 0 }
   0x9   :  { %24 = vsyncpa [#allocation9], 0 }
   0xa   :  { %25 = vsyncpa [#allocation12], 0 }
   0xb   :  { %26 = vsyncpa [#allocation15], 0 }
   0xc   :  { %27 = vsyncpa [#allocation18], 0 }
   0xd   :  { %28 = vsyncpa [#allocation4], 0 }
   0xe   :  { %30 = vsyncpa [#allocation4 + $0x1], 0  ;;  %s2205_s21 = smov 0   ;;  %s2207_s22 = smov 0  }
   0xf   :  { %s2209_s23 = smov 0   ;;  %s2211_s24 = smov 0  }
  0x10 LB: > { %2495 = sst [smem:[#allocation27_spill]] %s2087_s21  ;;  %s2226_s25 = sadd.s32 4294967295, %s2099_s24   ;;  %s2099_s24 = sphi %s2211_s24, %s2514_s24   ;;  %s2095_s23 = sphi %s2209_s23, %s2516_s23   ;;  %s2091_s22 = sphi %s2207_s22, %s2518_s22   ;;  %s2087_s21 = sphi %s2205_s21, %s2517_s21  }
  0x11   : > { %2496 = sst [smem:[#allocation28_spill]] %s2095_s23  ;;  %s1447_s26 = sadd.s32 4294967294, %s2099_s24  }
  0x12   : > { %2497 = sst [smem:[#allocation29_spill]] %s2099_s24  ;;  %s2230_s27 = sadd.s32 1, %s2099_s24  }
  0x13   : > { %2498 = sst [smem:[#allocation30_spill]] %s2230_s27  ;;  %s409_s28 = sadd.s32 1, %s2095_s23 }
  0x14   : > { %s406_s29 = ssub.s32 %s2099_s24, %s2230_s27  ;;  %p419_p0 = scmp.ne.s32.totalorder %s2095_s23, %s2091_s22 }
  0x15   : > { %p407_p1 = scmp.eq.s32.totalorder %s406_s29, 0  ;;  %p420_p2 = scmp.eq.s32.totalorder %s2226_s25, 1 }
  0x16   : > { %p425_p3 = scmp.ne.s32.totalorder %s2091_s22, %s2087_s21  ;;  %p426_p4 = scmp.eq.s32.totalorder %s1447_s26, 1 }
  0x17   : > { %s2241_s30 = scalar_select %p407_p1, %s2095_s23, %s409_s28  }
  0x18   : > { %p2243_p5 = por %p420_p2, %p419_p0  ;;  %p2247_p6 = por %p426_p4, %p425_p3 }
  0x19   : > { %2499 = sst [smem:[#allocation31_spill]] %s2241_s30  ;;  %p1448_p7 = scmp.ge.s32.totalorder %s2099_s24, 1 }
  0x1a   : > { %s2501_s17 = scalar_select %p2247_p6, 1, 0 }
  0x1b   : > { %p433_p8 = scmp.lt.s32.totalorder %s2099_s24, 3  ;;  %p1614_p9 = scmp.eq.s32.totalorder %s2226_s25, 0 }
  0x1c   : > { %2502 = sst [smem:[#allocation32_spill]] %s2501_s17  ;;  %s2101_s28 = smov [#allocation5]  }
  0x1d   : > { %p2254_p10 = pnand %p1448_p7, %p433_p8  ;;  %s2504_s6 = sld [smem:[#allocation35_spill]] }
  0x1e   : > { %s461_s29 = sshll.u32 %s2101_s28, 4  ;;  %s2505_s8 = sld [smem:[#allocation36_spill]]  ;;  %s462_s29 = int_to_ptr.vmem [resolvable:$true] %s461_s29 }
  0x1f   : > { %p1579_p11 = pneg %p2254_p10  ;;  %s2507_s10 = sld [smem:[#allocation37_spill]] }
  0x20   : > { %s2102_s21 = smov [#allocation8]   ;;  %s2103_s24 = smov [#allocation11]  }
  0x21   : > { %p2268_p12 = pnand %p1614_p9, %p1579_p11  ;;  %s487_s28 = sshll.u32 %s2102_s21, 4  ;;  %s488_s28 = int_to_ptr.vmem [resolvable:$true] %s487_s28 }
  0x22   : > { %s513_s15 = sshll.u32 %s2103_s24, 4  ;;  %s2104_s19 = smov [#allocation14]   ;;  %s514_s15 = int_to_ptr.vmem [resolvable:$true] %s513_s15 }
  0x23   : > { %s459_s26 = sshll.u32 %s2504_s6, 4  ;;  %s539_s21 = sshll.u32 %s2104_s19, 4  ;;  %s460_s26 = int_to_ptr.hbm [resolvable:$true] %s459_s26  ;;  %s540_s21 = int_to_ptr.vmem [resolvable:$true] %s539_s21 }
  0x24   : > { %s485_s27 = sshll.u32 %s2505_s8, 4  ;;  %s537_s8 = sshll.u32 %s2478_s12, 4  ;;  %s486_s27 = int_to_ptr.hbm [resolvable:$true] %s485_s27  ;;  %s538_s8 = int_to_ptr.hbm [resolvable:$true] %s537_s8 }
  0x25   : > { %s511_s6 = sshll.u32 %s2507_s10, 4  ;;  %s2508_s5 = sld [smem:[#allocation34_spill]]  ;;  %s512_s6 = int_to_ptr.hbm [resolvable:$true] %s511_s6 }
  0x26   : > { %1585 = dma.hbm_to_vmem [thread:$0]  (!%p2268_p12), %s460_s26, 16, %s462_s29, [#allocation6]  }
  0x27   : > { %1591 = dma.hbm_to_vmem [thread:$0]  (!%p2268_p12), %s486_s27, 16, %s488_s28, [#allocation9]  }
  0x28   : > { %1597 = dma.hbm_to_vmem [thread:$0]  (!%p2268_p12), %s512_s6, 16, %s514_s15, [#allocation12]  }
  0x29   : > { %1603 = dma.hbm_to_vmem [thread:$0]  (!%p2268_p12), %s538_s8, 16, %s540_s21, [#allocation15]  }
  0x2a   : > { %s2105_s27 = smov [#allocation2]   ;;  %s470_s23 = sshll.u32 %s2473_s7, 4  ;;  %s471_s23 = int_to_ptr.hbm [resolvable:$true] %s470_s23 }
  0x2b   : > { %s444_s26 = sshll.u32 %s2508_s5, 4  ;;  %s446_s29 = sshll.u32 %s2105_s27, 4  ;;  %s445_s26 = int_to_ptr.hbm [resolvable:$true] %s444_s26  ;;  %s447_s29 = int_to_ptr.vmem [resolvable:$true] %s446_s29 }
  0x2c   : > { %s2106_s6 = smov 64   ;;  %s2107_s15 = smov 4  }
  0x2d   : > { %1582 = dma.hbm_to_vmem [thread:$0]  (!%p2268_p12), %s445_s26, 256, %s447_s29, [#allocation3], %s2106_s6, %s2106_s6, %s2107_s15  }
  0x2e   : > { %s2108_s10 = smov [#allocation7]   ;;  %s496_s8 = sshll.u32 %s2475_s9, 4  ;;  %s497_s8 = int_to_ptr.hbm [resolvable:$true] %s496_s8 }
  0x2f   : > { %s472_s30 = sshll.u32 %s2108_s10, 4  ;;  %s522_s24 = sshll.u32 %s2477_s11, 4  ;;  %s473_s30 = int_to_ptr.vmem [resolvable:$true] %s472_s30  ;;  %s523_s24 = int_to_ptr.hbm [resolvable:$true] %s522_s24 }
  0x30   : > { %1588 = dma.hbm_to_vmem [thread:$0]  (!%p2268_p12), %s471_s23, 256, %s473_s30, [#allocation6], %s2106_s6, %s2106_s6, %s2107_s15  }
  0x31   : > { %s2109_s28 = smov [#allocation10]   ;;  %s2110_s26 = smov [#allocation13]  }
  0x32   : > { %s498_s5 = sshll.u32 %s2109_s28, 4  ;;  %s524_s29 = sshll.u32 %s2110_s26, 4  ;;  %s499_s5 = int_to_ptr.vmem [resolvable:$true] %s498_s5  ;;  %s525_s29 = int_to_ptr.vmem [resolvable:$true] %s524_s29 }
  0x33   : > { %1594 = dma.hbm_to_vmem [thread:$0]  (!%p2268_p12), %s497_s8, 256, %s499_s5, [#allocation9], %s2106_s6, %s2106_s6, %s2107_s15  }
  0x34   : > { %s549_s20 = sshll.u32 %s2479_s13, 4  ;;  %s561_s21 = sshll.u32 %s2480_s14, 4  ;;  %s550_s20 = int_to_ptr.hbm [resolvable:$true] %s549_s20  ;;  %s562_s21 = int_to_ptr.hbm [resolvable:$true] %s561_s21 }
  0x35   : > { %1600 = dma.hbm_to_vmem [thread:$0]  (!%p2268_p12), %s523_s24, 256, %s525_s29, [#allocation12], %s2106_s6, %s2106_s6, %s2107_s15  }
  0x36   : > { %s2111_s27 = smov [#allocation16]   ;;  %s2112_s5 = smov [#allocation17]  }
  0x37   : > { %s551_s28 = sshll.u32 %s2111_s27, 4  ;;  %s563_s8 = sshll.u32 %s2112_s5, 4  ;;  %s552_s28 = int_to_ptr.vmem [resolvable:$true] %s551_s28  ;;  %s564_s8 = int_to_ptr.vmem [resolvable:$true] %s563_s8 }
  0x38   : > { %1606 = dma.hbm_to_vmem [thread:$0]  (!%p2268_p12), %s550_s20, 16, %s552_s28, [#allocation15]  }
  0x39   : > { %1609 = dma.hbm_to_vmem [thread:$0]  (!%p2268_p12), %s562_s21, 16, %s564_s8, [#allocation18]  }
  0x3a   : > { %612 = sbr.rel (%p2254_p10) target bundleno = 1421 (0x58d), region = 80 }
  0x3f   : > { %2058 = dma.done.wait (%p1614_p9), [#allocation3], 256  }
  0x40   : > { %2060 = vsyncadd (%p1614_p9), [#allocation3], 4294967040 }
  0x41   : > { %2062 = dma.done.wait (%p1614_p9), [#allocation6], 272  }
  0x42   : > { %2064 = vsyncadd (%p1614_p9), [#allocation6], 4294967024 }
  0x43   : > { %2066 = dma.done.wait (%p1614_p9), [#allocation9], 272  }
  0x44   : > { %2068 = vsyncadd (%p1614_p9), [#allocation9], 4294967024 }
  0x45   : > { %2070 = dma.done.wait (%p1614_p9), [#allocation12], 272  }
  0x46   : > { %2072 = vsyncadd (%p1614_p9), [#allocation12], 4294967024 }
  0x47   : > { %2074 = dma.done.wait (%p1614_p9), [#allocation15], 32  }
  0x48   : > { %2076 = vsyncadd (%p1614_p9), [#allocation15], 4294967264 }
  0x49   : > { %2078 = dma.done.wait (%p1614_p9), [#allocation18], 16  }
  0x4a   : > { %2080 = vsyncadd (%p1614_p9), [#allocation18], 4294967280  ;;  %p728_p13 = scmp.lt.s32.totalorder %s2226_s25, 1  ;;  %s2509_s30 = sld [smem:[#allocation33_spill]]  ;;  %v1532_v0 = vld [vmem:[#allocation7 + $0x8] sm:$0xff]  ;;  %v1531_v1 = vld [vmem:[#allocation7] sm:$0xff] }
  0x4b   : > { %v1530_v2 = vld [vmem:[#allocation2 + $0x8] sm:$0xff]  ;;  %832 = vmatpush.bf16.msra.mxu1 %v1532_v0  ;;  %v1529_v8 = vld [vmem:[#allocation2] sm:$0xff]  ;;  %vm786_vm0 = vcmask 261120   ;;  %v1687_v15 = vld [vmem:[#allocation5] ss:$0 sm:$0xff]  ;;  %s2113_s8 = smov 112  }
  0x4c   : > { %s2344_s17 = scalar_select %p728_p13, %s2226_s25, 1  ;;  %796 = vmatpush.bf16.msra.mxu0 %v1530_v2  ;;  %v1686_v20 = vld [vmem:[#allocation8] ss:$0 sm:$0xff]  ;;  %vm885_vm1 = vcmask 64512   ;;  %v1534_v32 = vld [vmem:[#allocation10 + $0x8] sm:$0xff]  ;;  %v1533_v33 = vld [vmem:[#allocation10] sm:$0xff] }
  0x4d   : > { %s2115_s29 = smov 104   ;;  %869 = vmatpush.bf16.msra.mxu2 %v1534_v32  ;;  %vm905_vm2 = vcmask 130048   ;;  %v1689_v63 = vld [vmem:[#allocation11] ss:$0 sm:$0xff]  ;;  %s2116_s20 = smov 8   ;;  %vm1116_vm3 = vcmask 195584  }
  0x4e   : > { %s1527_s18 = sshll.u32 %s2344_s17, 4  ;;  %s2348_s6 = sshll.u32 %s2344_s17, 3 }
  0x4f   : > { %s740_s26 = scalar_lea.vmem %s2468_s2, %s1527_s18  ;;  %s745_s19 = scalar_lea.vmem %s2469_s3, %s1527_s18  ;;  %833 = vmatpush.bf16.msra.mxu1 %v1531_v1 }
  0x50   : > { %s731_s21 = scalar_lea.vmem %s2509_s30, %s2348_s6  ;;  %s735_s5 = scalar_lea.vmem %s2467_s1, %s2348_s6  ;;  %v2364_v3 = vld [vmem:[%s740_s26] sm:$0xff]  ;;  %v2366_v4 = vld [vmem:[%s740_s26 + $0x8] sm:$0xff]  ;;  %797 = vmatpush.bf16.msra.mxu0 %v1529_v8 }
  0x51   : > { %v760_v5 = vld [vmem:[%s745_s19] sm:$0xff]  ;;  %v761_v6 = vld [vmem:[%s745_s19 + $0x8] sm:$0xff]  ;;  %s748_s24 = scalar_lea.vmem %s2470_s4, %s2344_s17  ;;  %s2114_s26 = smov 120   ;;  %870 = vmatpush.bf16.msra.mxu2 %v1533_v33  ;;  %v765_v44 = vpack.c.bf16 %v2366_v4, %v2364_v3 }
  0x52   : > { %v762_v7 = vadd.f32 %v760_v5, %v2364_v3  ;;  %v2369_v9 = vld [vmem:[%s731_s21] sm:$0xff]  ;;  %v763_v10 = vadd.f32 %v761_v6, %v2366_v4  ;;  %s725_s17 = sand.u32 1, %s2091_s22   ;;  %s2117_s23 = smov 24  }
  0x53   : > { %v755_v11 = vld [vmem:[%s735_s5] sm:$0xff]  ;;  %s2412_s10 = sshll.u32 %s725_s17, 3  ;;  %s2118_s30 = smov 16  }
  0x54   : > { %v756_v12 = vadd.f32 %v755_v11, %v2369_v9  ;;  %v764_v13 = vpack.c.bf16 %v763_v10, %v762_v7  ;;  %v1688_v38 = vld [vmem:[%s748_s24] ss:$0 sm:$0xff]  ;;  %1505 = vmatmul.msk.bf16.vlgmr.msra.gmra.mxu2 %vm786_vm0, %v765_v44  ;;  %s727_s19 = scalar_lea.vmem [#allocation19], %s2412_s10  ;;  %s1524_s21 = sshll.u32 %s2226_s25, 3 }
  0x55   : > { %s1216_s5 = scalar_lea.hbm %s2482_s16, %s1524_s21  ;;  %s1203_s15 = scalar_lea.sflag [#allocation4], %s725_s17 }
  0x56   : > { %v757_v14 = vpack.c.bf16 %v756_v12, %v756_v12  ;;  %1496 = vmatmul.msk.bf16.vlgmr.msra.gmra.mxu1 %vm786_vm0, %v764_v13  ;;  %s1220_s18 = sshll.u32 %s1216_s5, 4  ;;  %s1221_s18 = int_to_ptr.hbm [resolvable:$true] %s1220_s18 }
  0x57   : > { %s2027_s24 = sshra.s32 %s1221_s18, 4  ;;  %s2028_s24 = int_to_ptr.hbm [resolvable:$true] %s2027_s24 }
  0x58   : > { %1487 = vmatmul.msk.bf16.vlgmr.msra.gmra.mxu0 %vm786_vm0, %v757_v14  ;;  %p2034_p3 = scmp.lt.s32.totalorder %s2028_s24, %s2482_s16 }
  0xd3   : > { %v835_v16 = vpop.f32.mrf.mxu1 }
  0xd4   : > { %v836_v24 = vadd.f32 %v1686_v20, %v835_v16 }
  0xd5   : > { %v799_v17 = vpop.f32.mrf.mxu0 }
  0xd6   : > { %v800_v18 = vadd.f32 %v1687_v15, %v799_v17 }
  0xd7   : > { %v872_v62 = vpop.f32.mrf.mxu2 }
  0xd8   : > { %v878_v19 = vmul.f32 0.35355338, %v800_v18  ;;  %v873_v0 = vadd.f32 %v1689_v63, %v872_v62 }
  0xda   : > { %v879_v21 = vpack.c.bf16 %v878_v19, %v878_v19 }
  0xdb   : > { %v837_v22 = vpop.f32.mrf.mxu1 }
  0xdc   : > { %992 = vrot.lane.b32.xlu2 %v879_v21, %s2113_s8  ;;  %v838_v25 = vadd.f32 %v1686_v20, %v837_v22 }
  0xdd   : > { %v801_v23 = vpop.f32.mrf.mxu0 }
  0xde   : > { %v880_v26 = vpack.c.bf16 %v838_v25, %v836_v24 }
  0xdf   : > { %v874_v1 = vpop.f32.mrf.mxu2 }
  0xe0   : > { %994 = vrot.lane.b32.xlu1 %v880_v26, %s2113_s8  ;;  %938 = vrot.lane.b32.xlu0 %v880_v26, %s2114_s26  ;;  %v890_v27 = vsel %vm885_vm1, %v880_v26, 0  ;;  %v875_v2 = vadd.f32 %v1689_v63, %v874_v1 }
  0xe1   : > { %899 = vmatpush.bf16.xpose.msra.mxu3 %v890_v27 }
  0xe2   : > { %v881_v3 = vpack.c.bf16 %v875_v2, %v873_v0  ;;  %v2119_v2 = vmov 32.0  }
  0xe4   : > { %1047 = vrot.lane.b32.xlu2 %v879_v21, %s2115_s29  ;;  %928 = vmatpush.bf16.msrb.mxu0 %v881_v3 }
  0xe8   : > { %1049 = vrot.lane.b32.xlu1 %v880_v26, %s2115_s29  ;;  %935 = vrot.lane.b32.xlu0 %v879_v21, %s2114_s26 }
  0xe9   : > { %1506 = vmatmul.msk.bf16.vlgmr.msra.gmra.mxu3 %vm885_vm1, %v879_v21 }
 0x136   : > { %v993_v34 = vpop.permute.xlu2 %992 }
 0x13e   : > { %v1048_v39 = vpop.permute.xlu2 %1047 }
 0x152   : > { %v995_v28 = vpop.permute.xlu1 %994  ;;  %v939_v29 = vpop.permute.xlu0 %938 }
 0x153   : > { %v944_v30 = vsel %vm885_vm1, %v939_v29, 0  ;;  %v1000_v31 = vsel %vm885_vm1, %v995_v28, 0 }
 0x154   : > { %953 = vmatpush.bf16.xpose.msrb.mxu1 %v944_v30  ;;  %1009 = vmatpush.bf16.xpose.msrb.mxu3 %v1000_v31 }
 0x15a   : > { %v1050_v35 = vpop.permute.xlu1 %1049  ;;  %v936_v36 = vpop.permute.xlu0 %935 }
 0x15b   : > { %v1055_v37 = vsel %vm885_vm1, %v1050_v35, 0  ;;  %1508 = vmatmul.msk.bf16.vlgmr.msrb.gmra.mxu1 %vm885_vm1, %v936_v36  ;;  %1510 = vmatmul.msk.bf16.vlgmr.msrb.gmra.mxu3 %vm885_vm1, %v993_v34 }
 0x15c   : > { %1064 = vmatpush.bf16.xpose.msra.mxu1 %v1055_v37 }
 0x16b   : > { %1512 = vmatmul.msk.bf16.vlgmr.msra.gmra.mxu1 %vm885_vm1, %v1048_v39 }
 0x16c   : > { %v901_v40 = vpop.f32.mrf.mxu3 }
 0x16d   : > { %v902_v41 = vadd.f32 %v1688_v38, %v901_v40 }
 0x16f   : > { %v906_v42 = vsel %vm905_vm2, %v902_v41, -inf }
 0x170   : > { %907 = vmax.xlane.f32.xlu1 %v906_v42 }
 0x174   : > { %v903_v43 = vpop.f32.mrf.mxu3 }
 0x1d8   : > { %v955_v45 = vpop.f32.mrf.mxu1 }
 0x1d9   : > { %v956_v46 = vadd.f32 %v1688_v38, %v955_v45 }
 0x1db   : > { %v959_v47 = vsel %vm905_vm2, %v956_v46, -inf }
 0x1dc   : > { %960 = vmax.xlane.f32.xlu0 %v959_v47 }
 0x1de   : > { %v1011_v48 = vpop.f32.mrf.mxu3 }
 0x1df   : > { %v1012_v58 = vadd.f32 %v1688_v38, %v1011_v48 }
 0x1e0   : > { %v957_v49 = vpop.f32.mrf.mxu1 }
 0x1e1   : > { %v1015_v61 = vsel %vm905_vm2, %v1012_v58, -inf }
 0x1e3   : > { %v908_v50 = vpop.xlane.xlu1 %907 }
 0x1e4   : > { %v909_v51 = vsub.f32 %v902_v41, %v908_v50 }
 0x1e6   : > { %v910_v52 = vmul.f32 1.442695, %v909_v51  ;;  %v1013_v53 = vpop.f32.mrf.mxu3  ;;  %v1536_v51 = vld [vmem:[#allocation13 + $0x8] sm:$0xff] }
 0x1e7   : > { %1148 = vmatpush.bf16.msra.mxu3 %v1536_v51 }
 0x1e8   : > { %1693 = vpow2.f32 %v910_v52  ;;  %v1066_v54 = vpop.f32.mrf.mxu1  ;;  %v1535_v52 = vld [vmem:[#allocation13] sm:$0xff] }
 0x1e9   : > { %v1067_v55 = vadd.f32 %v1688_v38, %v1066_v54 }
 0x1eb   : > { %v1070_v56 = vsel %vm905_vm2, %v1067_v55, -inf  ;;  %1149 = vmatpush.bf16.msra.mxu3 %v1535_v52 }
 0x1ec   : > { %1071 = vmax.xlane.f32.xlu2 %v1070_v56 }
 0x1ee   : > { %v1694_v57 = vpop.eup %1693 }
 0x1ef   : > { %v912_v59 = vsel %vm905_vm2, %v1694_v57, 0.0 }
 0x1f0   : > { %913 = vadd.xlane.f32.xlu1 %v912_v59  ;;  %v1068_v60 = vpop.f32.mrf.mxu1 }
 0x1f1   : > { %v1690_v60 = vld [vmem:[#allocation14] ss:$0 sm:$0xff] }
 0x1f4   : > { %1016 = vmax.xlane.f32.xlu2 %v1015_v61 }
 0x20c   : > { %972 = vrot.lane.b32.xlu2 %v881_v3, %s2114_s26  ;;  %s2029_s26 = scalar_lea.hbm %s2028_s24, 8 }
 0x20d   : > { %p2030_p0 = scmp.ne.s32.totalorder %s2028_s24, %s2029_s26 }
 0x20f   : > { %p2031_p1 = pnand %p2030_p0, %p2243_p5 }
 0x211   : > { %p2032_p2 = pneg %p2031_p1 }
 0x24f   : > { %v961_v4 = vpop.xlane.xlu0 %960 }
 0x250   : > { %v962_v5 = vsub.f32 %v956_v46, %v961_v4 }
 0x252   : > { %v963_v6 = vmul.f32 1.442695, %v962_v5 }
 0x254   : > { %1695 = vpow2.f32 %v963_v6 }
 0x25a   : > { %v1696_v7 = vpop.eup %1695 }
 0x25b   : > { %v965_v8 = vsel %vm905_vm2, %v1696_v7, 0.0 }
 0x25c   : > { %966 = vadd.xlane.f32.xlu0 %v965_v8 }
 0x25f   : > { %v1072_v10 = vpop.xlane.xlu2 %1071 }
 0x260   : > { %v1073_v11 = vsub.f32 %v1067_v55, %v1072_v10 }
 0x262   : > { %v1074_v12 = vmul.f32 1.442695, %v1073_v11 }
 0x263   : > { %v914_v13 = vpop.xlane.xlu1 %913 }
 0x264   : > { %1697 = vpow2.f32 %v1074_v12 }
 0x265   : > { %1699 = vrcp.f32 %v914_v13 }
 0x267   : > { %v1017_v14 = vpop.xlane.xlu2 %1016 }
 0x268   : > { %v1018_v15 = vsub.f32 %v1012_v58, %v1017_v14 }
 0x26a   : > { %v1698_v16 = vpop.eup %1697  ;;  %v1019_v17 = vmul.f32 1.442695, %v1018_v15 }
 0x26b   : > { %v1700_v18 = vpop.eup %1699  ;;  %v1076_v19 = vsel %vm905_vm2, %v1698_v16, 0.0 }
 0x26c   : > { %v916_v20 = vmul.f32 %v1700_v18, %v1694_v57  ;;  %1701 = vpow2.f32 %v1019_v17  ;;  %1077 = vadd.xlane.f32.xlu0 %v1076_v19 }
 0x26e   : > { %v917_v21 = vpack.c.bf16 %v916_v20, %v916_v20 }
 0x26f   : > { %v973_v24 = vpop.permute.xlu2 %972 }
 0x270   : > { %1507 = vmatmul.msk.bf16.vlgmr.msrb.gmra.mxu0 %vm905_vm2, %v917_v21  ;;  %985 = vmatpush.bf16.msrb.mxu2 %v973_v24 }
 0x272   : > { %v1702_v22 = vpop.eup %1701 }
 0x273   : > { %v1021_v23 = vsel %vm905_vm2, %v1702_v22, 0.0 }
 0x274   : > { %1022 = vadd.xlane.f32.xlu1 %v1021_v23 }
 0x280   : > { %1082 = vrot.lane.b32.xlu0 %v881_v3, %s2115_s29 }
 0x28d   : > { %1027 = vrot.lane.b32.xlu1 %v881_v3, %s2113_s8  ;;  %s1218_s8 = sshll.u32 %s727_s19, 4  ;;  %s1219_s8 = int_to_ptr.vmem [resolvable:$true] %s1218_s8 }
 0x2cf   : > { %v967_v25 = vpop.xlane.xlu0 %966 }
 0x2d0   : > { %1703 = vrcp.f32 %v967_v25 }
 0x2d6   : > { %v1704_v26 = vpop.eup %1703 }
 0x2d7   : > { %v969_v27 = vmul.f32 %v1704_v26, %v1696_v7 }
 0x2d9   : > { %v970_v28 = vpack.c.bf16 %v969_v27, %v969_v27  ;;  %v991_v34 = vadd.f32 %v969_v27, %v916_v20 }
 0x2db   : > { %1509 = vmatmul.msk.bf16.vlgmr.msrb.gmra.mxu2 %vm905_vm2, %v970_v28 }
 0x2df   : > { %v1078_v29 = vpop.xlane.xlu0 %1077 }
 0x2e0   : > { %1705 = vrcp.f32 %v1078_v29 }
 0x2e6   : > { %v1706_v31 = vpop.eup %1705 }
 0x2e7   : > { %v1023_v30 = vpop.xlane.xlu1 %1022  ;;  %v1080_v36 = vmul.f32 %v1706_v31, %v1698_v16 }
 0x2e8   : > { %1707 = vrcp.f32 %v1023_v30 }
 0x2e9   : > { %v1081_v40 = vpack.c.bf16 %v1080_v36, %v1080_v36  ;;  %1709 = vrcp.f32 %v2119_v2 }
 0x2ed   : > { %v930_v32 = vpop.f32.mrf.mxu0 }
 0x2ee   : > { %v1708_v33 = vpop.eup %1707 }
 0x2ef   : > { %v1025_v35 = vmul.f32 %v1708_v33, %v1702_v22  ;;  %v1710_v3 = vpop.eup %1709 }
 0x2f0   : > { %v1160_v4 = vmul.f32 32.0, %v1710_v3  ;;  %vm1164_vm4 = vweird.f32 %v1710_v3 }
 0x2f1   : > { %v1046_v37 = vadd.f32 %v1025_v35, %v991_v34  ;;  %v1026_v44 = vpack.c.bf16 %v1025_v35, %v1025_v35 }
 0x2f2   : > { %v1083_v38 = vpop.permute.xlu0 %1082  ;;  %v1161_v5 = vsub.f32 1.0, %v1160_v4 }
 0x2f3   : > { %v1101_v39 = vadd.f32 %v1080_v36, %v1046_v37  ;;  %1095 = vmatpush.bf16.msra.mxu2 %v1083_v38 }
 0x2f4   : > { %v1162_v6 = vmul.f32 %v1710_v3, %v1161_v5 }
 0x2f5   : > { %v1196_v41 = vmul.f32 0.25, %v1101_v39  ;;  %v932_v42 = vpop.f32.mrf.mxu0 }
 0x2f6   : > { %1513 = vmatmul.msk.bf16.vlgmr.msra.gmra.mxu2 %vm905_vm2, %v1081_v40  ;;  %v1163_v7 = vadd.f32 %v1710_v3, %v1162_v6 }
 0x2f7   : > { %1197 = vst.msk [vmem:[%s727_s19] sm:$0xff] %vm905_vm2, %v1196_v41 }
 0x2f8   : > { %v1165_v8 = vsel %vm1164_vm4, %v1710_v3, %v1163_v7 }
 0x2ff   : > { %v1028_v43 = vpop.permute.xlu1 %1027 }
 0x300   : > { %1040 = vmatpush.bf16.msra.mxu0 %v1028_v43 }
 0x303   : > { %1511 = vmatmul.msk.bf16.vlgmr.msra.gmra.mxu0 %vm905_vm2, %v1026_v44 }
 0x35e   : > { %v987_v45 = vpop.f32.mrf.mxu2 }
 0x35f   : > { %1103 = vrot.lane.b32.xlu2 %v987_v45, %s2116_s20  ;;  %s2033_s20 = scalar_lea.hbm %s2482_s16, 16 }
 0x360   : > { %p2035_p4 = scmp.lt.s32.totalorder %s2033_s20, %s2029_s26 }
 0x362   : > { %p2036_p7 = por %p2035_p4, %p2034_p3 }
 0x364   : > { %p2037_p8 = pnand %p2036_p7, %p2032_p2 }
 0x366   : > { %v989_v46 = vpop.f32.mrf.mxu2 }
 0x379   : > { %v1097_v47 = vpop.f32.mrf.mxu2 }
 0x37a   : > { %1111 = vrot.lane.b32.xlu2 %v1097_v47, %s2117_s23 }
 0x380   : > { %v1042_v48 = vpop.f32.mrf.mxu0 }
 0x381   : > { %v1099_v49 = vpop.f32.mrf.mxu2  ;;  %1107 = vrot.lane.b32.xlu0 %v1042_v48, %s2118_s30 }
 0x388   : > { %v1044_v50 = vpop.f32.mrf.mxu0 }
 0x3b9   : > { %v1104_v53 = vpop.permute.xlu2 %1103 }
 0x3ba   : > { %v1114_v54 = vsel %vm885_vm1, %v930_v32, %v1104_v53 }
 0x3d4   : > { %v1112_v56 = vpop.permute.xlu2 %1111 }
 0x3f3   : > { %v1108_v55 = vpop.permute.xlu0 %1107 }
 0x3f4   : > { %v1115_v57 = vsel %vm905_vm2, %v1114_v54, %v1108_v55 }
 0x3f5   : > { %v1117_v58 = vsel %vm1116_vm3, %v1115_v57, %v1112_v56 }
 0x3f6   : > { %v1118_v59 = vpack.c.bf16 %v1117_v58, %v1117_v58 }
 0x3f8   : > { %1522 = vmatmul.msk.bf16.vlgmr.msra.gmra.mxu3 %vm786_vm0, %v1118_v59 }
 0x47b   : > { %v1151_v61 = vpop.f32.mrf.mxu3 }
 0x47c   : > { %v1152_v62 = vadd.f32 %v1690_v60, %v1151_v61 }
 0x47e   : > { %v1155_v63 = vadd.f32 %v1152_v62, %v2369_v9 }
 0x480   : > { %v1156_v0 = vsel %vm786_vm0, %v1155_v63, 0.0 }
 0x481   : > { %1157 = vadd.xlane.f32.xlu1 %v1156_v0 }
 0x483   : > { %v1153_v1 = vpop.f32.mrf.mxu3 }
 0x4f4   : > { %v1158_v10 = vpop.xlane.xlu1 %1157 }
 0x4f5   : > { %v1166_v11 = vmul.f32 %v1165_v8, %v1158_v10 }
 0x4f7   : > { %v1167_v9 = vsub.f32 %v1155_v63, %v1166_v11 }
 0x4f9   : > { %v1168_v12 = vmul.f32 %v1167_v9, %v1167_v9 }
 0x4fb   : > { %v1169_v13 = vsel %vm786_vm0, %v1168_v12, 0.0 }
 0x4fc   : > { %1170 = vadd.xlane.f32.xlu0 %v1169_v13 }
 0x4fd   : > { %2040 = shalt.err (!%p2037_p8)
}
 0x4fe   : > { %1577 = dma.vmem_to_hbm [thread:$0]  (%p2243_p5), %s1219_s8, 128, %s1221_s18, %s1203_s15   ;;  %v1691_v23 = vld [vmem:[#allocation16] ss:$0 sm:$0xff]  ;;  %v1692_v25 = vld [vmem:[#allocation17] ss:$0 sm:$0xff] }
 0x4ff   : > { %s2510_s10 = sld [smem:[#allocation38_spill]] }
 0x505   : > { %s752_s19 = scalar_lea.vmem %s2510_s10, %s2348_s6 }
 0x56f   : > { %v1171_v14 = vpop.xlane.xlu0 %1170 }
 0x570   : > { %v1172_v15 = vmul.f32 %v1171_v14, %v1165_v8 }
 0x572   : > { %v1173_v16 = vadd.f32 1e-05, %v1172_v15 }
 0x574   : > { %1711 = vrsqrt.f32 %v1173_v16  ;;  %vm1180_vm6 = vweird.f32 %v1173_v16 }
 0x57a   : > { %v1712_v17 = vpop.eup %1711 }
 0x57b   : > { %v1175_v18 = vmul.f32 %v1712_v17, %v1173_v16  ;;  %vm1181_vm5 = vweird.f32 %v1712_v17 }
 0x57c   : > { %vm1182_vm7 = vmor %vm1180_vm6, %vm1181_vm5 }
 0x57d   : > { %v1176_v19 = vmul.f32 %v1712_v17, %v1175_v18 }
 0x57f   : > { %v1177_v20 = vmul.f32 0.5, %v1176_v19 }
 0x581   : > { %v1178_v21 = vsub.f32 1.5, %v1177_v20 }
 0x583   : > { %v1179_v22 = vmul.f32 %v1712_v17, %v1178_v21 }
 0x585   : > { %v1183_v24 = vsel %vm1182_vm7, %v1712_v17, %v1179_v22 }
 0x586   : > { %v1184_v26 = vmul.f32 %v1183_v24, %v1167_v9 }
 0x588   : > { %v1189_v27 = vmul.f32 %v1691_v23, %v1184_v26 }
 0x58a   : > { %v1194_v28 = vadd.f32 %v1692_v25, %v1189_v27 }
 0x58c   : > { %1195 = vst.msk [vmem:[%s752_s19] sm:$0xff] %vm786_vm0, %v1194_v28 }
 0x58d PF: > { %s2511_s21 = sld [smem:[#allocation29_spill]] }
 0x58e   : > { %s2512_s27 = sld [smem:[#allocation27_spill]] }
 0x593   : > { %p1634_p5 = scmp.ge.s32.totalorder %s2511_s21, 2 }
 0x594   : > { %s1239_s5 = sand.u32 1, %s2512_s27  }
 0x595   : > { %p1611_p9 = pnand %p1634_p5, %p2247_p6  ;;  %s1240_s8 = scalar_lea.sflag [#allocation4], %s1239_s5 }
 0x597   : > { %p1612_p10 = pneg %p1611_p9 }
 0x599   : > { %2082 = dma.done.wait (%p1612_p10), %s1240_s8, 128  }
 0x59a   : > { %2084 = vsyncadd (%p1612_p10), %s1240_s8, 4294967168  ;;  %s2514_s24 = sld [smem:[#allocation30_spill]]  ;;  %s2517_s21 = smov %s2091_s22 }
 0x59b   : > { %s2515_s18 = sld [smem:[#allocation28_spill]] }
 0x59c   : > { %s2516_s23 = sld [smem:[#allocation31_spill]] }
 0x5a0   : > { %p33_p11 = scmp.ge.s32.totalorder %s2514_s24, 4  }
 0x5a1   : > { %s2518_s22 = smov %s2515_s18 }
 0x5a2   :  { %35 = sbr.rel (!%p33_p11) target bundleno = 16 (0x10), region = 180 }
 0x5a7   :  { %1246 = vsyncpa [#allocation3], 1 }
 0x5a8   :  { %1248 = vsyncpa [#allocation3 + $0x1], 1 }
 0x5a9   :  { %1249 = vsyncpa [#allocation6], 1 }
 0x5aa   :  { %1250 = vsyncpa [#allocation9], 1 }
 0x5ab   :  { %1251 = vsyncpa [#allocation12], 1 }
 0x5ac   :  { %1252 = vsyncpa [#allocation15], 1 }
 0x5ad   :  { %1253 = vsyncpa [#allocation18], 1 }
 0x5ae   :  { %1254 = vsyncpa [#allocation4], 1 }
 0x5af   :  { %1256 = vsyncpa [#allocation4 + $0x1], 1 }

// kernel: transformer_forward.12
= control target key start
LH: loop header
LB: loop body
LE: loop exit
PB: predicated region body
PF: predicated region fallthrough
CT: control target
= control target key end

     0   :  { %s570_s24 = smov 0   ;;  %s628_s0 = inlined_call_operand.vmem [shape: f32[16,32], index: 0, kind: input, shape index: {}]   ;;  %s629_s1 = inlined_call_operand.vmem [shape: bf16[32,64], index: 1, kind: input, shape index: {}]   ;;  %s630_s2 = inlined_call_operand.vmem [shape: f32[1,64], index: 2, kind: input, shape index: {}]   ;;  %s631_s3 = inlined_call_operand.vmem [shape: bf16[64,32], index: 3, kind: input, shape index: {}]   ;;  %s632_s4 = inlined_call_operand.vmem [shape: f32[1,32], index: 4, kind: input, shape index: {}]   ;;  %s633_s5 = inlined_call_operand.vmem [shape: f32[1,32], index: 5, kind: input, shape index: {}]   ;;  %s634_s6 = inlined_call_operand.vmem [shape: f32[1,32], index: 6, kind: input, shape index: {}]   ;;  %s635_s7 = inlined_call_operand.vmem [shape: f32[16,32], index: 7, kind: output, shape index: {}]  }
   0x1 LB: > { %s463_s25 = sadd.s32 4294967295, %s527_s24   ;;  %p467_p0 = scmp.ge.s32.totalorder %s527_s24, 1  ;;  %s527_s24 = sphi %s570_s24, %s17_s24  }
   0x2   : > { %p236_p1 = scmp.lt.s32.totalorder %s527_s24, 3 }
   0x4   : > { %p237_p2 = pnand %p467_p0, %p236_p1 }
   0x5   : > { %p266_p3 = scmp.lt.s32.totalorder (!%p237_p2), %s463_s25, 1 }
   0x6   : > { %240 = sbr.rel (%p237_p2) target bundleno = 550 (0x226), region = 48 }
   0xb   : > { %v499_v0 = vld [vmem:[%s629_s1 + $0x8] sm:$0xff]  ;;  %v503_v1 = vld [vmem:[%s631_s3 + $0x18] sm:$0xff]  ;;  %v498_v2 = vld [vmem:[%s629_s1] sm:$0xff]  ;;  %s637_s25 = smov (!%p266_p3, %s463_s25), 1  ;;  %vm297_vm0 = vcmask 261120   ;;  %vm352_vm1 = vcmask 523264  }
   0xc   : > { %307 = vmatpush.bf16.msra.mxu0 %v499_v0  ;;  %360 = vmatpush.bf16.msra.mxu1 %v503_v1  ;;  %v502_v3 = vld [vmem:[%s631_s3 + $0x10] sm:$0xff]  ;;  %s468_s11 = sshll.u32 %s637_s25, 3  ;;  %v501_v6 = vld [vmem:[%s631_s3 + $0x8] sm:$0xff]  ;;  %v500_v7 = vld [vmem:[%s631_s3] sm:$0xff]  ;;  %v529_v20 = vmov 32.0  }
   0xd   : > { %s269_s14 = scalar_lea.vmem %s628_s0, %s468_s11  ;;  %v513_v8 = vld [vmem:[%s630_s2] ss:$0 sm:$0xff]  ;;  %517 = vrcp.f32 %v529_v20  ;;  %s273_s8 = scalar_lea.vmem %s635_s7, %s468_s11 }
   0xe   : > { %v275_v4 = vld [vmem:[%s269_s14] sm:$0xff] }
   0xf   : > { %v276_v5 = vpack.c.bf16 %v275_v4, %v275_v4  ;;  %v514_v14 = vld [vmem:[%s632_s4] ss:$0 sm:$0xff] }
  0x10   : > { %308 = vmatpush.bf16.msra.mxu0 %v498_v2  ;;  %361 = vmatpush.bf16.msra.mxu1 %v502_v3  ;;  %v515_v41 = vld [vmem:[%s633_s5] ss:$0 sm:$0xff] }
  0x11   : > { %v516_v43 = vld [vmem:[%s634_s6] ss:$0 sm:$0xff] }
  0x13   : > { %478 = vmatmul.msk.bf16.vlgmr.msra.gmra.mxu0 %vm297_vm0, %v276_v5  ;;  %v518_v21 = vpop.eup %517 }
  0x14   : > { %362 = vmatpush.bf16.msra.mxu1 %v501_v6  ;;  %v374_v22 = vmul.f32 32.0, %v518_v21  ;;  %vm378_vm2 = vweird.f32 %v518_v21 }
  0x16   : > { %v375_v23 = vsub.f32 1.0, %v374_v22 }
  0x18   : > { %363 = vmatpush.bf16.msra.mxu1 %v500_v7  ;;  %v376_v24 = vmul.f32 %v518_v21, %v375_v23 }
  0x1a   : > { %v377_v25 = vadd.f32 %v518_v21, %v376_v24 }
  0x1c   : > { %v379_v26 = vsel %vm378_vm2, %v518_v21, %v377_v25 }
  0x90   : > { %v310_v9 = vpop.f32.mrf.mxu0 }
  0x91   : > { %v311_v10 = vadd.f32 %v513_v8, %v310_v9 }
  0x93   : > { %v314_v11 = vmax.f32 %v311_v10, 0.0 }
  0x95   : > { %v315_v12 = vpack.c.bf16 %v314_v11, %v314_v11 }
  0x97   : > { %495 = vmatmul.msk.bf16.vlgmr.msra.gmra.mxu1 %vm352_vm1, %v315_v12 }
  0x98   : > { %v312_v13 = vpop.f32.mrf.mxu0 }
 0x114   : > { %v365_v15 = vpop.f32.mrf.mxu1 }
 0x115   : > { %v366_v16 = vadd.f32 %v514_v14, %v365_v15 }
 0x117   : > { %v369_v17 = vadd.f32 %v366_v16, %v275_v4 }
 0x119   : > { %v370_v18 = vsel %vm297_vm0, %v369_v17, 0.0 }
 0x11a   : > { %371 = vadd.xlane.f32.xlu0 %v370_v18 }
 0x11c   : > { %v367_v19 = vpop.f32.mrf.mxu1 }
 0x18d   : > { %v372_v27 = vpop.xlane.xlu0 %371 }
 0x18e   : > { %v380_v28 = vmul.f32 %v379_v26, %v372_v27 }
 0x190   : > { %v381_v29 = vsub.f32 %v369_v17, %v380_v28 }
 0x192   : > { %v382_v30 = vmul.f32 %v381_v29, %v381_v29 }
 0x194   : > { %v383_v31 = vsel %vm297_vm0, %v382_v30, 0.0 }
 0x195   : > { %384 = vadd.xlane.f32.xlu0 %v383_v31 }
 0x208   : > { %v385_v32 = vpop.xlane.xlu0 %384 }
 0x209   : > { %v386_v33 = vmul.f32 %v385_v32, %v379_v26 }
 0x20b   : > { %v387_v34 = vadd.f32 1e-05, %v386_v33 }
 0x20d   : > { %519 = vrsqrt.f32 %v387_v34  ;;  %vm394_vm4 = vweird.f32 %v387_v34 }
 0x213   : > { %v520_v35 = vpop.eup %519 }
 0x214   : > { %v389_v36 = vmul.f32 %v520_v35, %v387_v34  ;;  %vm395_vm3 = vweird.f32 %v520_v35 }
 0x215   : > { %vm396_vm5 = vmor %vm394_vm4, %vm395_vm3 }
 0x216   : > { %v390_v37 = vmul.f32 %v520_v35, %v389_v36 }
 0x218   : > { %v391_v38 = vmul.f32 0.5, %v390_v37 }
 0x21a   : > { %v392_v39 = vsub.f32 1.5, %v391_v38 }
 0x21c   : > { %v393_v40 = vmul.f32 %v520_v35, %v392_v39 }
 0x21e   : > { %v397_v42 = vsel %vm396_vm5, %v520_v35, %v393_v40 }
 0x21f   : > { %v398_v44 = vmul.f32 %v397_v42, %v381_v29 }
 0x221   : > { %v403_v45 = vmul.f32 %v515_v41, %v398_v44 }
 0x223   : > { %v408_v46 = vadd.f32 %v516_v43, %v403_v45 }
 0x225   : > { %409 = vst.msk [vmem:[%s273_s8] sm:$0xff] %vm297_vm0, %v408_v46 }
 0x226 PF: > { %s17_s24 = sadd.s32 1, %s527_s24  }
 0x227   : > { %p14_p4 = scmp.ge.s32.totalorder %s17_s24, 4  }
 0x229   :  { %16 = sbr.rel (!%p14_p4) target bundleno = 1 (0x1), region = 78 }

</bundles_post_ra>
